<compile_context>
chip_gen: v6e
topology: v6e:2x2x1
jax: 0.10.0
libtpu: 0.0.40
codegen_flags: <defaults>
</compile_context>

<pallas_src>
import math
import functools

import jax
import jax.numpy as jnp
from jax.experimental import pallas as pl
from jax.experimental.pallas import tpu as pltpu


def encoder_block_kernel(
    x_ref, pad_ref, w_ref, vec_ref,   # inputs
    o_ref,                            # output
    attn_scr,                         # VMEM scratch (N, D) f32
    *, heads: int, compute_dtype, eps: float = 1e-5,
):
    x = x_ref[0].astype(jnp.float32)          # (N, D) raw input (used as query)
    pad = pad_ref[0]                          # (1, N) f32, 1.0 = valid, 0.0 = padded
    n, d = x.shape
    d_k = d // heads
    cdt = compute_dtype

    # ---- packed params ----
    W = w_ref[...]                            # (D, 6D) compute_dtype, [wq|wk|wv|wo|w1|w2]
    V = vec_ref[...].astype(jnp.float32)      # (10, D) f32
    ln1_g, ln1_b = V[0:1], V[1:2]
    ln2_g, ln2_b = V[2:3], V[3:4]
    bq, bk, bv, bo = V[4:5], V[5:6], V[6:7], V[7:8]
    bf1, bf2 = V[8:9], V[9:10]
    wq = W[:, 0:d]
    wkv = W[:, d:3 * d]                       # fused K|V projection weight (D, 2D)
    wo = W[:, 3 * d:4 * d]
    w1 = W[:, 4 * d:5 * d]
    w2 = W[:, 5 * d:6 * d]

    def layer_norm(v, g, b):
        mu = jnp.mean(v, axis=-1, keepdims=True)
        var = jnp.mean((v - mu) ** 2, axis=-1, keepdims=True)
        return (v - mu) * jax.lax.rsqrt(var + eps) * g + b

    # --- LayerNorm1: K/V come from ln1(x); query uses the raw input, as in the
    #     PyTorch forward (query bound before layer_norm1) ---
    ln1 = layer_norm(x, ln1_g, ln1_b)

    q = jnp.dot(x.astype(cdt), wq, preferred_element_type=jnp.float32) + bq
    kv = jnp.dot(ln1.astype(cdt), wkv, preferred_element_type=jnp.float32)
    k = kv[:, :d] + bk
    v = kv[:, d:] + bv

    # --- attention mask built ONCE: causal AND key-padding ---
    row = jax.lax.broadcasted_iota(jnp.int32, (n, n), 0)
    col = jax.lax.broadcasted_iota(jnp.int32, (n, n), 1)
    maskf = jnp.where(jnp.logical_and(row >= col, pad > 0.0), 1.0, 0.0)   # (N, N)
    neg_bias = (1.0 - maskf) * (-1e9)                                     # additive fill

    # --- stack heads along a leading (major) axis: no lane-splitting reshape ---
    def split_heads(t):
        return jnp.stack([t[:, h * d_k:(h + 1) * d_k] for h in range(heads)], axis=0)

    q3 = split_heads(q).astype(cdt)           # (H, N, d_k)
    k3 = split_heads(k).astype(cdt)
    v3 = split_heads(v).astype(cdt)

    # scores: batched contraction over d_k (no explicit transpose)
    scores = jax.lax.dot_general(
        q3, k3, dimension_numbers=(((2,), (2,)), ((0,), (0,))),
        preferred_element_type=jnp.float32)                               # (H, N, N)
    scores = scores * (1.0 / math.sqrt(d_k)) + neg_bias[None]

    # softmax in f32 (single batched pass over all heads); denominator >= 1 after
    # max-subtraction, so no NaN guard needed.
    m = jnp.max(scores, axis=-1, keepdims=True)
    e = jnp.exp(scores - m)
    p = e * pl.reciprocal(jnp.sum(e, axis=-1, keepdims=True), approx=True)
    p = p * maskf[None]                       # == masked_fill(~mask, 0.0)

    ctx = jax.lax.dot_general(
        p.astype(cdt), v3, dimension_numbers=(((2,), (1,)), ((0,), (0,))),
        preferred_element_type=jnp.float32)                               # (H, N, d_k)

    # write heads into a fixed (N, D) buffer instead of lane-axis concatenate
    for h in range(heads):
        attn_scr[:, h * d_k:(h + 1) * d_k] = ctx[h]

    attn = jnp.dot(attn_scr[...].astype(cdt), wo,
                   preferred_element_type=jnp.float32) + bo

    # --- residual + LayerNorm2 + FFN + residual (matches the torch forward) ---
    m_out = attn + ln1
    ln2 = layer_norm(m_out, ln2_g, ln2_b)
    h1 = jnp.maximum(
        jnp.dot(ln2.astype(cdt), w1, preferred_element_type=jnp.float32) + bf1, 0.0)
    ffn = jnp.dot(h1.astype(cdt), w2, preferred_element_type=jnp.float32) + bf2
    o_ref[0] = (ffn + ln2).astype(o_ref.dtype)


def encoder_block(x, padding_mask, params, *, heads, compute_dtype=jnp.bfloat16):
    """x: (B, N, D) float32, padding_mask: (B, N) float32 {0,1}."""
    B, N, D = x.shape
    assert D % heads == 0
    pad3 = padding_mask.reshape(B, 1, N).astype(jnp.float32)

    # Pack weights (lane-dense, bf16 for the MXU) and vectors (f32).
    w_packed = jnp.concatenate(
        [params["wq"], params["wk"], params["wv"],
         params["wo"], params["w1"], params["w2"]], axis=1).astype(compute_dtype)
    vec_packed = jnp.concatenate(
        [params["ln1_g"], params["ln1_b"], params["ln2_g"], params["ln2_b"],
         params["bq"], params["bk"], params["bv"], params["bo"],
         params["b1"], params["b2"]], axis=0).astype(jnp.float32)
    n_vec = vec_packed.shape[0]

    kernel = functools.partial(encoder_block_kernel, heads=heads,
                               compute_dtype=compute_dtype)

    # Advisory cost estimate for XLA scheduling around the custom call.
    flops = B * (12 * N * D * D + 4 * N * N * D)
    cost = pl.CostEstimate(
        flops=int(flops),
        transcendentals=int(B * heads * N * N),
        bytes_accessed=int(2 * B * N * D * 4 + B * N * 4
                           + w_packed.size * 2 + vec_packed.size * 4))

    # Explicit VMEM budget: weights (<=2 copies) + double-buffered act blocks +
    # in-kernel temporaries (q/k/v/scores/p/ffn) + scratch, with 2x headroom.
    est = (2 * w_packed.size * 2 + 2 * vec_packed.size * 4
           + 2 * 2 * N * D * 4 + N * D * 4
           + (10 * N * D + 3 * heads * N * N) * 4)
    vmem_limit = int(min(64 * 2**20, max(16 * 2**20, 2 * est)))

    def build(single_buffer_weights):
        if single_buffer_weights:
            # weights are grid-invariant -> single-buffer them (halves weight VMEM)
            w_spec = pl.BlockSpec((D, 6 * D), lambda b: (0, 0),
                                  pipeline_mode=pl.Buffered(1))
            vec_spec = pl.BlockSpec((n_vec, D), lambda b: (0, 0),
                                    pipeline_mode=pl.Buffered(1))
        else:
            w_spec = pl.BlockSpec((D, 6 * D), lambda b: (0, 0))
            vec_spec = pl.BlockSpec((n_vec, D), lambda b: (0, 0))

        batch3 = pl.BlockSpec((1, N, D), lambda b: (b, 0, 0))
        pad_spec = pl.BlockSpec((1, 1, N), lambda b: (b, 0, 0))

        return pl.pallas_call(
            kernel,
            out_shape=jax.ShapeDtypeStruct((B, N, D), x.dtype),
            grid_spec=pltpu.PrefetchScalarGridSpec(
                num_scalar_prefetch=0,
                grid=(B,),
                in_specs=[batch3, pad_spec, w_spec, vec_spec],
                out_specs=batch3,
                scratch_shapes=[pltpu.VMEM((N, D), jnp.float32)],
            ),
            compiler_params=pltpu.CompilerParams(
                dimension_semantics=("parallel",),      # batch elems independent (v7x)
                vmem_limit_bytes=vmem_limit),
            cost_estimate=cost,
        )

    try:
        return build(True)(x, pad3, w_packed, vec_packed)
    except Exception:
        # fall back if this jax version rejects pipeline_mode=pl.Buffered(1)
        return build(False)(x, pad3, w_packed, vec_packed)


def encoder_block_ref(x, padding_mask, params, *, heads):
    """Plain-JAX f32 reference mirroring the PyTorch forward (eval mode)."""
    B, N, D = x.shape
    d_k = D // heads
    eps = 1e-5

    def ln(v, g, b):
        mu = v.mean(-1, keepdims=True)
        var = ((v - mu) ** 2).mean(-1, keepdims=True)
        return (v - mu) / jnp.sqrt(var + eps) * g + b

    ln1 = ln(x, params["ln1_g"], params["ln1_b"])
    q = x @ params["wq"] + params["bq"]
    k = ln1 @ params["wk"] + params["bk"]
    v = ln1 @ params["wv"] + params["bv"]
    q = q.reshape(B, N, heads, d_k).transpose(0, 2, 1, 3)
    k = k.reshape(B, N, heads, d_k).transpose(0, 2, 1, 3)
    v = v.reshape(B, N, heads, d_k).transpose(0, 2, 1, 3)
    causal = jnp.tril(jnp.ones((N, N), bool))
    mask = causal[None, None] & (padding_mask > 0)[:, None, None, :]
    scores = (q @ k.transpose(0, 1, 3, 2)) / math.sqrt(d_k)
    scores = jnp.where(mask, scores, -1e9)
    p = jax.nn.softmax(scores, axis=-1)
    p = jnp.where(jnp.isnan(p), 0.0, p)
    p = jnp.where(mask, p, 0.0)
    attn = (p @ v).transpose(0, 2, 1, 3).reshape(B, N, D)
    attn = attn @ params["wo"] + params["bo"]
    m = attn + ln1
    ln2 = ln(m, params["ln2_g"], params["ln2_b"])
    ffn = jnp.maximum(ln2 @ params["w1"] + params["b1"], 0.0) @ params["w2"] + params["b2"]
    return ffn + ln2


def make_params(key, D):
    ks = jax.random.split(key, 6)
    s = 1.0 / math.sqrt(D)

    def lin(k):
        kw, kb = jax.random.split(k)
        # weight stored as (in, out)  (== torch weight transposed)
        return (jax.random.uniform(kw, (D, D), jnp.float32, -s, s),
                jax.random.uniform(kb, (1, D), jnp.float32, -s, s))

    wq, bq = lin(ks[0]); wk, bk = lin(ks[1]); wv, bv = lin(ks[2]); wo, bo = lin(ks[3])
    w1, b1 = lin(ks[4]); w2, b2 = lin(ks[5])
    return dict(
        ln1_g=jnp.ones((1, D), jnp.float32), ln1_b=jnp.zeros((1, D), jnp.float32),
        ln2_g=jnp.ones((1, D), jnp.float32), ln2_b=jnp.zeros((1, D), jnp.float32),
        wq=wq, bq=bq, wk=wk, bk=bk, wv=wv, bv=bv, wo=wo, bo=bo,
        w1=w1, b1=b1, w2=w2, b2=b2,
    )


if __name__ == "__main__":
    B, N, D, HEADS = 2, 16, 128, 4            # D multiple of 128 -> lane-dense blocks
    key = jax.random.PRNGKey(0)
    kx, kparam = jax.random.split(key, 2)

    x = jax.random.normal(kx, (B, N, D), jnp.float32)
    # padding mask: batch 0 fully valid, batch 1 has last 5 positions padded
    padding_mask = jnp.ones((B, N), jnp.float32).at[1, N - 5:].set(0.0)
    params = make_params(kparam, D)

    out = jax.block_until_ready(encoder_block(x, padding_mask, params, heads=HEADS))
    ref = encoder_block_ref(x, padding_mask, params, heads=HEADS)

    assert out.shape == (B, N, D)
    # Wider tolerance than f32-vs-f32: kernel runs MXU matmuls in bf16 (f32 accumulate)
    # and uses the approximate EUP reciprocal for the softmax denominator.
    assert jnp.allclose(out, ref, atol=3e-2, rtol=3e-2), "mismatch vs reference"

    print("KERNEL_OK")
</pallas_src>

<mosaic_0001>
module attributes {stable_mosaic.version = 11 : i64} {
  func.func @encoder_block_kernel(%arg0: i32, %arg1: memref<1x16x128xf32, #tpu.memory_space<vmem>>, %arg2: memref<1x1x16xf32, #tpu.memory_space<vmem>>, %arg3: memref<128x768xbf16, #tpu.memory_space<vmem>>, %arg4: memref<10x128xf32, #tpu.memory_space<vmem>>, %arg5: memref<1x16x128xf32, #tpu.memory_space<vmem>>, %arg6: memref<16x128xf32, #tpu.memory_space<vmem>>) attributes {dimension_semantics = [#tpu.dimension_semantics<parallel>], iteration_bounds = array<i64: 2>, scalar_prefetch = 0 : i64, scratch_operands = 1 : i64, tpu.core_type = #tpu.core_type<tc>, window_params = [{transform_indices = @transform_0, window_bounds = array<i64: 1, 16, 128>}, {transform_indices = @transform_1, window_bounds = array<i64: 1, 1, 16>}, {pipeline_mode = #tpu.pipeline_mode<synchronous>, transform_indices = @transform_2, window_bounds = array<i64: 128, 768>}, {pipeline_mode = #tpu.pipeline_mode<synchronous>, transform_indices = @transform_3, window_bounds = array<i64: 10, 128>}, {transform_indices = @transform_4, window_bounds = array<i64: 1, 16, 128>}]} {
    %c0 = arith.constant 0 : index
    %c0_0 = arith.constant 0 : index
    %c0_1 = arith.constant 0 : index
    %0 = vector.load %arg1[%c0, %c0_0, %c0_1] : memref<1x16x128xf32, #tpu.memory_space<vmem>>, vector<1x16x128xf32>
    %1 = vector.shape_cast %0 : vector<1x16x128xf32> to vector<16x128xf32>
    %c0_2 = arith.constant 0 : index
    %c0_3 = arith.constant 0 : index
    %c0_4 = arith.constant 0 : index
    %2 = vector.load %arg2[%c0_2, %c0_3, %c0_4] : memref<1x1x16xf32, #tpu.memory_space<vmem>>, vector<1x1x16xf32>
    %3 = vector.shape_cast %2 : vector<1x1x16xf32> to vector<1x16xf32>
    %c0_5 = arith.constant 0 : index
    %c0_6 = arith.constant 0 : index
    %4 = vector.load %arg3[%c0_5, %c0_6] : memref<128x768xbf16, #tpu.memory_space<vmem>>, vector<128x768xbf16>
    %c0_7 = arith.constant 0 : index
    %c0_8 = arith.constant 0 : index
    %5 = vector.load %arg4[%c0_7, %c0_8] : memref<10x128xf32, #tpu.memory_space<vmem>>, vector<10x128xf32>
    %6 = vector.extract_strided_slice %5 {offsets = [0, 0], sizes = [1, 128], strides = [1, 1]} : vector<10x128xf32> to vector<1x128xf32>
    %7 = vector.extract_strided_slice %5 {offsets = [1, 0], sizes = [1, 128], strides = [1, 1]} : vector<10x128xf32> to vector<1x128xf32>
    %8 = vector.extract_strided_slice %5 {offsets = [2, 0], sizes = [1, 128], strides = [1, 1]} : vector<10x128xf32> to vector<1x128xf32>
    %9 = vector.extract_strided_slice %5 {offsets = [3, 0], sizes = [1, 128], strides = [1, 1]} : vector<10x128xf32> to vector<1x128xf32>
    %10 = vector.extract_strided_slice %5 {offsets = [4, 0], sizes = [1, 128], strides = [1, 1]} : vector<10x128xf32> to vector<1x128xf32>
    %11 = vector.extract_strided_slice %5 {offsets = [5, 0], sizes = [1, 128], strides = [1, 1]} : vector<10x128xf32> to vector<1x128xf32>
    %12 = vector.extract_strided_slice %5 {offsets = [6, 0], sizes = [1, 128], strides = [1, 1]} : vector<10x128xf32> to vector<1x128xf32>
    %13 = vector.extract_strided_slice %5 {offsets = [7, 0], sizes = [1, 128], strides = [1, 1]} : vector<10x128xf32> to vector<1x128xf32>
    %14 = vector.extract_strided_slice %5 {offsets = [8, 0], sizes = [1, 128], strides = [1, 1]} : vector<10x128xf32> to vector<1x128xf32>
    %15 = vector.extract_strided_slice %5 {offsets = [9, 0], sizes = [1, 128], strides = [1, 1]} : vector<10x128xf32> to vector<1x128xf32>
    %16 = vector.extract_strided_slice %4 {offsets = [0, 0], sizes = [128, 128], strides = [1, 1]} : vector<128x768xbf16> to vector<128x128xbf16>
    %17 = vector.extract_strided_slice %4 {offsets = [0, 128], sizes = [128, 256], strides = [1, 1]} : vector<128x768xbf16> to vector<128x256xbf16>
    %18 = vector.extract_strided_slice %4 {offsets = [0, 384], sizes = [128, 128], strides = [1, 1]} : vector<128x768xbf16> to vector<128x128xbf16>
    %19 = vector.extract_strided_slice %4 {offsets = [0, 512], sizes = [128, 128], strides = [1, 1]} : vector<128x768xbf16> to vector<128x128xbf16>
    %20 = vector.extract_strided_slice %4 {offsets = [0, 640], sizes = [128, 128], strides = [1, 1]} : vector<128x768xbf16> to vector<128x128xbf16>
    %cst = arith.constant dense<0.000000e+00> : vector<16xf32>
    %21 = vector.multi_reduction <add>, %1, %cst [1] : vector<16x128xf32> to vector<16xf32>
    %22 = vector.shape_cast %21 : vector<16xf32> to vector<16x1xf32>
    %cst_9 = arith.constant 1.280000e+02 : f32
    %23 = vector.broadcast %cst_9 : f32 to vector<16x1xf32>
    %24 = arith.divf %22, %23 : vector<16x1xf32>
    %25 = vector.broadcast %24 : vector<16x1xf32> to vector<16x128xf32>
    %26 = arith.subf %1, %25 : vector<16x128xf32>
    %27 = arith.mulf %26, %26 : vector<16x128xf32>
    %cst_10 = arith.constant dense<0.000000e+00> : vector<16xf32>
    %28 = vector.multi_reduction <add>, %27, %cst_10 [1] : vector<16x128xf32> to vector<16xf32>
    %29 = vector.shape_cast %28 : vector<16xf32> to vector<16x1xf32>
    %cst_11 = arith.constant 1.280000e+02 : f32
    %30 = vector.broadcast %cst_11 : f32 to vector<16x1xf32>
    %31 = arith.divf %29, %30 : vector<16x1xf32>
    %32 = vector.broadcast %24 : vector<16x1xf32> to vector<16x128xf32>
    %33 = arith.subf %1, %32 : vector<16x128xf32>
    %cst_12 = arith.constant 9.99999974E-6 : f32
    %34 = vector.broadcast %cst_12 : f32 to vector<16x1xf32>
    %35 = arith.addf %31, %34 : vector<16x1xf32>
    %36 = math.rsqrt %35 : vector<16x1xf32>
    %37 = vector.broadcast %36 : vector<16x1xf32> to vector<16x128xf32>
    %38 = arith.mulf %33, %37 : vector<16x128xf32>
    %39 = vector.broadcast %6 : vector<1x128xf32> to vector<16x128xf32>
    %40 = arith.mulf %38, %39 : vector<16x128xf32>
    %41 = vector.broadcast %7 : vector<1x128xf32> to vector<16x128xf32>
    %42 = arith.addf %40, %41 : vector<16x128xf32>
    %43 = arith.truncf %1 : vector<16x128xf32> to vector<16x128xbf16>
    %cst_13 = arith.constant dense<0.000000e+00> : vector<16x128xf32>
    %44 = tpu.matmul %43, %16, %cst_13 {dimension_numbers = #tpu.dot_dimension_numbers<[1], [0], [0], [1], [0, 0, 1, 1], [], []>} : vector<16x128xbf16>, vector<128x128xbf16>, vector<16x128xf32> -> vector<16x128xf32>
    %45 = vector.broadcast %10 : vector<1x128xf32> to vector<16x128xf32>
    %46 = arith.addf %44, %45 : vector<16x128xf32>
    %47 = arith.truncf %42 : vector<16x128xf32> to vector<16x128xbf16>
    %cst_14 = arith.constant dense<0.000000e+00> : vector<16x256xf32>
    %48 = tpu.matmul %47, %17, %cst_14 {dimension_numbers = #tpu.dot_dimension_numbers<[1], [0], [0], [1], [0, 0, 1, 1], [], []>} : vector<16x128xbf16>, vector<128x256xbf16>, vector<16x256xf32> -> vector<16x256xf32>
    %49 = vector.extract_strided_slice %48 {offsets = [0, 0], sizes = [16, 128], strides = [1, 1]} : vector<16x256xf32> to vector<16x128xf32>
    %50 = vector.broadcast %11 : vector<1x128xf32> to vector<16x128xf32>
    %51 = arith.addf %49, %50 : vector<16x128xf32>
    %52 = vector.extract_strided_slice %48 {offsets = [0, 128], sizes = [16, 128], strides = [1, 1]} : vector<16x256xf32> to vector<16x128xf32>
    %53 = vector.broadcast %12 : vector<1x128xf32> to vector<16x128xf32>
    %54 = arith.addf %52, %53 : vector<16x128xf32>
    %55 = tpu.iota {dimensions = array<i32: 0>} : vector<16x16xi32>
    %56 = tpu.iota {dimensions = array<i32: 1>} : vector<16x16xi32>
    %57 = arith.cmpi sge, %55, %56 : vector<16x16xi32>
    %cst_15 = arith.constant 0.000000e+00 : f32
    %58 = vector.broadcast %cst_15 : f32 to vector<1x16xf32>
    %59 = arith.cmpf ogt, %3, %58 : vector<1x16xf32>
    %60 = vector.broadcast %59 : vector<1x16xi1> to vector<16x16xi1>
    %61 = arith.andi %57, %60 : vector<16x16xi1>
    %cst_16 = arith.constant 1.000000e+00 : f32
    %cst_17 = arith.constant 0.000000e+00 : f32
    %62 = vector.broadcast %cst_16 : f32 to vector<16x16xf32>
    %63 = vector.broadcast %cst_17 : f32 to vector<16x16xf32>
    %64 = arith.select %61, %62, %63 : vector<16x16xi1>, vector<16x16xf32>
    %cst_18 = arith.constant 1.000000e+00 : f32
    %65 = vector.broadcast %cst_18 : f32 to vector<16x16xf32>
    %66 = arith.subf %65, %64 : vector<16x16xf32>
    %cst_19 = arith.constant -1.000000e+09 : f32
    %67 = vector.broadcast %cst_19 : f32 to vector<16x16xf32>
    %68 = arith.mulf %66, %67 : vector<16x16xf32>
    %69 = vector.extract_strided_slice %46 {offsets = [0, 0], sizes = [16, 32], strides = [1, 1]} : vector<16x128xf32> to vector<16x32xf32>
    %70 = vector.extract_strided_slice %46 {offsets = [0, 32], sizes = [16, 32], strides = [1, 1]} : vector<16x128xf32> to vector<16x32xf32>
    %71 = vector.extract_strided_slice %46 {offsets = [0, 64], sizes = [16, 32], strides = [1, 1]} : vector<16x128xf32> to vector<16x32xf32>
    %72 = vector.extract_strided_slice %46 {offsets = [0, 96], sizes = [16, 32], strides = [1, 1]} : vector<16x128xf32> to vector<16x32xf32>
    %73 = vector.shape_cast %69 : vector<16x32xf32> to vector<1x16x32xf32>
    %74 = vector.shape_cast %70 : vector<16x32xf32> to vector<1x16x32xf32>
    %75 = vector.shape_cast %71 : vector<16x32xf32> to vector<1x16x32xf32>
    %76 = vector.shape_cast %72 : vector<16x32xf32> to vector<1x16x32xf32>
    %77 = tpu.concatenate %73, %74, %75, %76 in 0 : vector<1x16x32xf32>, vector<1x16x32xf32>, vector<1x16x32xf32>, vector<1x16x32xf32> -> vector<4x16x32xf32>
    %78 = arith.truncf %77 : vector<4x16x32xf32> to vector<4x16x32xbf16>
    %79 = vector.extract_strided_slice %51 {offsets = [0, 0], sizes = [16, 32], strides = [1, 1]} : vector<16x128xf32> to vector<16x32xf32>
    %80 = vector.extract_strided_slice %51 {offsets = [0, 32], sizes = [16, 32], strides = [1, 1]} : vector<16x128xf32> to vector<16x32xf32>
    %81 = vector.extract_strided_slice %51 {offsets = [0, 64], sizes = [16, 32], strides = [1, 1]} : vector<16x128xf32> to vector<16x32xf32>
    %82 = vector.extract_strided_slice %51 {offsets = [0, 96], sizes = [16, 32], strides = [1, 1]} : vector<16x128xf32> to vector<16x32xf32>
    %83 = vector.shape_cast %79 : vector<16x32xf32> to vector<1x16x32xf32>
    %84 = vector.shape_cast %80 : vector<16x32xf32> to vector<1x16x32xf32>
    %85 = vector.shape_cast %81 : vector<16x32xf32> to vector<1x16x32xf32>
    %86 = vector.shape_cast %82 : vector<16x32xf32> to vector<1x16x32xf32>
    %87 = tpu.concatenate %83, %84, %85, %86 in 0 : vector<1x16x32xf32>, vector<1x16x32xf32>, vector<1x16x32xf32>, vector<1x16x32xf32> -> vector<4x16x32xf32>
    %88 = arith.truncf %87 : vector<4x16x32xf32> to vector<4x16x32xbf16>
    %89 = vector.extract_strided_slice %54 {offsets = [0, 0], sizes = [16, 32], strides = [1, 1]} : vector<16x128xf32> to vector<16x32xf32>
    %90 = vector.extract_strided_slice %54 {offsets = [0, 32], sizes = [16, 32], strides = [1, 1]} : vector<16x128xf32> to vector<16x32xf32>
    %91 = vector.extract_strided_slice %54 {offsets = [0, 64], sizes = [16, 32], strides = [1, 1]} : vector<16x128xf32> to vector<16x32xf32>
    %92 = vector.extract_strided_slice %54 {offsets = [0, 96], sizes = [16, 32], strides = [1, 1]} : vector<16x128xf32> to vector<16x32xf32>
    %93 = vector.shape_cast %89 : vector<16x32xf32> to vector<1x16x32xf32>
    %94 = vector.shape_cast %90 : vector<16x32xf32> to vector<1x16x32xf32>
    %95 = vector.shape_cast %91 : vector<16x32xf32> to vector<1x16x32xf32>
    %96 = vector.shape_cast %92 : vector<16x32xf32> to vector<1x16x32xf32>
    %97 = tpu.concatenate %93, %94, %95, %96 in 0 : vector<1x16x32xf32>, vector<1x16x32xf32>, vector<1x16x32xf32>, vector<1x16x32xf32> -> vector<4x16x32xf32>
    %98 = arith.truncf %97 : vector<4x16x32xf32> to vector<4x16x32xbf16>
    %cst_20 = arith.constant dense<0.000000e+00> : vector<4x16x16xf32>
    %99 = tpu.matmul %78, %88, %cst_20 {dimension_numbers = #tpu.dot_dimension_numbers<[2], [2], [1], [1], [0, 0, 0, 1, 1, 1], [0], [0]>} : vector<4x16x32xbf16>, vector<4x16x32xbf16>, vector<4x16x16xf32> -> vector<4x16x16xf32>
    %cst_21 = arith.constant 0.176776692 : f32
    %100 = vector.broadcast %cst_21 : f32 to vector<4x16x16xf32>
    %101 = arith.mulf %99, %100 : vector<4x16x16xf32>
    %102 = vector.shape_cast %68 : vector<16x16xf32> to vector<1x16x16xf32>
    %103 = vector.broadcast %102 : vector<1x16x16xf32> to vector<4x16x16xf32>
    %104 = arith.addf %101, %103 : vector<4x16x16xf32>
    %cst_22 = arith.constant dense<0xFF800000> : vector<4x16xf32>
    %105 = vector.multi_reduction <maximumf>, %104, %cst_22 [2] : vector<4x16x16xf32> to vector<4x16xf32>
    %106 = vector.shape_cast %105 : vector<4x16xf32> to vector<4x16x1xf32>
    %107 = vector.broadcast %106 : vector<4x16x1xf32> to vector<4x16x16xf32>
    %108 = arith.subf %104, %107 : vector<4x16x16xf32>
    %109 = math.exp %108 : vector<4x16x16xf32>
    %cst_23 = arith.constant dense<0.000000e+00> : vector<4x16xf32>
    %110 = vector.multi_reduction <add>, %109, %cst_23 [2] : vector<4x16x16xf32> to vector<4x16xf32>
    %111 = vector.shape_cast %110 : vector<4x16xf32> to vector<4x16x1xf32>
    %112 = tpu.reciprocal %111 {approx = true} : vector<4x16x1xf32> -> vector<4x16x1xf32>
    %113 = vector.broadcast %112 : vector<4x16x1xf32> to vector<4x16x16xf32>
    %114 = arith.mulf %109, %113 : vector<4x16x16xf32>
    %115 = vector.shape_cast %64 : vector<16x16xf32> to vector<1x16x16xf32>
    %116 = vector.broadcast %115 : vector<1x16x16xf32> to vector<4x16x16xf32>
    %117 = arith.mulf %114, %116 : vector<4x16x16xf32>
    %118 = arith.truncf %117 : vector<4x16x16xf32> to vector<4x16x16xbf16>
    %cst_24 = arith.constant dense<0.000000e+00> : vector<4x16x32xf32>
    %119 = tpu.matmul %118, %98, %cst_24 {dimension_numbers = #tpu.dot_dimension_numbers<[2], [1], [1], [2], [0, 0, 0, 1, 1, 2], [0], [0]>} : vector<4x16x16xbf16>, vector<4x16x32xbf16>, vector<4x16x32xf32> -> vector<4x16x32xf32>
    %120 = vector.extract_strided_slice %119 {offsets = [0, 0, 0], sizes = [1, 16, 32], strides = [1, 1, 1]} : vector<4x16x32xf32> to vector<1x16x32xf32>
    %121 = vector.shape_cast %120 : vector<1x16x32xf32> to vector<16x32xf32>
    %c0_25 = arith.constant 0 : index
    %c0_26 = arith.constant 0 : index
    %122 = vector.load %arg6[%c0_25, %c0_26] : memref<16x128xf32, #tpu.memory_space<vmem>>, vector<16x32xf32>
    tpu.vector_store %arg6[%c0_25, %c0_26], %121 {strides = array<i32>} : memref<16x128xf32, #tpu.memory_space<vmem>>, vector<16x32xf32>,
    %123 = vector.extract_strided_slice %119 {offsets = [1, 0, 0], sizes = [1, 16, 32], strides = [1, 1, 1]} : vector<4x16x32xf32> to vector<1x16x32xf32>
    %124 = vector.shape_cast %123 : vector<1x16x32xf32> to vector<16x32xf32>
    %c0_27 = arith.constant 0 : index
    %c32 = arith.constant 32 : index
    %125 = vector.load %arg6[%c0_27, %c32] : memref<16x128xf32, #tpu.memory_space<vmem>>, vector<16x32xf32>
    tpu.vector_store %arg6[%c0_27, %c32], %124 {strides = array<i32>} : memref<16x128xf32, #tpu.memory_space<vmem>>, vector<16x32xf32>,
    %126 = vector.extract_strided_slice %119 {offsets = [2, 0, 0], sizes = [1, 16, 32], strides = [1, 1, 1]} : vector<4x16x32xf32> to vector<1x16x32xf32>
    %127 = vector.shape_cast %126 : vector<1x16x32xf32> to vector<16x32xf32>
    %c0_28 = arith.constant 0 : index
    %c64 = arith.constant 64 : index
    %128 = vector.load %arg6[%c0_28, %c64] : memref<16x128xf32, #tpu.memory_space<vmem>>, vector<16x32xf32>
    tpu.vector_store %arg6[%c0_28, %c64], %127 {strides = array<i32>} : memref<16x128xf32, #tpu.memory_space<vmem>>, vector<16x32xf32>,
    %129 = vector.extract_strided_slice %119 {offsets = [3, 0, 0], sizes = [1, 16, 32], strides = [1, 1, 1]} : vector<4x16x32xf32> to vector<1x16x32xf32>
    %130 = vector.shape_cast %129 : vector<1x16x32xf32> to vector<16x32xf32>
    %c0_29 = arith.constant 0 : index
    %c96 = arith.constant 96 : index
    %131 = vector.load %arg6[%c0_29, %c96] : memref<16x128xf32, #tpu.memory_space<vmem>>, vector<16x32xf32>
    tpu.vector_store %arg6[%c0_29, %c96], %130 {strides = array<i32>} : memref<16x128xf32, #tpu.memory_space<vmem>>, vector<16x32xf32>,
    %c0_30 = arith.constant 0 : index
    %c0_31 = arith.constant 0 : index
    %132 = vector.load %arg6[%c0_30, %c0_31] : memref<16x128xf32, #tpu.memory_space<vmem>>, vector<16x128xf32>
    %133 = arith.truncf %132 : vector<16x128xf32> to vector<16x128xbf16>
    %cst_32 = arith.constant dense<0.000000e+00> : vector<16x128xf32>
    %134 = tpu.matmul %133, %18, %cst_32 {dimension_numbers = #tpu.dot_dimension_numbers<[1], [0], [0], [1], [0, 0, 1, 1], [], []>} : vector<16x128xbf16>, vector<128x128xbf16>, vector<16x128xf32> -> vector<16x128xf32>
    %135 = vector.broadcast %13 : vector<1x128xf32> to vector<16x128xf32>
    %136 = arith.addf %134, %135 : vector<16x128xf32>
    %137 = arith.addf %136, %42 : vector<16x128xf32>
    %cst_33 = arith.constant dense<0.000000e+00> : vector<16xf32>
    %138 = vector.multi_reduction <add>, %137, %cst_33 [1] : vector<16x128xf32> to vector<16xf32>
    %139 = vector.shape_cast %138 : vector<16xf32> to vector<16x1xf32>
    %cst_34 = arith.constant 1.280000e+02 : f32
    %140 = vector.broadcast %cst_34 : f32 to vector<16x1xf32>
    %141 = arith.divf %139, %140 : vector<16x1xf32>
    %142 = vector.broadcast %141 : vector<16x1xf32> to vector<16x128xf32>
    %143 = arith.subf %137, %142 : vector<16x128xf32>
    %144 = arith.mulf %143, %143 : vector<16x128xf32>
    %cst_35 = arith.constant dense<0.000000e+00> : vector<16xf32>
    %145 = vector.multi_reduction <add>, %144, %cst_35 [1] : vector<16x128xf32> to vector<16xf32>
    %146 = vector.shape_cast %145 : vector<16xf32> to vector<16x1xf32>
    %cst_36 = arith.constant 1.280000e+02 : f32
    %147 = vector.broadcast %cst_36 : f32 to vector<16x1xf32>
    %148 = arith.divf %146, %147 : vector<16x1xf32>
    %149 = vector.broadcast %141 : vector<16x1xf32> to vector<16x128xf32>
    %150 = arith.subf %137, %149 : vector<16x128xf32>
    %cst_37 = arith.constant 9.99999974E-6 : f32
    %151 = vector.broadcast %cst_37 : f32 to vector<16x1xf32>
    %152 = arith.addf %148, %151 : vector<16x1xf32>
    %153 = math.rsqrt %152 : vector<16x1xf32>
    %154 = vector.broadcast %153 : vector<16x1xf32> to vector<16x128xf32>
    %155 = arith.mulf %150, %154 : vector<16x128xf32>
    %156 = vector.broadcast %8 : vector<1x128xf32> to vector<16x128xf32>
    %157 = arith.mulf %155, %156 : vector<16x128xf32>
    %158 = vector.broadcast %9 : vector<1x128xf32> to vector<16x128xf32>
    %159 = arith.addf %157, %158 : vector<16x128xf32>
    %160 = arith.truncf %159 : vector<16x128xf32> to vector<16x128xbf16>
    %cst_38 = arith.constant dense<0.000000e+00> : vector<16x128xf32>
    %161 = tpu.matmul %160, %19, %cst_38 {dimension_numbers = #tpu.dot_dimension_numbers<[1], [0], [0], [1], [0, 0, 1, 1], [], []>} : vector<16x128xbf16>, vector<128x128xbf16>, vector<16x128xf32> -> vector<16x128xf32>
    %162 = vector.broadcast %14 : vector<1x128xf32> to vector<16x128xf32>
    %163 = arith.addf %161, %162 : vector<16x128xf32>
    %cst_39 = arith.constant 0.000000e+00 : f32
    %164 = vector.broadcast %cst_39 : f32 to vector<16x128xf32>
    %165 = arith.maximumf %163, %164 : vector<16x128xf32>
    %166 = arith.truncf %165 : vector<16x128xf32> to vector<16x128xbf16>
    %cst_40 = arith.constant dense<0.000000e+00> : vector<16x128xf32>
    %167 = tpu.matmul %166, %20, %cst_40 {dimension_numbers = #tpu.dot_dimension_numbers<[1], [0], [0], [1], [0, 0, 1, 1], [], []>} : vector<16x128xbf16>, vector<128x128xbf16>, vector<16x128xf32> -> vector<16x128xf32>
    %168 = vector.broadcast %15 : vector<1x128xf32> to vector<16x128xf32>
    %169 = arith.addf %167, %168 : vector<16x128xf32>
    %170 = arith.addf %169, %159 : vector<16x128xf32>
    %c0_41 = arith.constant 0 : index
    %c0_42 = arith.constant 0 : index
    %c0_43 = arith.constant 0 : index
    %171 = vector.load %arg5[%c0_41, %c0_42, %c0_43] : memref<1x16x128xf32, #tpu.memory_space<vmem>>, vector<1x16x128xf32>
    %172 = vector.shape_cast %171 : vector<1x16x128xf32> to vector<16x128xf32>
    %173 = vector.shape_cast %170 : vector<16x128xf32> to vector<1x16x128xf32>
    tpu.vector_store %arg5[%c0_41, %c0_42, %c0_43], %173 {strides = array<i32>} : memref<1x16x128xf32, #tpu.memory_space<vmem>>, vector<1x16x128xf32>,
    return
  }
  func.func @transform_0(%arg0: i32) -> (i32, i32, i32) {
    %c0_i32 = arith.constant 0 : i32
    %c0_i32_0 = arith.constant 0 : i32
    %c0_i32_1 = arith.constant 0 : i32
    return %arg0, %c0_i32, %c0_i32_0 : i32, i32, i32
  }
  func.func @transform_1(%arg0: i32) -> (i32, i32, i32) {
    %c0_i32 = arith.constant 0 : i32
    %c0_i32_0 = arith.constant 0 : i32
    %c0_i32_1 = arith.constant 0 : i32
    return %arg0, %c0_i32, %c0_i32_0 : i32, i32, i32
  }
  func.func @transform_2(%arg0: i32) -> (i32, i32) {
    %c0_i32 = arith.constant 0 : i32
    %c0_i32_0 = arith.constant 0 : i32
    %c0_i32_1 = arith.constant 0 : i32
    return %c0_i32, %c0_i32_0 : i32, i32
  }
  func.func @transform_3(%arg0: i32) -> (i32, i32) {
    %c0_i32 = arith.constant 0 : i32
    %c0_i32_0 = arith.constant 0 : i32
    %c0_i32_1 = arith.constant 0 : i32
    return %c0_i32, %c0_i32_0 : i32, i32
  }
  func.func @transform_4(%arg0: i32) -> (i32, i32, i32) {
    %c0_i32 = arith.constant 0 : i32
    %c0_i32_0 = arith.constant 0 : i32
    %c0_i32_1 = arith.constant 0 : i32
    return %arg0, %c0_i32, %c0_i32_0 : i32, i32, i32
  }
}

module attributes {stable_mosaic.version = 11 : i64} {
  func.func @encoder_block_kernel(%arg0: i32, %arg1: memref<1x16x128xf32, #tpu.memory_space<vmem>>, %arg2: memref<1x1x16xf32, #tpu.memory_space<vmem>>, %arg3: memref<128x768xbf16, #tpu.memory_space<vmem>>, %arg4: memref<10x128xf32, #tpu.memory_space<vmem>>, %arg5: memref<1x16x128xf32, #tpu.memory_space<vmem>>, %arg6: memref<16x128xf32, #tpu.memory_space<vmem>>) attributes {dimension_semantics = [#tpu.dimension_semantics<parallel>], iteration_bounds = array<i64: 2>, scalar_prefetch = 0 : i64, scratch_operands = 1 : i64, tpu.core_type = #tpu.core_type<tc>, window_params = [{transform_indices = @transform_0, window_bounds = array<i64: 1, 16, 128>}, {transform_indices = @transform_1, window_bounds = array<i64: 1, 1, 16>}, {pipeline_mode = #tpu.pipeline_mode<synchronous>, transform_indices = @transform_2, window_bounds = array<i64: 128, 768>}, {pipeline_mode = #tpu.pipeline_mode<synchronous>, transform_indices = @transform_3, window_bounds = array<i64: 10, 128>}, {transform_indices = @transform_4, window_bounds = array<i64: 1, 16, 128>}]} {
    %c0 = arith.constant 0 : index
    %c0_0 = arith.constant 0 : index
    %c0_1 = arith.constant 0 : index
    %0 = vector.load %arg1[%c0, %c0_0, %c0_1] : memref<1x16x128xf32, #tpu.memory_space<vmem>>, vector<1x16x128xf32>
    %1 = vector.shape_cast %0 : vector<1x16x128xf32> to vector<16x128xf32>
    %c0_2 = arith.constant 0 : index
    %c0_3 = arith.constant 0 : index
    %c0_4 = arith.constant 0 : index
    %2 = vector.load %arg2[%c0_2, %c0_3, %c0_4] : memref<1x1x16xf32, #tpu.memory_space<vmem>>, vector<1x1x16xf32>
    %3 = vector.shape_cast %2 : vector<1x1x16xf32> to vector<1x16xf32>
    %c0_5 = arith.constant 0 : index
    %c0_6 = arith.constant 0 : index
    %4 = vector.load %arg3[%c0_5, %c0_6] : memref<128x768xbf16, #tpu.memory_space<vmem>>, vector<128x768xbf16>
    %c0_7 = arith.constant 0 : index
    %c0_8 = arith.constant 0 : index
    %5 = vector.load %arg4[%c0_7, %c0_8] : memref<10x128xf32, #tpu.memory_space<vmem>>, vector<10x128xf32>
    %6 = vector.extract_strided_slice %5 {offsets = [0, 0], sizes = [1, 128], strides = [1, 1]} : vector<10x128xf32> to vector<1x128xf32>
    %7 = vector.extract_strided_slice %5 {offsets = [1, 0], sizes = [1, 128], strides = [1, 1]} : vector<10x128xf32> to vector<1x128xf32>
    %8 = vector.extract_strided_slice %5 {offsets = [2, 0], sizes = [1, 128], strides = [1, 1]} : vector<10x128xf32> to vector<1x128xf32>
    %9 = vector.extract_strided_slice %5 {offsets = [3, 0], sizes = [1, 128], strides = [1, 1]} : vector<10x128xf32> to vector<1x128xf32>
    %10 = vector.extract_strided_slice %5 {offsets = [4, 0], sizes = [1, 128], strides = [1, 1]} : vector<10x128xf32> to vector<1x128xf32>
    %11 = vector.extract_strided_slice %5 {offsets = [5, 0], sizes = [1, 128], strides = [1, 1]} : vector<10x128xf32> to vector<1x128xf32>
    %12 = vector.extract_strided_slice %5 {offsets = [6, 0], sizes = [1, 128], strides = [1, 1]} : vector<10x128xf32> to vector<1x128xf32>
    %13 = vector.extract_strided_slice %5 {offsets = [7, 0], sizes = [1, 128], strides = [1, 1]} : vector<10x128xf32> to vector<1x128xf32>
    %14 = vector.extract_strided_slice %5 {offsets = [8, 0], sizes = [1, 128], strides = [1, 1]} : vector<10x128xf32> to vector<1x128xf32>
    %15 = vector.extract_strided_slice %5 {offsets = [9, 0], sizes = [1, 128], strides = [1, 1]} : vector<10x128xf32> to vector<1x128xf32>
    %16 = vector.extract_strided_slice %4 {offsets = [0, 0], sizes = [128, 128], strides = [1, 1]} : vector<128x768xbf16> to vector<128x128xbf16>
    %17 = vector.extract_strided_slice %4 {offsets = [0, 128], sizes = [128, 256], strides = [1, 1]} : vector<128x768xbf16> to vector<128x256xbf16>
    %18 = vector.extract_strided_slice %4 {offsets = [0, 384], sizes = [128, 128], strides = [1, 1]} : vector<128x768xbf16> to vector<128x128xbf16>
    %19 = vector.extract_strided_slice %4 {offsets = [0, 512], sizes = [128, 128], strides = [1, 1]} : vector<128x768xbf16> to vector<128x128xbf16>
    %20 = vector.extract_strided_slice %4 {offsets = [0, 640], sizes = [128, 128], strides = [1, 1]} : vector<128x768xbf16> to vector<128x128xbf16>
    %cst = arith.constant dense<0.000000e+00> : vector<16xf32>
    %21 = vector.multi_reduction <add>, %1, %cst [1] : vector<16x128xf32> to vector<16xf32>
    %22 = vector.shape_cast %21 : vector<16xf32> to vector<16x1xf32>
    %cst_9 = arith.constant 1.280000e+02 : f32
    %23 = vector.broadcast %cst_9 : f32 to vector<16x1xf32>
    %24 = arith.divf %22, %23 : vector<16x1xf32>
    %25 = vector.broadcast %24 : vector<16x1xf32> to vector<16x128xf32>
    %26 = arith.subf %1, %25 : vector<16x128xf32>
    %27 = arith.mulf %26, %26 : vector<16x128xf32>
    %cst_10 = arith.constant dense<0.000000e+00> : vector<16xf32>
    %28 = vector.multi_reduction <add>, %27, %cst_10 [1] : vector<16x128xf32> to vector<16xf32>
    %29 = vector.shape_cast %28 : vector<16xf32> to vector<16x1xf32>
    %cst_11 = arith.constant 1.280000e+02 : f32
    %30 = vector.broadcast %cst_11 : f32 to vector<16x1xf32>
    %31 = arith.divf %29, %30 : vector<16x1xf32>
    %32 = vector.broadcast %24 : vector<16x1xf32> to vector<16x128xf32>
    %33 = arith.subf %1, %32 : vector<16x128xf32>
    %cst_12 = arith.constant 9.99999974E-6 : f32
    %34 = vector.broadcast %cst_12 : f32 to vector<16x1xf32>
    %35 = arith.addf %31, %34 : vector<16x1xf32>
    %36 = math.rsqrt %35 : vector<16x1xf32>
    %37 = vector.broadcast %36 : vector<16x1xf32> to vector<16x128xf32>
    %38 = arith.mulf %33, %37 : vector<16x128xf32>
    %39 = vector.broadcast %6 : vector<1x128xf32> to vector<16x128xf32>
    %40 = arith.mulf %38, %39 : vector<16x128xf32>
    %41 = vector.broadcast %7 : vector<1x128xf32> to vector<16x128xf32>
    %42 = arith.addf %40, %41 : vector<16x128xf32>
    %43 = arith.truncf %1 : vector<16x128xf32> to vector<16x128xbf16>
    %cst_13 = arith.constant dense<0.000000e+00> : vector<16x128xf32>
    %44 = tpu.matmul %43, %16, %cst_13 {dimension_numbers = #tpu.dot_dimension_numbers<[1], [0], [0], [1], [0, 0, 1, 1], [], []>} : vector<16x128xbf16>, vector<128x128xbf16>, vector<16x128xf32> -> vector<16x128xf32>
    %45 = vector.broadcast %10 : vector<1x128xf32> to vector<16x128xf32>
    %46 = arith.addf %44, %45 : vector<16x128xf32>
    %47 = arith.truncf %42 : vector<16x128xf32> to vector<16x128xbf16>
    %cst_14 = arith.constant dense<0.000000e+00> : vector<16x256xf32>
    %48 = tpu.matmul %47, %17, %cst_14 {dimension_numbers = #tpu.dot_dimension_numbers<[1], [0], [0], [1], [0, 0, 1, 1], [], []>} : vector<16x128xbf16>, vector<128x256xbf16>, vector<16x256xf32> -> vector<16x256xf32>
    %49 = vector.extract_strided_slice %48 {offsets = [0, 0], sizes = [16, 128], strides = [1, 1]} : vector<16x256xf32> to vector<16x128xf32>
    %50 = vector.broadcast %11 : vector<1x128xf32> to vector<16x128xf32>
    %51 = arith.addf %49, %50 : vector<16x128xf32>
    %52 = vector.extract_strided_slice %48 {offsets = [0, 128], sizes = [16, 128], strides = [1, 1]} : vector<16x256xf32> to vector<16x128xf32>
    %53 = vector.broadcast %12 : vector<1x128xf32> to vector<16x128xf32>
    %54 = arith.addf %52, %53 : vector<16x128xf32>
    %55 = tpu.iota {dimensions = array<i32: 0>} : vector<16x16xi32>
    %56 = tpu.iota {dimensions = array<i32: 1>} : vector<16x16xi32>
    %57 = arith.cmpi sge, %55, %56 : vector<16x16xi32>
    %cst_15 = arith.constant 0.000000e+00 : f32
    %58 = vector.broadcast %cst_15 : f32 to vector<1x16xf32>
    %59 = arith.cmpf ogt, %3, %58 : vector<1x16xf32>
    %60 = vector.broadcast %59 : vector<1x16xi1> to vector<16x16xi1>
    %61 = arith.andi %57, %60 : vector<16x16xi1>
    %cst_16 = arith.constant 1.000000e+00 : f32
    %cst_17 = arith.constant 0.000000e+00 : f32
    %62 = vector.broadcast %cst_16 : f32 to vector<16x16xf32>
    %63 = vector.broadcast %cst_17 : f32 to vector<16x16xf32>
    %64 = arith.select %61, %62, %63 : vector<16x16xi1>, vector<16x16xf32>
    %cst_18 = arith.constant 1.000000e+00 : f32
    %65 = vector.broadcast %cst_18 : f32 to vector<16x16xf32>
    %66 = arith.subf %65, %64 : vector<16x16xf32>
    %cst_19 = arith.constant -1.000000e+09 : f32
    %67 = vector.broadcast %cst_19 : f32 to vector<16x16xf32>
    %68 = arith.mulf %66, %67 : vector<16x16xf32>
    %69 = vector.extract_strided_slice %46 {offsets = [0, 0], sizes = [16, 32], strides = [1, 1]} : vector<16x128xf32> to vector<16x32xf32>
    %70 = vector.extract_strided_slice %46 {offsets = [0, 32], sizes = [16, 32], strides = [1, 1]} : vector<16x128xf32> to vector<16x32xf32>
    %71 = vector.extract_strided_slice %46 {offsets = [0, 64], sizes = [16, 32], strides = [1, 1]} : vector<16x128xf32> to vector<16x32xf32>
    %72 = vector.extract_strided_slice %46 {offsets = [0, 96], sizes = [16, 32], strides = [1, 1]} : vector<16x128xf32> to vector<16x32xf32>
    %73 = vector.shape_cast %69 : vector<16x32xf32> to vector<1x16x32xf32>
    %74 = vector.shape_cast %70 : vector<16x32xf32> to vector<1x16x32xf32>
    %75 = vector.shape_cast %71 : vector<16x32xf32> to vector<1x16x32xf32>
    %76 = vector.shape_cast %72 : vector<16x32xf32> to vector<1x16x32xf32>
    %77 = tpu.concatenate %73, %74, %75, %76 in 0 : vector<1x16x32xf32>, vector<1x16x32xf32>, vector<1x16x32xf32>, vector<1x16x32xf32> -> vector<4x16x32xf32>
    %78 = arith.truncf %77 : vector<4x16x32xf32> to vector<4x16x32xbf16>
    %79 = vector.extract_strided_slice %51 {offsets = [0, 0], sizes = [16, 32], strides = [1, 1]} : vector<16x128xf32> to vector<16x32xf32>
    %80 = vector.extract_strided_slice %51 {offsets = [0, 32], sizes = [16, 32], strides = [1, 1]} : vector<16x128xf32> to vector<16x32xf32>
    %81 = vector.extract_strided_slice %51 {offsets = [0, 64], sizes = [16, 32], strides = [1, 1]} : vector<16x128xf32> to vector<16x32xf32>
    %82 = vector.extract_strided_slice %51 {offsets = [0, 96], sizes = [16, 32], strides = [1, 1]} : vector<16x128xf32> to vector<16x32xf32>
    %83 = vector.shape_cast %79 : vector<16x32xf32> to vector<1x16x32xf32>
    %84 = vector.shape_cast %80 : vector<16x32xf32> to vector<1x16x32xf32>
    %85 = vector.shape_cast %81 : vector<16x32xf32> to vector<1x16x32xf32>
    %86 = vector.shape_cast %82 : vector<16x32xf32> to vector<1x16x32xf32>
    %87 = tpu.concatenate %83, %84, %85, %86 in 0 : vector<1x16x32xf32>, vector<1x16x32xf32>, vector<1x16x32xf32>, vector<1x16x32xf32> -> vector<4x16x32xf32>
    %88 = arith.truncf %87 : vector<4x16x32xf32> to vector<4x16x32xbf16>
    %89 = vector.extract_strided_slice %54 {offsets = [0, 0], sizes = [16, 32], strides = [1, 1]} : vector<16x128xf32> to vector<16x32xf32>
    %90 = vector.extract_strided_slice %54 {offsets = [0, 32], sizes = [16, 32], strides = [1, 1]} : vector<16x128xf32> to vector<16x32xf32>
    %91 = vector.extract_strided_slice %54 {offsets = [0, 64], sizes = [16, 32], strides = [1, 1]} : vector<16x128xf32> to vector<16x32xf32>
    %92 = vector.extract_strided_slice %54 {offsets = [0, 96], sizes = [16, 32], strides = [1, 1]} : vector<16x128xf32> to vector<16x32xf32>
    %93 = vector.shape_cast %89 : vector<16x32xf32> to vector<1x16x32xf32>
    %94 = vector.shape_cast %90 : vector<16x32xf32> to vector<1x16x32xf32>
    %95 = vector.shape_cast %91 : vector<16x32xf32> to vector<1x16x32xf32>
    %96 = vector.shape_cast %92 : vector<16x32xf32> to vector<1x16x32xf32>
    %97 = tpu.concatenate %93, %94, %95, %96 in 0 : vector<1x16x32xf32>, vector<1x16x32xf32>, vector<1x16x32xf32>, vector<1x16x32xf32> -> vector<4x16x32xf32>
    %98 = arith.truncf %97 : vector<4x16x32xf32> to vector<4x16x32xbf16>
    %cst_20 = arith.constant dense<0.000000e+00> : vector<4x16x16xf32>
    %99 = tpu.matmul %78, %88, %cst_20 {dimension_numbers = #tpu.dot_dimension_numbers<[2], [2], [1], [1], [0, 0, 0, 1, 1, 1], [0], [0]>} : vector<4x16x32xbf16>, vector<4x16x32xbf16>, vector<4x16x16xf32> -> vector<4x16x16xf32>
    %cst_21 = arith.constant 0.176776692 : f32
    %100 = vector.broadcast %cst_21 : f32 to vector<4x16x16xf32>
    %101 = arith.mulf %99, %100 : vector<4x16x16xf32>
    %102 = vector.shape_cast %68 : vector<16x16xf32> to vector<1x16x16xf32>
    %103 = vector.broadcast %102 : vector<1x16x16xf32> to vector<4x16x16xf32>
    %104 = arith.addf %101, %103 : vector<4x16x16xf32>
    %cst_22 = arith.constant dense<0xFF800000> : vector<4x16xf32>
    %105 = vector.multi_reduction <maximumf>, %104, %cst_22 [2] : vector<4x16x16xf32> to vector<4x16xf32>
    %106 = vector.shape_cast %105 : vector<4x16xf32> to vector<4x16x1xf32>
    %107 = vector.broadcast %106 : vector<4x16x1xf32> to vector<4x16x16xf32>
    %108 = arith.subf %104, %107 : vector<4x16x16xf32>
    %109 = math.exp %108 : vector<4x16x16xf32>
    %cst_23 = arith.constant dense<0.000000e+00> : vector<4x16xf32>
    %110 = vector.multi_reduction <add>, %109, %cst_23 [2] : vector<4x16x16xf32> to vector<4x16xf32>
    %111 = vector.shape_cast %110 : vector<4x16xf32> to vector<4x16x1xf32>
    %112 = tpu.reciprocal %111 {approx = true} : vector<4x16x1xf32> -> vector<4x16x1xf32>
    %113 = vector.broadcast %112 : vector<4x16x1xf32> to vector<4x16x16xf32>
    %114 = arith.mulf %109, %113 : vector<4x16x16xf32>
    %115 = vector.shape_cast %64 : vector<16x16xf32> to vector<1x16x16xf32>
    %116 = vector.broadcast %115 : vector<1x16x16xf32> to vector<4x16x16xf32>
    %117 = arith.mulf %114, %116 : vector<4x16x16xf32>
    %118 = arith.truncf %117 : vector<4x16x16xf32> to vector<4x16x16xbf16>
    %cst_24 = arith.constant dense<0.000000e+00> : vector<4x16x32xf32>
    %119 = tpu.matmul %118, %98, %cst_24 {dimension_numbers = #tpu.dot_dimension_numbers<[2], [1], [1], [2], [0, 0, 0, 1, 1, 2], [0], [0]>} : vector<4x16x16xbf16>, vector<4x16x32xbf16>, vector<4x16x32xf32> -> vector<4x16x32xf32>
    %120 = vector.extract_strided_slice %119 {offsets = [0, 0, 0], sizes = [1, 16, 32], strides = [1, 1, 1]} : vector<4x16x32xf32> to vector<1x16x32xf32>
    %121 = vector.shape_cast %120 : vector<1x16x32xf32> to vector<16x32xf32>
    %c0_25 = arith.constant 0 : index
    %c0_26 = arith.constant 0 : index
    %122 = vector.load %arg6[%c0_25, %c0_26] : memref<16x128xf32, #tpu.memory_space<vmem>>, vector<16x32xf32>
    tpu.vector_store %arg6[%c0_25, %c0_26], %121 {strides = array<i32>} : memref<16x128xf32, #tpu.memory_space<vmem>>, vector<16x32xf32>,
    %123 = vector.extract_strided_slice %119 {offsets = [1, 0, 0], sizes = [1, 16, 32], strides = [1, 1, 1]} : vector<4x16x32xf32> to vector<1x16x32xf32>
    %124 = vector.shape_cast %123 : vector<1x16x32xf32> to vector<16x32xf32>
    %c0_27 = arith.constant 0 : index
    %c32 = arith.constant 32 : index
    %125 = vector.load %arg6[%c0_27, %c32] : memref<16x128xf32, #tpu.memory_space<vmem>>, vector<16x32xf32>
    tpu.vector_store %arg6[%c0_27, %c32], %124 {strides = array<i32>} : memref<16x128xf32, #tpu.memory_space<vmem>>, vector<16x32xf32>,
    %126 = vector.extract_strided_slice %119 {offsets = [2, 0, 0], sizes = [1, 16, 32], strides = [1, 1, 1]} : vector<4x16x32xf32> to vector<1x16x32xf32>
    %127 = vector.shape_cast %126 : vector<1x16x32xf32> to vector<16x32xf32>
    %c0_28 = arith.constant 0 : index
    %c64 = arith.constant 64 : index
    %128 = vector.load %arg6[%c0_28, %c64] : memref<16x128xf32, #tpu.memory_space<vmem>>, vector<16x32xf32>
    tpu.vector_store %arg6[%c0_28, %c64], %127 {strides = array<i32>} : memref<16x128xf32, #tpu.memory_space<vmem>>, vector<16x32xf32>,
    %129 = vector.extract_strided_slice %119 {offsets = [3, 0, 0], sizes = [1, 16, 32], strides = [1, 1, 1]} : vector<4x16x32xf32> to vector<1x16x32xf32>
    %130 = vector.shape_cast %129 : vector<1x16x32xf32> to vector<16x32xf32>
    %c0_29 = arith.constant 0 : index
    %c96 = arith.constant 96 : index
    %131 = vector.load %arg6[%c0_29, %c96] : memref<16x128xf32, #tpu.memory_space<vmem>>, vector<16x32xf32>
    tpu.vector_store %arg6[%c0_29, %c96], %130 {strides = array<i32>} : memref<16x128xf32, #tpu.memory_space<vmem>>, vector<16x32xf32>,
    %c0_30 = arith.constant 0 : index
    %c0_31 = arith.constant 0 : index
    %132 = vector.load %arg6[%c0_30, %c0_31] : memref<16x128xf32, #tpu.memory_space<vmem>>, vector<16x128xf32>
    %133 = arith.truncf %132 : vector<16x128xf32> to vector<16x128xbf16>
    %cst_32 = arith.constant dense<0.000000e+00> : vector<16x128xf32>
    %134 = tpu.matmul %133, %18, %cst_32 {dimension_numbers = #tpu.dot_dimension_numbers<[1], [0], [0], [1], [0, 0, 1, 1], [], []>} : vector<16x128xbf16>, vector<128x128xbf16>, vector<16x128xf32> -> vector<16x128xf32>
    %135 = vector.broadcast %13 : vector<1x128xf32> to vector<16x128xf32>
    %136 = arith.addf %134, %135 : vector<16x128xf32>
    %137 = arith.addf %136, %42 : vector<16x128xf32>
    %cst_33 = arith.constant dense<0.000000e+00> : vector<16xf32>
    %138 = vector.multi_reduction <add>, %137, %cst_33 [1] : vector<16x128xf32> to vector<16xf32>
    %139 = vector.shape_cast %138 : vector<16xf32> to vector<16x1xf32>
    %cst_34 = arith.constant 1.280000e+02 : f32
    %140 = vector.broadcast %cst_34 : f32 to vector<16x1xf32>
    %141 = arith.divf %139, %140 : vector<16x1xf32>
    %142 = vector.broadcast %141 : vector<16x1xf32> to vector<16x128xf32>
    %143 = arith.subf %137, %142 : vector<16x128xf32>
    %144 = arith.mulf %143, %143 : vector<16x128xf32>
    %cst_35 = arith.constant dense<0.000000e+00> : vector<16xf32>
    %145 = vector.multi_reduction <add>, %144, %cst_35 [1] : vector<16x128xf32> to vector<16xf32>
    %146 = vector.shape_cast %145 : vector<16xf32> to vector<16x1xf32>
    %cst_36 = arith.constant 1.280000e+02 : f32
    %147 = vector.broadcast %cst_36 : f32 to vector<16x1xf32>
    %148 = arith.divf %146, %147 : vector<16x1xf32>
    %149 = vector.broadcast %141 : vector<16x1xf32> to vector<16x128xf32>
    %150 = arith.subf %137, %149 : vector<16x128xf32>
    %cst_37 = arith.constant 9.99999974E-6 : f32
    %151 = vector.broadcast %cst_37 : f32 to vector<16x1xf32>
    %152 = arith.addf %148, %151 : vector<16x1xf32>
    %153 = math.rsqrt %152 : vector<16x1xf32>
    %154 = vector.broadcast %153 : vector<16x1xf32> to vector<16x128xf32>
    %155 = arith.mulf %150, %154 : vector<16x128xf32>
    %156 = vector.broadcast %8 : vector<1x128xf32> to vector<16x128xf32>
    %157 = arith.mulf %155, %156 : vector<16x128xf32>
    %158 = vector.broadcast %9 : vector<1x128xf32> to vector<16x128xf32>
    %159 = arith.addf %157, %158 : vector<16x128xf32>
    %160 = arith.truncf %159 : vector<16x128xf32> to vector<16x128xbf16>
    %cst_38 = arith.constant dense<0.000000e+00> : vector<16x128xf32>
    %161 = tpu.matmul %160, %19, %cst_38 {dimension_numbers = #tpu.dot_dimension_numbers<[1], [0], [0], [1], [0, 0, 1, 1], [], []>} : vector<16x128xbf16>, vector<128x128xbf16>, vector<16x128xf32> -> vector<16x128xf32>
    %162 = vector.broadcast %14 : vector<1x128xf32> to vector<16x128xf32>
    %163 = arith.addf %161, %162 : vector<16x128xf32>
    %cst_39 = arith.constant 0.000000e+00 : f32
    %164 = vector.broadcast %cst_39 : f32 to vector<16x128xf32>
    %165 = arith.maximumf %163, %164 : vector<16x128xf32>
    %166 = arith.truncf %165 : vector<16x128xf32> to vector<16x128xbf16>
    %cst_40 = arith.constant dense<0.000000e+00> : vector<16x128xf32>
    %167 = tpu.matmul %166, %20, %cst_40 {dimension_numbers = #tpu.dot_dimension_numbers<[1], [0], [0], [1], [0, 0, 1, 1], [], []>} : vector<16x128xbf16>, vector<128x128xbf16>, vector<16x128xf32> -> vector<16x128xf32>
    %168 = vector.broadcast %15 : vector<1x128xf32> to vector<16x128xf32>
    %169 = arith.addf %167, %168 : vector<16x128xf32>
    %170 = arith.addf %169, %159 : vector<16x128xf32>
    %c0_41 = arith.constant 0 : index
    %c0_42 = arith.constant 0 : index
    %c0_43 = arith.constant 0 : index
    %171 = vector.load %arg5[%c0_41, %c0_42, %c0_43] : memref<1x16x128xf32, #tpu.memory_space<vmem>>, vector<1x16x128xf32>
    %172 = vector.shape_cast %171 : vector<1x16x128xf32> to vector<16x128xf32>
    %173 = vector.shape_cast %170 : vector<16x128xf32> to vector<1x16x128xf32>
    tpu.vector_store %arg5[%c0_41, %c0_42, %c0_43], %173 {strides = array<i32>} : memref<1x16x128xf32, #tpu.memory_space<vmem>>, vector<1x16x128xf32>,
    return
  }
  func.func @transform_0(%arg0: i32) -> (i32, i32, i32) {
    %c0_i32 = arith.constant 0 : i32
    %c0_i32_0 = arith.constant 0 : i32
    %c0_i32_1 = arith.constant 0 : i32
    return %arg0, %c0_i32, %c0_i32_0 : i32, i32, i32
  }
  func.func @transform_1(%arg0: i32) -> (i32, i32, i32) {
    %c0_i32 = arith.constant 0 : i32
    %c0_i32_0 = arith.constant 0 : i32
    %c0_i32_1 = arith.constant 0 : i32
    return %arg0, %c0_i32, %c0_i32_0 : i32, i32, i32
  }
  func.func @transform_2(%arg0: i32) -> (i32, i32) {
    %c0_i32 = arith.constant 0 : i32
    %c0_i32_0 = arith.constant 0 : i32
    %c0_i32_1 = arith.constant 0 : i32
    return %c0_i32, %c0_i32_0 : i32, i32
  }
  func.func @transform_3(%arg0: i32) -> (i32, i32) {
    %c0_i32 = arith.constant 0 : i32
    %c0_i32_0 = arith.constant 0 : i32
    %c0_i32_1 = arith.constant 0 : i32
    return %c0_i32, %c0_i32_0 : i32, i32
  }
  func.func @transform_4(%arg0: i32) -> (i32, i32, i32) {
    %c0_i32 = arith.constant 0 : i32
    %c0_i32_0 = arith.constant 0 : i32
    %c0_i32_1 = arith.constant 0 : i32
    return %arg0, %c0_i32, %c0_i32_0 : i32, i32, i32
  }
}

</mosaic_0001>

<bundles_post_ra>
// kernel: tpu_custom_call.1
= control target key start
LH: loop header
LB: loop body
LE: loop exit
PB: predicated region body
PF: predicated region fallthrough
CT: control target
= control target key end

     0   :  { %s2809_s0 = inlined_call_operand.hbm [shape: f32[2,16,128], index: 0, kind: input, shape index: {}]   ;;  %s2810_s1 = inlined_call_operand.hbm [shape: f32[2,1,16], index: 1, kind: input, shape index: {}]   ;;  %s2811_s2 = inlined_call_operand.hbm [shape: bf16[128,768], index: 2, kind: input, shape index: {}]   ;;  %s2812_s3 = inlined_call_operand.hbm [shape: f32[10,128], index: 3, kind: input, shape index: {}]   ;;  %s2813_s4 = inlined_call_operand.hbm [shape: f32[2,16,128], index: 4, kind: output, shape index: {}]  }
   0x1   :  { %2818 = sst [smem:[#allocation17_spill]] %s2809_s0 }
   0x2   :  { %2819 = sst [smem:[#allocation18_spill]] %s2811_s2 }
   0x3   :  { %2820 = sst [smem:[#allocation19_spill]] %s2812_s3 }
   0x4   :  { %9 = vsyncpa [#allocation4], 0 }
   0x5   :  { %11 = vsyncpa [#allocation4 + $0x1], 0 }
   0x6   :  { %12 = vsyncpa [#allocation7], 0 }
   0x7   :  { %14 = vsyncpa [#allocation7 + $0x1], 0 }
   0x8   :  { %15 = vsyncpa [#allocation10], 0 }
   0x9   :  { %16 = vsyncpa [#allocation5], 0 }
   0xa   :  { %18 = vsyncpa [#allocation5 + $0x1], 0  ;;  %s2355_s15 = smov 0   ;;  %s2357_s16 = smov 0  }
   0xb   :  { %s2359_s17 = smov 0   ;;  %s2361_s18 = smov 0  }
   0xc LB: > { %s2376_s19 = sadd.s32 4294967295, %s2311_s18   ;;  %s1629_s20 = sadd.s32 4294967294, %s2311_s18   ;;  %s2311_s18 = sphi %s2361_s18, %s2848_s18   ;;  %s2307_s17 = sphi %s2359_s17, %s2847_s17   ;;  %s2303_s16 = sphi %s2357_s16, %s2846_s16   ;;  %s2299_s15 = sphi %s2355_s15, %s2845_s15  }
   0xd   : > { %p44_p0 = scmp.ne.s32.totalorder %s2303_s16, %s2299_s15  ;;  %p2814_p1 = scmp.eq.s32.totalorder %s2376_s19, 0 }
   0xe   : > { %p142_p3 = scmp.eq.s32.totalorder %s1629_s20, 1  ;;  %p1630_p5 = scmp.ge.s32.totalorder %s2311_s18, 1 }
   0xf   : > { %p2385_p4 = por %p2814_p1, %p44_p0  ;;  %p149_p7 = scmp.lt.s32.totalorder %s2311_s18, 3 }
  0x10   : > { %p2390_p6 = por %p142_p3, %p44_p0  ;;  %s2313_s24 = smov [#allocation8]  }
  0x11   : > { %s2821_s21 = scalar_select %p2385_p4, 1, 0 }
  0x12   : > { %s2822_s22 = scalar_select %p2390_p6, 1, 0 }
  0x13   : > { %p2395_p8 = pnand %p1630_p5, %p149_p7  ;;  %s161_s25 = sshll.u32 %s2313_s24, 4  ;;  %s162_s25 = int_to_ptr.vmem [resolvable:$true] %s161_s25 }
  0x14   : > { %s2314_s27 = smov [#allocation9]   ;;  %s2138_s29 = scalar_lea.vmem %s162_s25, 6144 }
  0x15   : > { %s2823_s23 = scalar_select %p2395_p8, 1, 0 }
  0x16   : > { %p1900_p9 = pneg %p2395_p8  ;;  %s174_s28 = sshll.u32 %s2314_s27, 4  ;;  %s175_s28 = int_to_ptr.vmem [resolvable:$true] %s174_s28 }
  0x17   : > { %p2139_p13 = scmp.ne.s32.totalorder %s162_s25, %s2138_s29  ;;  %p2146_p5 = scmp.lt.s32.totalorder %s162_s25, %s162_s25 }
  0x18   : > { %p2404_p11 = pnand %p1900_p9, %p2814_p1  ;;  %p2147_p7 = scmp.lt.s32.totalorder %s2138_s29, %s2138_s29 }
  0x1a   : > { %p2129_p12 = pneg %p2404_p11  ;;  %p2148_p10 = por %p2147_p7, %p2146_p5 }
  0x1c   : > { %p2141_p0 = pnand %p2139_p13, %p2129_p12 }
  0x1e   : > { %p2142_p3 = pneg %p2141_p0 }
  0x20   : > { %p2149_p9 = pnand %p2148_p10, %p2142_p3 }
  0x22   : > { %2152 = shalt.err (!%p2149_p9)
}
  0x23   : > { %s2315_s30 = smov 384   ;;  %s2316_s5 = smov 24  }
  0x24   : > { %s2825_s2 = sld [smem:[#allocation18_spill]]  ;;  %s2164_s8 = scalar_lea.vmem %s175_s28, 256 }
  0x25   : > { %p2165_p1 = scmp.ne.s32.totalorder %s175_s28, %s2164_s8  ;;  %p2172_p2 = scmp.lt.s32.totalorder %s175_s28, %s175_s28 }
  0x26   : > { %p2173_p6 = scmp.lt.s32.totalorder %s2164_s8, %s2164_s8 }
  0x27   : > { %p2167_p13 = pnand %p2165_p1, %p2129_p12 }
  0x28   : > { %p2174_p5 = por %p2173_p6, %p2172_p2 }
  0x29   : > { %p2168_p0 = pneg %p2167_p13 }
  0x2a   : > { %1903 = dma.hbm_to_vmem [thread:$0]  (!%p2404_p11), %s2825_s2, 6144, %s162_s25, [#allocation7], %s2315_s30, %s2315_s30, %s2316_s5  }
  0x2b   : > { %p2175_p10 = pnand %p2174_p5, %p2168_p0 }
  0x2d   : > { %2178 = shalt.err (!%p2175_p10)
}
  0x2e   : > { %s2317_s9 = smov 128   ;;  %s2318_s10 = smov 8  }
  0x2f   : > { %s2826_s3 = sld [smem:[#allocation19_spill]]  ;;  %s2430_s13 = sadd.s32 1, %s2311_s18  }
  0x30   : > { %s28_s14 = ssub.s32 %s2311_s18, %s2430_s13  ;;  %s31_s20 = sadd.s32 1, %s2307_s17 }
  0x31   : > { %p29_p1 = scmp.eq.s32.totalorder %s28_s14, 0  ;;  %p38_p2 = scmp.ne.s32.totalorder %s2307_s17, %s2303_s16 }
  0x32   : > { %p39_p6 = scmp.eq.s32.totalorder %s2311_s18, 0  ;;  %p2827_p3 = scmp.eq.s32.totalorder %s2376_s19, 1 }
  0x33   : > { %s2439_s24 = scalar_select %p29_p1, %s2307_s17, %s31_s20  }
  0x34   : > { %p40_p12 = por %p39_p6, %p38_p2  ;;  %p2443_p7 = por %p2827_p3, %p38_p2 }
  0x35   : > { %1906 = dma.hbm_to_vmem [thread:$0]  (!%p2404_p11), %s2826_s3, 256, %s175_s28, [#allocation10], %s2317_s9, %s2317_s9, %s2318_s10  }
  0x36   : > { %s2828_s25 = scalar_select %p2443_p7, 1, 0 }
  0x37   : > { %p1920_p9 = scmp.lt.s32.totalorder %s2311_s18, 2  ;;  %s2449_s26 = sand.u32 1, %s2307_s17  }
  0x38   : > { %s1634_s27 = sshll.u32 %s2449_s26, 4  ;;  %s1704_s28 = sshll.u32 %s2311_s18, 8 }
  0x39   : > { %s2829_s0 = sld [smem:[#allocation17_spill]]  ;;  %s192_s6 = scalar_lea.vmem [#allocation3], %s1634_s27 }
  0x3a   : > { %s199_s7 = sshll.u32 %s192_s6, 4  ;;  %p2460_p11 = pnand %p1920_p9, %p40_p12  ;;  %s2458_s7 = int_to_ptr.vmem [resolvable:$true] %s199_s7 }
  0x3b   : > { %s189_s12 = scalar_lea.sflag [#allocation4], %s2449_s26 }
  0x3c   : > { %p2181_p0 = pneg %p2460_p11 }
  0x3f   : > { %s2456_s5 = scalar_lea.hbm %s2829_s0, %s1704_s28  ;;  %s2184_s28 = scalar_lea.hbm %s2829_s0, 512 }
  0x40   : > { %s2179_s14 = scalar_lea.hbm %s2456_s5, 256  ;;  %p2185_p1 = scmp.lt.s32.totalorder %s2456_s5, %s2829_s0 }
  0x41   : > { %p2180_p13 = scmp.ne.s32.totalorder %s2456_s5, %s2179_s14  ;;  %p2186_p2 = scmp.lt.s32.totalorder %s2184_s28, %s2179_s14 }
  0x43   : > { %p2182_p5 = pnand %p2181_p0, %p2180_p13  ;;  %p2187_p6 = por %p2186_p2, %p2185_p1 }
  0x45   : > { %p2183_p10 = pneg %p2182_p5 }
  0x47   : > { %p2188_p12 = pnand %p2187_p6, %p2183_p10 }
  0x49   : > { %2191 = shalt.err (!%p2188_p12)
}
  0x4a   : > { %s2192_s6 = scalar_lea.vmem %s2458_s7, 256  ;;  %s2319_s20 = smov [#allocation3]  }
  0x4b   : > { %p2193_p3 = scmp.ne.s32.totalorder %s2458_s7, %s2192_s6  ;;  %s2197_s27 = sshll.u32 %s2319_s20, 4  ;;  %s2198_s27 = int_to_ptr.vmem [resolvable:$false] %s2197_s27 }
  0x4c   : > { %s2199_s11 = scalar_lea.vmem %s2198_s27, 512  ;;  %p2200_p5 = scmp.lt.s32.totalorder %s2458_s7, %s2198_s27 }
  0x4d   : > { %p2195_p9 = pnand %p2193_p3, %p2181_p0  ;;  %p2201_p7 = scmp.lt.s32.totalorder %s2199_s11, %s2192_s6 }
  0x4f   : > { %p2196_p13 = pneg %p2195_p9  ;;  %p2202_p4 = por %p2201_p7, %p2200_p5 }
  0x51   : > { %p2203_p1 = pnand %p2202_p4, %p2196_p13 }
  0x53   : > { %2206 = shalt.err (!%p2203_p1)
}
  0x54   : > { %1910 = dma.hbm_to_vmem [thread:$0]  (!%p2460_p11), %s2456_s5, 256, %s2458_s7, %s189_s12, %s2317_s9, %s2317_s9, %s2318_s10  }
  0x55   : > { %s1637_s14 = sshll.u32 %s2311_s18, 4  ;;  %s212_s28 = scalar_lea.vmem [#allocation6], %s2449_s26 }
  0x56   : > { %s219_s11 = sshll.u32 %s212_s28, 4  ;;  %s217_s6 = scalar_lea.hbm %s2810_s1, %s1637_s14  ;;  %s220_s11 = int_to_ptr.vmem [resolvable:$true] %s219_s11 }
  0x57   : > { %s2831_s20 = sand.u32 1, %s2311_s18   ;;  %s2207_s0 = scalar_lea.hbm %s217_s6, 16 }
  0x58   : > { %s210_s27 = scalar_lea.sflag [#allocation7], %s2831_s20  ;;  %p2208_p4 = scmp.ne.s32.totalorder %s217_s6, %s2207_s0 }
  0x59   : > { %s2212_s9 = scalar_lea.hbm %s2810_s1, 32  ;;  %p2213_p2 = scmp.lt.s32.totalorder %s217_s6, %s2810_s1 }
  0x5a   : > { %p2210_p7 = pnand %p2208_p4, %p2181_p0  ;;  %p2214_p6 = scmp.lt.s32.totalorder %s2212_s9, %s2207_s0 }
  0x5c   : > { %p2211_p10 = pneg %p2210_p7  ;;  %p2215_p12 = por %p2214_p6, %p2213_p2 }
  0x5e   : > { %p2216_p3 = pnand %p2215_p12, %p2211_p10 }
  0x60   : > { %2219 = shalt.err (!%p2216_p3)
}
  0x61   : > { %s2220_s5 = scalar_lea.vmem %s220_s11, 16  ;;  %s2320_s7 = smov [#allocation6]  }
  0x62   : > { %p2221_p9 = scmp.ne.s32.totalorder %s220_s11, %s2220_s5  ;;  %s2225_s12 = sshll.u32 %s2320_s7, 4  ;;  %s2226_s12 = int_to_ptr.vmem [resolvable:$false] %s2225_s12 }
  0x63   : > { %s2227_s2 = scalar_lea.vmem %s2226_s12, 32  ;;  %p2228_p1 = scmp.lt.s32.totalorder %s220_s11, %s2226_s12 }
  0x64   : > { %p2223_p13 = pnand %p2221_p9, %p2181_p0  ;;  %p2229_p4 = scmp.lt.s32.totalorder %s2227_s2, %s2220_s5 }
  0x66   : > { %p2224_p5 = pneg %p2223_p13  ;;  %p2230_p7 = por %p2229_p4, %p2228_p1 }
  0x68   : > { %p2231_p8 = pnand %p2230_p7, %p2224_p5 }
  0x6a   : > { %2234 = shalt.err (!%p2231_p8)
}
  0x6b   : > { %1913 = dma.hbm_to_vmem [thread:$0]  (!%p2460_p11), %s217_s6, 16, %s220_s11, %s210_s27  }
  0x6c   : > { %p2832_p10 = scmp.ne.s32.totalorder %s2823_s23, 0 }
  0x6d   : > { %s2519_s0 = sand.u32 (!%p2832_p10), 1, %s2303_s16   ;;  %p2833_p0 = scmp.ne.s32.totalorder (!%p2832_p10), %s2821_s21, 0 }
  0x6e   : > { %228 = sbr.rel (%p2832_p10) target bundleno = 2593 (0xa21), region = 36  ;;  %s1639_s3 = sshll.u32 (!%p2832_p10), %s2519_s0, 4 }
  0x6f   : > { %s231_s14 = scalar_lea.sflag (!%p2832_p10), [#allocation4], %s2519_s0  ;;  %s234_s28 = scalar_lea.vmem (!%p2832_p10), [#allocation3], %s1639_s3 }
  0x73   : > { %2278 = dma.done.wait (%p2833_p0), %s231_s14, 256  }
  0x74   : > { %2280 = vsyncadd (%p2833_p0), %s231_s14, 4294967040  ;;  %s239_s23 = sand.u32 1, %s2376_s19   ;;  %s242_s11 = scalar_lea.vmem [#allocation6], %s2519_s0 }
  0x75   : > { %s240_s8 = scalar_lea.sflag [#allocation7], %s239_s23 }
  0x76   : > { %2282 = dma.done.wait (%p2833_p0), %s240_s8, 16  }
  0x77   : > { %2284 = vsyncadd (%p2833_p0), %s240_s8, 4294967280  ;;  %p2834_p8 = scmp.eq.s32.totalorder %s2376_s19, 0 }
  0x79   : > { %2286 = dma.done.wait (%p2834_p8), [#allocation7], 6144   ;;  %p2835_p11 = pmov %p2834_p8 }
  0x7a   : > { %p2836_p2 = pmov %p2834_p8 }
  0x7b   : > { %2288 = vsyncadd (%p2835_p11), [#allocation7], 4294961152 }
  0x7c   : > { %2290 = dma.done.wait (%p2836_p2), [#allocation10], 256   ;;  %p2837_p6 = pmov %p2836_p2 }
  0x7d   : > { %v2543_v0 = vld [vmem:[%s234_s28] sm:$0xff]  ;;  %v2545_v1 = vld [vmem:[%s234_s28 + $0x8] sm:$0xff]  ;;  %v2321_v4 = vmov 0.0   ;;  %v356_v25 = vlaneseq  ;;  %vm2322_vm0 = vmmov 0   ;;  %v2323_v37 = vmov 0   ;;  %s2324_s21 = smov 96  }
  0x7e   : > { %2292 = vsyncadd (%p2837_p6), [#allocation10], 4294967040  ;;  %333 = vadd.xlane.f32.xlu0 %v2543_v0  ;;  %v2015_v2 = vld [vmem:[#allocation8 + $0x150] ss:$24 sps:$4 sm:$0xff]   ;;  %1758 = vmatprep.subr.bf16.mxu0 %v2321_v4  ;;  %v2022_v5 = vld [vmem:[#allocation8 + $0x154] ss:$24 sps:$4 sm:$0xff]   ;;  %v368_v44 = vpack.c.bf16 %v2545_v1, %v2543_v0 }
  0x7f   : > { %v2017_v3 = vld [vmem:[#allocation8 + $0x158] ss:$24 sps:$4 sm:$0xff]   ;;  %1759 = vmatpush3.bf16.msra.mxu0 %v2015_v2  ;;  %v2023_v15 = vld [vmem:[#allocation8 + $0x128] ss:$24 sps:$4 sm:$0xff]   ;;  %v2028_v17 = vld [vmem:[#allocation8 + $0x124] ss:$24 sps:$4 sm:$0xff]   ;;  %1774 = vmatprep.mubr.msk.bf16.mxu0 %vm2322_vm0, %v2321_v4 }
  0x80   : > { %543 = vmatprep.subr.bf16.mxu1 %v2017_v3  ;;  %v2020_v6 = vld [vmem:[#allocation8 + $0x120] ss:$24 sps:$4 sm:$0xff]   ;;  %1760 = vmatprep.subr.bf16.mxu0 %v2321_v4  ;;  %v2026_v16 = vld [vmem:[#allocation8 + $0xf0] ss:$24 sps:$4 sm:$0xff]   ;;  %v2034_v20 = vld [vmem:[#allocation8 + $0xf4] ss:$24 sps:$4 sm:$0xff]  }
  0x81   : > { %544 = vmatpush1.bf16.msra.mxu1 %v2022_v5  ;;  %v2029_v18 = vld [vmem:[#allocation8 + $0xf8] ss:$24 sps:$4 sm:$0xff]   ;;  %v2035_v21 = vld [vmem:[#allocation8 + $0xc8] ss:$24 sps:$4 sm:$0xff]   ;;  %v2040_v23 = vld [vmem:[#allocation8 + $0xc4] ss:$24 sps:$4 sm:$0xff]   ;;  %575 = vmatprep.mubr.bf16.mxu1 %v2323_v37 }
  0x82   : > { %335 = vadd.xlane.f32.xlu0 %v2545_v1  ;;  %545 = vmatprep.subr.bf16.mxu1 %v2023_v15  ;;  %v2032_v19 = vld [vmem:[#allocation8 + $0xc0] ss:$24 sps:$4 sm:$0xff]   ;;  %v2038_v22 = vld [vmem:[#allocation8 + $0x90] ss:$24 sps:$4 sm:$0xff]   ;;  %v2046_v27 = vld [vmem:[#allocation8 + $0x94] ss:$24 sps:$4 sm:$0xff]  }
  0x83   : > { %1761 = vmatpush3.bf16.msra.mxu0 %v2020_v6  ;;  %v2041_v24 = vld [vmem:[#allocation8 + $0x98] ss:$24 sps:$4 sm:$0xff]   ;;  %v2047_v28 = vld [vmem:[#allocation8 + $0x68] ss:$24 sps:$4 sm:$0xff]   ;;  %v2565_v29 = vshrl.u32 %v356_v25, 7  ;;  %v602_v34 = vand.u32 127, %v356_v25 }
  0x84   : > { %1762 = vmatprep.subr.bf16.mxu0 %v2321_v4  ;;  %v2044_v26 = vld [vmem:[#allocation8 + $0x60] ss:$24 sps:$4 sm:$0xff]   ;;  %v2050_v30 = vld [vmem:[#allocation8 + $0x30] ss:$24 sps:$4 sm:$0xff]   ;;  %v2052_v31 = vld [vmem:[#allocation8 + $0x64] ss:$24 sps:$4 sm:$0xff]  }
  0x85   : > { %546 = vmatpush1.bf16.msra.mxu1 %v2028_v17  ;;  %v282_v32 = vld [vmem:[%s242_s11] sm:$0x1]  ;;  %v600_v33 = vadd.s32 8, %v2565_v29  ;;  %v2053_v35 = vld [vmem:[#allocation8 + $0x38] ss:$24 sps:$4 sm:$0xff]   ;;  %v2574_v36 = vsub.s32 0, %v2565_v29  ;;  %vm603_vm2 = vcmp.ge.s32.totalorder %v2565_v29, %v602_v34 }
  0x86   : > { %547 = vmatprep.subr.bf16.mxu1 %v2029_v18  ;;  %vm605_vm1 = vcmp.gt.f32.partialorder %v282_v32, 0.0  ;;  %v2056_v40 = vld [vmem:[#allocation8] ss:$24 sps:$4 sm:$0xff]   ;;  %v2058_v41 = vld [vmem:[#allocation8 + $0x34] ss:$24 sps:$4 sm:$0xff]   ;;  %v364_v57 = vsub.s32 1, %v2565_v29 }
  0x87   : > { %1763 = vmatpush3.bf16.msra.mxu0 %v2026_v16  ;;  %v606_v38 = vsel %vm605_vm1, 1, %v2323_v37  ;;  %vm604_vm3 = vcmp.ge.s32.totalorder %v600_v33, %v602_v34  ;;  %v2059_v42 = vld [vmem:[#allocation8 + $0x8] ss:$24 sps:$4 sm:$0xff]   ;;  %v2062_v46 = vld [vmem:[#allocation8 + $0x4] ss:$24 sps:$4 sm:$0xff]   ;;  %v371_v2 = vsub.s32 4, %v2565_v29 }
  0x88   : > { %1764 = vmatprep.subr.bf16.mxu0 %v2321_v4  ;;  %v610_v39 = vrot.slane %v606_v38, %v2574_v36  ;;  %v2593_v53 = vld [vmem:[#allocation9] sm:$0xff]  ;;  %vm692_vm7 = vcmask 261120   ;;  %s2325_s29 = smov 64   ;;  %s2326_s30 = smov 32   ;;  %vm897_vm8 = vcmask 130048   ;;  %vm1184_vm9 = vcmask 523520  }
  0x89   : > { %548 = vmatpush1.bf16.msra.mxu1 %v2034_v20  ;;  %v359_v56 = vrot.slane %v2593_v53, %v2574_v36  ;;  %v365_v61 = vrot.slane %v2593_v53, %v364_v57  ;;  %v372_v3 = vrot.slane %v2593_v53, %v371_v2  ;;  %vm1195_vm10 = vcmask 785920   ;;  %s278_s6 = scalar_lea.vmem [#allocation11], %s1639_s3  ;;  %s1705_s27 = sshll.u32 %s2376_s19, 8 }
  0x8a   : > { %549 = vmatprep.subr.bf16.mxu1 %v2035_v21  ;;  %vm611_vm4 = vcmp.eq.s32.totalorder %v610_v39, 1  ;;  %vm1206_vm11 = vcmask 1048320   ;;  %s1517_s20 = sshll.u32 %s278_s6, 4  ;;  %s2766_s26 = scalar_lea.hbm %s2813_s4, %s1705_s27  ;;  %s2761_s20 = int_to_ptr.vmem [resolvable:$true] %s1517_s20 }
  0x8b   : > { %1765 = vmatpush3.bf16.msra.mxu0 %v2032_v19  ;;  %vm2579_vm5 = vmand %vm603_vm2, %vm611_vm4  ;;  %s1504_s5 = scalar_lea.sflag [#allocation5], %s2519_s0  ;;  %s2235_s7 = scalar_lea.vmem %s2761_s20, 256 }
  0x8c   : > { %1766 = vmatprep.subr.bf16.mxu0 %v2321_v4  ;;  %vm2585_vm6 = vmand %vm604_vm3, %vm611_vm4  ;;  %p2236_p12 = scmp.ne.s32.totalorder %s2761_s20, %s2235_s7  ;;  %p2842_p3 = scmp.ne.s32.totalorder %s2828_s25, 0 }
  0x8d   : > { %550 = vmatpush1.bf16.msra.mxu1 %v2040_v23  ;;  %s2327_s19 = smov [#allocation11]  }
  0x8e   : > { %551 = vmatprep.subr.bf16.mxu1 %v2041_v24  ;;  %p2237_p9 = pnand %p2236_p12, %p2842_p3  ;;  %s2239_s12 = sshll.u32 %s2327_s19, 4  ;;  %s2240_s12 = int_to_ptr.vmem [resolvable:$false] %s2239_s12 }
  0x8f   : > { %1767 = vmatpush3.bf16.msra.mxu0 %v2038_v22  ;;  %s2241_s2 = scalar_lea.vmem %s2240_s12, 512  ;;  %p2242_p5 = scmp.lt.s32.totalorder %s2761_s20, %s2240_s12 }
  0x90   : > { %1768 = vmatprep.subr.bf16.mxu0 %v2321_v4  ;;  %p2238_p13 = pneg %p2237_p9  ;;  %p2243_p1 = scmp.lt.s32.totalorder %s2241_s2, %s2235_s7 }
  0x91   : > { %552 = vmatpush1.bf16.msra.mxu1 %v2046_v27 }
  0x92   : > { %553 = vmatprep.subr.bf16.mxu1 %v2047_v28  ;;  %p2244_p4 = por %p2243_p1, %p2242_p5 }
  0x93   : > { %1769 = vmatpush3.bf16.msra.mxu0 %v2044_v26 }
  0x94   : > { %1770 = vmatprep.subr.bf16.mxu0 %v2321_v4  ;;  %p2245_p7 = pnand %p2244_p4, %p2238_p13 }
  0x95   : > { %554 = vmatpush1.bf16.msra.mxu1 %v2052_v31 }
  0x96   : > { %555 = vmatprep.subr.bf16.mxu1 %v2053_v35 }
  0x97   : > { %1771 = vmatpush3.bf16.msra.mxu0 %v2050_v30 }
  0x98   : > { %1772 = vmatprep.subr.bf16.mxu0 %v2321_v4 }
  0x99   : > { %556 = vmatpush1.bf16.msra.mxu1 %v2058_v41 }
  0x9a   : > { %557 = vmatprep.subr.bf16.mxu1 %v2059_v42 }
  0x9b   : > { %1773 = vmatpush3.bf16.msra.mxu0 %v2056_v40 }
  0x9c   : > { %1802 = vmatprep.subr.bf16.mxu0 %v2321_v4 }
  0x9d   : > { %558 = vmatpush1.bf16.msra.mxu1 %v2062_v46 }
  0x9e   : > { %1775 = vmatmul.mubr.bf16.vlgmr.msra.gmra.mxu0 %v368_v44  ;;  %1778 = vmatprep.subr.bf16.mxu1 %v2321_v4 }
  0x9f   : > { %1804 = vmatprep.mubr.msk.bf16.mxu0 %vm2322_vm0, %v2321_v4 }
 0x107   : > { %v334_v7 = vpop.xlane.xlu0 %333 }
 0x108   : > { %v338_v8 = vmul.f32 0.0078125, %v334_v7 }
 0x10a   : > { %v2553_v9 = vsub.f32 %v2543_v0, %v338_v8 }
 0x10b   : > { %v336_v10 = vpop.xlane.xlu0 %335 }
 0x10c   : > { %v339_v11 = vmul.f32 0.0078125, %v336_v10  ;;  %v342_v12 = vmul.f32 %v2553_v9, %v2553_v9 }
 0x10e   : > { %v2558_v13 = vsub.f32 %v2545_v1, %v339_v11  ;;  %344 = vadd.xlane.f32.xlu1 %v342_v12 }
 0x110   : > { %v343_v14 = vmul.f32 %v2558_v13, %v2558_v13 }
 0x112   : > { %346 = vadd.xlane.f32.xlu1 %v343_v14  ;;  %v594_v14 = vsub.s32 6, %v2565_v29 }
 0x114   : > { %v595_v18 = vrot.slane %v2593_v53, %v594_v14 }
 0x15e   : > { %v455_v5 = vpop.f32.mrf.mxu0 }
 0x15f   : > { %v456_v7 = vadd.f32 %v455_v5, %v372_v3 }
 0x160   : > { %v1776_v6 = vpop.f32.mrf.mxu0 }
 0x162   : > { %v458_v8 = vpop.f32.mrf.mxu0 }
 0x164   : > { %v1777_v10 = vpop.f32.mrf.mxu0 }
 0x197   : > { %v345_v47 = vpop.xlane.xlu1 %344 }
 0x198   : > { %v348_v48 = vmul.f32 0.0078125, %v345_v47 }
 0x19a   : > { %v350_v49 = vadd.f32 1e-05, %v348_v48 }
 0x19b   : > { %v347_v50 = vpop.xlane.xlu1 %346 }
 0x19c   : > { %2087 = vrsqrt.f32 %v350_v49  ;;  %v349_v51 = vmul.f32 0.0078125, %v347_v50 }
 0x19e   : > { %v351_v52 = vadd.f32 1e-05, %v349_v51 }
 0x1a0   : > { %2089 = vrsqrt.f32 %v351_v52 }
 0x1a9   : > { %v2088_v54 = vpop.eup %2087 }
 0x1aa   : > { %v354_v55 = vmul.f32 %v2088_v54, %v2553_v9  ;;  %v459_v9 = vadd.f32 %v458_v8, %v372_v3  ;;  %v2655_v3 = vsel %vm2585_vm6, 1.0, %v2321_v4 }
 0x1ab   : > { %v617_v6 = vsub.f32 1.0, %v2655_v3 }
 0x1ac   : > { %v360_v60 = vmul.f32 %v359_v56, %v354_v55  ;;  %v640_v11 = vpack.c.bf16 %v459_v9, %v456_v7  ;;  %v1975_v12 = vpack.i.bf16 %v459_v9, %v456_v7 }
 0x1ad   : > { %v2090_v58 = vpop.eup %2089 }
 0x1ae   : > { %v355_v59 = vmul.f32 %v2090_v58, %v2558_v13  ;;  %v2603_v63 = vadd.f32 %v365_v61, %v360_v60  ;;  %1976 = vrot.lane.b32.xlu1 %v1975_v12, %s2324_s21  ;;  %v588_v13 = vsub.s32 5, %v2565_v29 }
 0x1b0   : > { %v361_v62 = vmul.f32 %v359_v56, %v355_v59  ;;  %v589_v16 = vrot.slane %v2593_v53, %v588_v13 }
 0x1b2   : > { %v2605_v0 = vadd.f32 %v365_v61, %v361_v62 }
 0x1b4   : > { %v462_v1 = vpack.c.bf16 %v2605_v0, %v2603_v63 }
 0x1b6   : > { %576 = vmatmul.mubr.bf16.vlgmr.msra.gmra.mxu1 %v462_v1  ;;  %v2649_v1 = vsel %vm2579_vm5, 1.0, %v2321_v4 }
 0x1b7   : > { %1780 = vmatprep.mubr.msk.bf16.mxu1 %vm2322_vm0, %v2321_v4  ;;  %v616_v2 = vsub.f32 1.0, %v2649_v1 }
 0x1b9   : > { %v618_v5 = vmul.f32 -1e+09, %v616_v2 }
 0x220   : > { %v1977_v31 = vpop.permute.xlu1 %1976 }
 0x221   : > { %v1979_v41 = vunpack.i.h.bf16 %v1977_v31  ;;  %v1978_v42 = vunpack.i.l.bf16 %v1977_v31 }
 0x223   : > { %v641_v47 = vpack.c.bf16 %v1979_v41, %v1978_v42 }
 0x276   : > { %v577_v15 = vpop.f32.mrf.mxu1 }
 0x277   : > { %v590_v20 = vadd.f32 %v589_v16, %v577_v15 }
 0x278   : > { %v579_v17 = vpop.f32.mrf.mxu1 }
 0x279   : > { %v596_v22 = vadd.f32 %v595_v18, %v579_v17 }
 0x27a   : > { %v581_v19 = vpop.f32.mrf.mxu1 }
 0x27b   : > { %v591_v21 = vadd.f32 %v589_v16, %v581_v19 }
 0x27c   : > { %v583_v23 = vpop.f32.mrf.mxu1 }
 0x27d   : > { %v597_v24 = vadd.f32 %v595_v18, %v583_v23  ;;  %v1970_v25 = vpack.i.bf16 %v591_v21, %v590_v20  ;;  %v664_v26 = vpack.c.bf16 %v591_v21, %v590_v20 }
 0x27f   : > { %1971 = vrot.lane.b32.xlu0 %v1970_v25, %s2324_s21  ;;  %1981 = vrot.lane.b32.xlu1 %v1970_v25, %s2325_s29  ;;  %v697_v27 = vsel %vm692_vm7, %v664_v26, 0  ;;  %v688_v28 = vpack.c.bf16 %v597_v24, %v596_v22  ;;  %v2621_v30 = vpack.i.bf16 %v597_v24, %v596_v22 }
 0x280   : > { %1779 = vmatpush3.bf16.xpose.msra.mxu1 %v697_v27 }
 0x281   : > { %1803 = vmatpush3.bf16.msra.mxu0 %v688_v28  ;;  %1784 = vmatprep.subr.bf16.mxu1 %v2321_v4 }
 0x282   : > { %1814 = vmatprep.subr.bf16.mxu0 %v2321_v4 }
 0x283   : > { %1991 = vrot.lane.b32.xlu0 %v1970_v25, %s2326_s30  ;;  %1986 = vrot.lane.b32.xlu1 %v1975_v12, %s2325_s29 }
 0x287   : > { %1996 = vrot.lane.b32.xlu1 %v1975_v12, %s2326_s30  ;;  %1781 = vmatmul.mubr.msk.bf16.vlgmr.msra.gmra.mxu1 %vm692_vm7, %v640_v11  ;;  %v619_v11 = vmul.f32 -1e+09, %v617_v6 }
 0x288   : > { %1786 = vmatprep.mubr.msk.bf16.mxu1 %vm2322_vm0, %v2321_v4 }
 0x2f1   : > { %v1972_v32 = vpop.permute.xlu0 %1971  ;;  %v1982_v37 = vpop.permute.xlu1 %1981 }
 0x2f2   : > { %v1974_v33 = vunpack.i.h.bf16 %v1972_v32  ;;  %v1973_v34 = vunpack.i.l.bf16 %v1972_v32  ;;  %v1984_v38 = vunpack.i.h.bf16 %v1982_v37  ;;  %v1983_v39 = vunpack.i.l.bf16 %v1982_v37 }
 0x2f4   : > { %v665_v35 = vpack.c.bf16 %v1974_v33, %v1973_v34  ;;  %v666_v44 = vpack.c.bf16 %v1984_v38, %v1983_v39 }
 0x2f5   : > { %v1992_v46 = vpop.permute.xlu0 %1991  ;;  %v1987_v48 = vpop.permute.xlu1 %1986 }
 0x2f6   : > { %v744_v40 = vsel %vm692_vm7, %v665_v35, 0  ;;  %v1994_v49 = vunpack.i.h.bf16 %v1992_v46  ;;  %v1993_v50 = vunpack.i.l.bf16 %v1992_v46  ;;  %v791_v51 = vsel %vm692_vm7, %v666_v44, 0 }
 0x2f7   : > { %1785 = vmatpush3.bf16.xpose.msra.mxu1 %v744_v40  ;;  %v1989_v52 = vunpack.i.h.bf16 %v1987_v48  ;;  %v1988_v54 = vunpack.i.l.bf16 %v1987_v48 }
 0x2f8   : > { %1790 = vmatprep.subr.bf16.mxu1 %v2321_v4  ;;  %v667_v55 = vpack.c.bf16 %v1994_v49, %v1993_v50 }
 0x2f9   : > { %v642_v56 = vpack.c.bf16 %v1989_v52, %v1988_v54  ;;  %v1997_v58 = vpop.permute.xlu1 %1996 }
 0x2fa   : > { %v838_v59 = vsel %vm692_vm7, %v667_v55, 0  ;;  %v1999_v60 = vunpack.i.h.bf16 %v1997_v58  ;;  %v1998_v61 = vunpack.i.l.bf16 %v1997_v58 }
 0x2fc   : > { %v643_v62 = vpack.c.bf16 %v1999_v60, %v1998_v61 }
 0x2fe   : > { %1787 = vmatmul.mubr.msk.bf16.vlgmr.msra.gmra.mxu1 %vm692_vm7, %v641_v47 }
 0x2ff   : > { %1791 = vmatpush3.bf16.xpose.msra.mxu1 %v791_v51  ;;  %1792 = vmatprep.mubr.msk.bf16.mxu1 %vm2322_vm0, %v2321_v4 }
 0x300   : > { %1796 = vmatprep.subr.bf16.mxu1 %v2321_v4 }
 0x306   : > { %1793 = vmatmul.mubr.msk.bf16.vlgmr.msra.gmra.mxu1 %vm692_vm7, %v642_v56 }
 0x307   : > { %1797 = vmatpush3.bf16.xpose.msra.mxu1 %v838_v59  ;;  %1798 = vmatprep.mubr.msk.bf16.mxu1 %vm2322_vm0, %v2321_v4 }
 0x308   : > { %1808 = vmatprep.subr.bf16.mxu1 %v2321_v4 }
 0x30e   : > { %1799 = vmatmul.mubr.msk.bf16.vlgmr.msra.gmra.mxu1 %vm692_vm7, %v643_v62 }
 0x30f   : > { %1810 = vmatprep.mubr.msk.bf16.mxu1 %vm2322_vm0, %v2321_v4 }
 0x347   : > { %v733_v7 = vpop.f32.mrf.mxu1 }
 0x348   : > { %v881_v8 = vmul.f32 0.17677669, %v733_v7 }
 0x349   : > { %v1782_v9 = vpop.f32.mrf.mxu1 }
 0x34a   : > { %v889_v10 = vadd.f32 %v881_v8, %v618_v5 }
 0x34b   : > { %v736_v12 = vpop.f32.mrf.mxu1 }
 0x34c   : > { %v882_v43 = vmul.f32 0.17677669, %v736_v12  ;;  %v898_v13 = vsel %vm897_vm8, %v889_v10, -inf }
 0x34d   : > { %899 = vmax.xlane.f32.xlu0 %v898_v13  ;;  %v1783_v14 = vpop.f32.mrf.mxu1 }
 0x34e   : > { %v890_v15 = vadd.f32 %v882_v43, %v619_v11 }
 0x350   : > { %v901_v45 = vsel %vm897_vm8, %v890_v15, -inf }
 0x351   : > { %902 = vmax.xlane.f32.xlu1 %v901_v45 }
 0x3be   : > { %v780_v16 = vpop.f32.mrf.mxu1 }
 0x3bf   : > { %v883_v17 = vmul.f32 0.17677669, %v780_v16 }
 0x3c0   : > { %v1788_v18 = vpop.f32.mrf.mxu1 }
 0x3c1   : > { %v891_v19 = vadd.f32 %v883_v17, %v618_v5 }
 0x3c2   : > { %v783_v20 = vpop.f32.mrf.mxu1 }
 0x3c3   : > { %v884_v21 = vmul.f32 0.17677669, %v783_v20  ;;  %v904_v22 = vsel %vm897_vm8, %v891_v19, -inf }
 0x3c4   : > { %905 = vmax.xlane.f32.xlu0 %v904_v22  ;;  %v1789_v23 = vpop.f32.mrf.mxu1 }
 0x3c5   : > { %v892_v24 = vadd.f32 %v884_v21, %v619_v11 }
 0x3c6   : > { %v827_v25 = vpop.f32.mrf.mxu1 }
 0x3c7   : > { %v885_v26 = vmul.f32 0.17677669, %v827_v25  ;;  %v907_v27 = vsel %vm897_vm8, %v892_v24, -inf }
 0x3c8   : > { %908 = vmax.xlane.f32.xlu0 %v907_v27  ;;  %v1794_v28 = vpop.f32.mrf.mxu1 }
 0x3c9   : > { %v893_v31 = vadd.f32 %v885_v26, %v618_v5 }
 0x3ca   : > { %v830_v32 = vpop.f32.mrf.mxu1 }
 0x3cb   : > { %v886_v33 = vmul.f32 0.17677669, %v830_v32  ;;  %v910_v34 = vsel %vm897_vm8, %v893_v31, -inf }
 0x3cc   : > { %911 = vmax.xlane.f32.xlu0 %v910_v34  ;;  %v1795_v35 = vpop.f32.mrf.mxu1 }
 0x3cd   : > { %v894_v37 = vadd.f32 %v886_v33, %v619_v11 }
 0x3ce   : > { %v874_v38 = vpop.f32.mrf.mxu1 }
 0x3cf   : > { %v887_v39 = vmul.f32 0.17677669, %v874_v38  ;;  %v913_v40 = vsel %vm897_vm8, %v894_v37, -inf }
 0x3d0   : > { %914 = vmax.xlane.f32.xlu1 %v913_v40  ;;  %v1800_v41 = vpop.f32.mrf.mxu1 }
 0x3d1   : > { %v895_v42 = vadd.f32 %v887_v39, %v618_v5 }
 0x3d2   : > { %v877_v44 = vpop.f32.mrf.mxu1 }
 0x3d3   : > { %v888_v46 = vmul.f32 0.17677669, %v877_v44  ;;  %v916_v47 = vsel %vm897_vm8, %v895_v42, -inf }
 0x3d4   : > { %917 = vmax.xlane.f32.xlu0 %v916_v47  ;;  %v1801_v48 = vpop.f32.mrf.mxu1 }
 0x3d5   : > { %v2665_v50 = vadd.f32 %v888_v46, %v619_v11 }
 0x3d6   : > { %v900_v49 = vpop.xlane.xlu0 %899 }
 0x3d7   : > { %v922_v51 = vsub.f32 %v889_v10, %v900_v49  ;;  %v919_v52 = vsel %vm897_vm8, %v2665_v50, -inf }
 0x3d8   : > { %920 = vmax.xlane.f32.xlu1 %v919_v52 }
 0x3d9   : > { %v930_v54 = vmul.f32 1.442695, %v922_v51 }
 0x3da   : > { %v903_v55 = vpop.xlane.xlu1 %902 }
 0x3db   : > { %2091 = vpow2.f32 %v930_v54  ;;  %v923_v56 = vsub.f32 %v890_v15, %v903_v55 }
 0x3dd   : > { %v932_v58 = vmul.f32 1.442695, %v923_v56 }
 0x3df   : > { %2093 = vpow2.f32 %v932_v58 }
 0x3e8   : > { %v2092_v59 = vpop.eup %2091 }
 0x3e9   : > { %v946_v60 = vsel %vm897_vm8, %v2092_v59, 0.0 }
 0x3ea   : > { %947 = vadd.xlane.f32.xlu0 %v946_v60 }
 0x3ec   : > { %v2094_v61 = vpop.eup %2093 }
 0x3ed   : > { %v949_v62 = vsel %vm897_vm8, %v2094_v61, 0.0 }
 0x3ee   : > { %950 = vadd.xlane.f32.xlu1 %v949_v62 }
 0x44d   : > { %v906_v2 = vpop.xlane.xlu0 %905 }
 0x44e   : > { %v924_v5 = vsub.f32 %v891_v19, %v906_v2 }
 0x450   : > { %v934_v6 = vmul.f32 1.442695, %v924_v5 }
 0x451   : > { %v909_v7 = vpop.xlane.xlu0 %908 }
 0x452   : > { %2095 = vpow2.f32 %v934_v6  ;;  %v925_v8 = vsub.f32 %v892_v24, %v909_v7 }
 0x454   : > { %v936_v9 = vmul.f32 1.442695, %v925_v8 }
 0x455   : > { %v912_v10 = vpop.xlane.xlu0 %911 }
 0x456   : > { %2097 = vpow2.f32 %v936_v9  ;;  %v926_v11 = vsub.f32 %v893_v31, %v912_v10 }
 0x458   : > { %v938_v12 = vmul.f32 1.442695, %v926_v11 }
 0x459   : > { %v915_v43 = vpop.xlane.xlu1 %914 }
 0x45a   : > { %2099 = vpow2.f32 %v938_v12  ;;  %v927_v13 = vsub.f32 %v894_v37, %v915_v43 }
 0x45c   : > { %v940_v14 = vmul.f32 1.442695, %v927_v13  ;;  %v2019_v13 = vld [vmem:[#allocation8 + $0x15c] ss:$24 sps:$4 sm:$0xff]  }
 0x45d   : > { %v918_v15 = vpop.xlane.xlu0 %917 }
 0x45e   : > { %2101 = vpow2.f32 %v940_v14  ;;  %v928_v45 = vsub.f32 %v895_v42, %v918_v15  ;;  %v2025_v15 = vld [vmem:[#allocation8 + $0x12c] ss:$24 sps:$4 sm:$0xff]  }
 0x45f   : > { %v2096_v16 = vpop.eup %2095 }
 0x460   : > { %v942_v17 = vmul.f32 1.442695, %v928_v45  ;;  %v952_v18 = vsel %vm897_vm8, %v2096_v16, 0.0  ;;  %v2031_v45 = vld [vmem:[#allocation8 + $0xfc] ss:$24 sps:$4 sm:$0xff]  }
 0x461   : > { %953 = vadd.xlane.f32.xlu0 %v952_v18  ;;  %v921_v27 = vpop.xlane.xlu1 %920  ;;  %v2049_v18 = vld [vmem:[#allocation8 + $0x6c] ss:$24 sps:$4 sm:$0xff]  }
 0x462   : > { %2103 = vpow2.f32 %v942_v17  ;;  %v929_v39 = vsub.f32 %v2665_v50, %v921_v27  ;;  %v2043_v17 = vld [vmem:[#allocation8 + $0x9c] ss:$24 sps:$4 sm:$0xff]  }
 0x463   : > { %v2098_v19 = vpop.eup %2097 }
 0x464   : > { %v955_v20 = vsel %vm897_vm8, %v2098_v19, 0.0  ;;  %v944_v41 = vmul.f32 1.442695, %v929_v39 }
 0x465   : > { %956 = vadd.xlane.f32.xlu1 %v955_v20  ;;  %v2061_v20 = vld [vmem:[#allocation8 + $0xc] ss:$24 sps:$4 sm:$0xff]  }
 0x467   : > { %v2100_v21 = vpop.eup %2099 }
 0x468   : > { %v958_v22 = vsel %vm897_vm8, %v2100_v21, 0.0 }
 0x469   : > { %959 = vadd.xlane.f32.xlu0 %v958_v22 }
 0x46b   : > { %v2102_v23 = vpop.eup %2101 }
 0x46c   : > { %v961_v24 = vsel %vm897_vm8, %v2102_v23, 0.0 }
 0x46d   : > { %962 = vadd.xlane.f32.xlu1 %v961_v24 }
 0x46f   : > { %v2675_v25 = vpop.eup %2103 }
 0x470   : > { %v964_v26 = vsel %vm897_vm8, %v2675_v25, 0.0 }
 0x471   : > { %965 = vadd.xlane.f32.xlu0 %v964_v26 }
 0x473   : > { %v948_v28 = vpop.xlane.xlu0 %947 }
 0x474   : > { %2105 = vrcp.f32 %v948_v28 }
 0x477   : > { %v951_v31 = vpop.xlane.xlu1 %950 }
 0x478   : > { %2107 = vrcp.f32 %v951_v31 }
 0x479   : > { %2109 = vpow2.f32 %v944_v41 }
 0x47e   : > { %2006 = vrot.lane.b32.xlu1 %v2621_v30, %s2325_s29 }
 0x481   : > { %v2106_v32 = vpop.eup %2105 }
 0x482   : > { %v978_v33 = vmul.f32 %v2106_v32, %v2092_v59 }
 0x484   : > { %v986_v37 = vmul.f32 %v978_v33, %v2649_v1 }
 0x485   : > { %v2108_v34 = vpop.eup %2107 }
 0x486   : > { %v979_v35 = vmul.f32 %v2108_v34, %v2094_v61  ;;  %v2689_v42 = vpop.eup %2109 }
 0x487   : > { %2001 = vrot.lane.b32.xlu0 %v2621_v30, %s2324_s21  ;;  %v967_v44 = vsel %vm897_vm8, %v2689_v42, 0.0 }
 0x488   : > { %v987_v38 = vmul.f32 %v979_v35, %v2655_v3 }
 0x48a   : > { %v994_v40 = vpack.c.bf16 %v987_v38, %v986_v37 }
 0x48c   : > { %1805 = vmatmul.mubr.msk.bf16.vlgmr.msra.gmra.mxu0 %vm897_vm8, %v994_v40 }
 0x48d   : > { %1816 = vmatprep.mubr.msk.bf16.mxu0 %vm2322_vm0, %v2321_v4 }
 0x4a2   : > { %968 = vadd.xlane.f32.xlu1 %v967_v44 }
 0x4b3   : > { %2011 = vrot.lane.b32.xlu1 %v2621_v30, %s2326_s30 }
 0x4ea   : > { %v954_v46 = vpop.xlane.xlu0 %953 }
 0x4eb   : > { %2111 = vrcp.f32 %v954_v46 }
 0x4ee   : > { %v957_v47 = vpop.xlane.xlu1 %956 }
 0x4ef   : > { %2113 = vrcp.f32 %v957_v47 }
 0x4f2   : > { %v960_v48 = vpop.xlane.xlu0 %959 }
 0x4f3   : > { %2115 = vrcp.f32 %v960_v48 }
 0x4f6   : > { %v963_v49 = vpop.xlane.xlu1 %962 }
 0x4f7   : > { %2117 = vrcp.f32 %v963_v49 }
 0x4f8   : > { %v2112_v52 = vpop.eup %2111 }
 0x4f9   : > { %v980_v60 = vmul.f32 %v2112_v52, %v2096_v16  ;;  %v2037_v16 = vld [vmem:[#allocation8 + $0xcc] ss:$24 sps:$4 sm:$0xff]  }
 0x4fa   : > { %v966_v50 = vpop.xlane.xlu0 %965  ;;  %v2007_v51 = vpop.permute.xlu1 %2006 }
 0x4fb   : > { %v2009_v54 = vunpack.i.h.bf16 %v2007_v51  ;;  %v2008_v55 = vunpack.i.l.bf16 %v2007_v51  ;;  %v988_v7 = vmul.f32 %v980_v60, %v2649_v1  ;;  %2119 = vrcp.f32 %v966_v50 }
 0x4fc   : > { %v2114_v56 = vpop.eup %2113 }
 0x4fd   : > { %v981_v58 = vmul.f32 %v2114_v56, %v2098_v19  ;;  %v690_v59 = vpack.c.bf16 %v2009_v54, %v2008_v55  ;;  %v2055_v19 = vld [vmem:[#allocation8 + $0x3c] ss:$24 sps:$4 sm:$0xff]  }
 0x4fe   : > { %v2002_v61 = vpop.permute.xlu0 %2001 }
 0x4ff   : > { %v2004_v62 = vunpack.i.h.bf16 %v2002_v61  ;;  %v2003_v30 = vunpack.i.l.bf16 %v2002_v61  ;;  %1815 = vmatpush3.bf16.msra.mxu0 %v690_v59  ;;  %v989_v5 = vmul.f32 %v981_v58, %v2655_v3 }
 0x500   : > { %v2116_v2 = vpop.eup %2115  ;;  %1826 = vmatprep.subr.bf16.mxu0 %v2321_v4 }
 0x501   : > { %v689_v6 = vpack.c.bf16 %v2004_v62, %v2003_v30  ;;  %v982_v8 = vmul.f32 %v2116_v2, %v2100_v21  ;;  %v995_v10 = vpack.c.bf16 %v989_v5, %v988_v7  ;;  %v1214_v30 = vsub.s32 7, %v2565_v29 }
 0x503   : > { %1809 = vmatpush3.bf16.msra.mxu1 %v689_v6  ;;  %v990_v12 = vmul.f32 %v982_v8, %v2649_v1  ;;  %v1215_v2 = vrot.slane %v2593_v53, %v1214_v30 }
 0x504   : > { %v2118_v9 = vpop.eup %2117  ;;  %1820 = vmatprep.subr.bf16.mxu1 %v2321_v4 }
 0x505   : > { %v983_v11 = vmul.f32 %v2118_v9, %v2102_v23 }
 0x506   : > { %1811 = vmatmul.mubr.msk.bf16.vlgmr.msra.gmra.mxu1 %vm897_vm8, %v995_v10 }
 0x507   : > { %v991_v43 = vmul.f32 %v983_v11, %v2655_v3  ;;  %1822 = vmatprep.mubr.msk.bf16.mxu1 %vm2322_vm0, %v2321_v4 }
 0x508   : > { %v2120_v27 = vpop.eup %2119 }
 0x509   : > { %v996_v14 = vpack.c.bf16 %v991_v43, %v990_v12  ;;  %v984_v28 = vmul.f32 %v2120_v27, %v2675_v25  ;;  %v2063_v43 = vld [vmem:[#allocation8 + $0x160] ss:$24 sps:$4 sm:$0xff]   ;;  %v2080_v27 = vld [vmem:[#allocation8 + $0x134] ss:$24 sps:$4 sm:$0xff]  }
 0x50b   : > { %1817 = vmatmul.mubr.msk.bf16.vlgmr.msra.gmra.mxu0 %vm897_vm8, %v996_v14  ;;  %v992_v33 = vmul.f32 %v984_v28, %v2649_v1  ;;  %v2081_v28 = vld [vmem:[#allocation8 + $0x104] ss:$24 sps:$4 sm:$0xff]  }
 0x50c   : > { %1827 = vmatpush3.bf16.msra.mxu0 %v2019_v13  ;;  %1842 = vmatprep.mubr.msk.bf16.mxu0 %vm2322_vm0, %v2321_v4 }
 0x50d   : > { %1828 = vmatprep.subr.bf16.mxu0 %v2321_v4 }
 0x510   : > { %1829 = vmatpush3.bf16.msra.mxu0 %v2025_v15 }
 0x511   : > { %1830 = vmatprep.subr.bf16.mxu0 %v2321_v4 }
 0x514   : > { %1831 = vmatpush3.bf16.msra.mxu0 %v2031_v45 }
 0x515   : > { %1832 = vmatprep.subr.bf16.mxu0 %v2321_v4 }
 0x518   : > { %1833 = vmatpush3.bf16.msra.mxu0 %v2037_v16 }
 0x519   : > { %1834 = vmatprep.subr.bf16.mxu0 %v2321_v4 }
 0x51c   : > { %1835 = vmatpush3.bf16.msra.mxu0 %v2043_v17 }
 0x51d   : > { %1836 = vmatprep.subr.bf16.mxu0 %v2321_v4 }
 0x520   : > { %1837 = vmatpush3.bf16.msra.mxu0 %v2049_v18 }
 0x521   : > { %1838 = vmatprep.subr.bf16.mxu0 %v2321_v4 }
 0x524   : > { %1839 = vmatpush3.bf16.msra.mxu0 %v2055_v19  ;;  %v2065_v19 = vld [vmem:[#allocation8 + $0x130] ss:$24 sps:$4 sm:$0xff]  }
 0x525   : > { %1840 = vmatprep.subr.bf16.mxu0 %v2321_v4 }
 0x528   : > { %1841 = vmatpush3.bf16.msra.mxu0 %v2061_v20  ;;  %v2069_v20 = vld [vmem:[#allocation8 + $0xd0] ss:$24 sps:$4 sm:$0xff]  }
 0x529   : > { %1866 = vmatprep.subr.bf16.mxu0 %v2321_v4 }
 0x52b   : > { %v969_v21 = vpop.xlane.xlu1 %968 }
 0x52c   : > { %2121 = vrcp.f32 %v969_v21  ;;  %v2071_v21 = vld [vmem:[#allocation8 + $0xa0] ss:$24 sps:$4 sm:$0xff]  }
 0x52f   : > { %v2012_v22 = vpop.permute.xlu1 %2011 }
 0x530   : > { %v2014_v23 = vunpack.i.h.bf16 %v2012_v22  ;;  %v2013_v24 = vunpack.i.l.bf16 %v2012_v22  ;;  %v2073_v22 = vld [vmem:[#allocation8 + $0x70] ss:$24 sps:$4 sm:$0xff]  }
 0x532   : > { %v691_v26 = vpack.c.bf16 %v2014_v23, %v2013_v24  ;;  %v2075_v23 = vld [vmem:[#allocation8 + $0x40] ss:$24 sps:$4 sm:$0xff]   ;;  %v2077_v24 = vld [vmem:[#allocation8 + $0x10] ss:$24 sps:$4 sm:$0xff]  }
 0x534   : > { %1821 = vmatpush3.bf16.msra.mxu1 %v691_v26  ;;  %v2079_v26 = vld [vmem:[#allocation8 + $0x164] ss:$24 sps:$4 sm:$0xff]  }
 0x535   : > { %1846 = vmatprep.subr.bf16.mxu1 %v2321_v4 }
 0x539   : > { %v2122_v31 = vpop.eup %2121 }
 0x53a   : > { %v985_v32 = vmul.f32 %v2122_v31, %v2689_v42  ;;  %v2082_v31 = vld [vmem:[#allocation8 + $0xd4] ss:$24 sps:$4 sm:$0xff]  }
 0x53c   : > { %v993_v34 = vmul.f32 %v985_v32, %v2655_v3  ;;  %v2083_v32 = vld [vmem:[#allocation8 + $0xa4] ss:$24 sps:$4 sm:$0xff]  }
 0x53e   : > { %v997_v35 = vpack.c.bf16 %v993_v34, %v992_v33 }
 0x540   : > { %1823 = vmatmul.mubr.msk.bf16.vlgmr.msra.gmra.mxu1 %vm897_vm8, %v997_v35 }
 0x541   : > { %1862 = vmatprep.mubr.msk.bf16.mxu1 %vm2322_vm0, %v2321_v4  ;;  %1847 = vmatpush3.bf16.msra.mxu1 %v2063_v43 }
 0x542   : > { %1848 = vmatprep.subr.bf16.mxu1 %v2321_v4 }
 0x545   : > { %1849 = vmatpush3.bf16.msra.mxu1 %v2065_v19 }
 0x546   : > { %1850 = vmatprep.subr.bf16.mxu1 %v2321_v4 }
 0x54c   : > { %v1035_v37 = vpop.f32.mrf.mxu0 }
 0x54d   : > { %1174 = vst.msk [vmem:[#allocation2] sm:$0xff] %vm692_vm7, %v1035_v37 }
 0x54e   : > { %v1806_v38 = vpop.f32.mrf.mxu0 }
 0x550   : > { %v1038_v39 = vpop.f32.mrf.mxu0 }
 0x551   : > { %1175 = vst.msk [vmem:[#allocation2 + $0x8] sm:$0xff] %vm692_vm7, %v1038_v39 }
 0x552   : > { %v1807_v25 = vpop.f32.mrf.mxu0 }
 0x553   : > { %v1315_v25 = vsub.s32 2, %v2565_v29 }
 0x5c6   : > { %v1079_v40 = vpop.f32.mrf.mxu1 }
 0x5c7   : > { %1178 = vrot.lane.b32.xlu1 %v1079_v40, %s2326_s30 }
 0x5c8   : > { %v1812_v1 = vpop.f32.mrf.mxu1 }
 0x5ca   : > { %v1082_v41 = vpop.f32.mrf.mxu1 }
 0x5cb   : > { %1180 = vrot.lane.b32.xlu0 %v1082_v41, %s2326_s30  ;;  %v1123_v3 = vpop.f32.mrf.mxu0  ;;  %v1316_v41 = vrot.slane %v2593_v53, %v1315_v25 }
 0x5cc   : > { %v1813_v42 = vpop.f32.mrf.mxu1  ;;  %1189 = vrot.lane.b32.xlu1 %v1123_v3, %s2325_s29  ;;  %v1321_v3 = vsub.s32 3, %v2565_v29 }
 0x5cd   : > { %v1818_v44 = vpop.f32.mrf.mxu0 }
 0x5cf   : > { %v1126_v46 = vpop.f32.mrf.mxu0 }
 0x5d0   : > { %1191 = vrot.lane.b32.xlu0 %v1126_v46, %s2325_s29 }
 0x5d1   : > { %v1819_v47 = vpop.f32.mrf.mxu0 }
 0x5d2   : > { %v1322_v47 = vrot.slane %v2593_v53, %v1321_v3 }
 0x600   : > { %v1167_v48 = vpop.f32.mrf.mxu1 }
 0x601   : > { %1200 = vrot.lane.b32.xlu1 %v1167_v48, %s2324_s21 }
 0x602   : > { %v1824_v49 = vpop.f32.mrf.mxu1 }
 0x604   : > { %v1170_v50 = vpop.f32.mrf.mxu1 }
 0x605   : > { %1202 = vrot.lane.b32.xlu0 %v1170_v50, %s2324_s21 }
 0x606   : > { %v1825_v51 = vpop.f32.mrf.mxu1 }
 0x639   : > { %v1179_v52 = vpop.permute.xlu1 %1178 }
 0x63a   : > { %1185 = vst.msk [vmem:[#allocation2] sm:$0xff] %vm1184_vm9, %v1179_v52  ;;  %v2084_v52 = vld [vmem:[#allocation8 + $0x74] ss:$24 sps:$4 sm:$0xff]  }
 0x63d   : > { %v1181_v54 = vpop.permute.xlu0 %1180 }
 0x63e   : > { %1186 = vst.msk [vmem:[#allocation2 + $0x8] sm:$0xff] %vm1184_vm9, %v1181_v54  ;;  %v1190_v55 = vpop.permute.xlu1 %1189  ;;  %v2085_v54 = vld [vmem:[#allocation8 + $0x44] ss:$24 sps:$4 sm:$0xff]  }
 0x63f   : > { %1196 = vst.msk [vmem:[#allocation2] sm:$0xff] %vm1195_vm10, %v1190_v55  ;;  %v2086_v55 = vld [vmem:[#allocation8 + $0x14] ss:$24 sps:$4 sm:$0xff]  }
 0x642   : > { %v1192_v56 = vpop.permute.xlu0 %1191 }
 0x643   : > { %1197 = vst.msk [vmem:[#allocation2 + $0x8] sm:$0xff] %vm1195_vm10, %v1192_v56  ;;  %v332_v56 = vld [vmem:[#allocation9 + $0x8] sm:$0x3] }
 0x673   : > { %v1201_v58 = vpop.permute.xlu1 %1200 }
 0x674   : > { %1207 = vst.msk [vmem:[#allocation2] sm:$0xff] %vm1206_vm11, %v1201_v58  ;;  %v1329_v58 = vrot.slane %v332_v56, %v2574_v36 }
 0x677   : > { %v1203_v59 = vpop.permute.xlu0 %1202 }
 0x678   : > { %1208 = vst.msk [vmem:[#allocation2 + $0x8] sm:$0xff] %vm1206_vm11, %v1203_v59 }
 0x67b   : > { %v1209_v60 = vld [vmem:[#allocation2] sm:$0xff] }
 0x67f   : > { %v1210_v61 = vld [vmem:[#allocation2 + $0x8] sm:$0xff] }
 0x680   : > { %v1211_v62 = vpack.c.bf16 %v1210_v61, %v1209_v60 }
 0x682   : > { %1843 = vmatmul.mubr.bf16.vlgmr.msra.gmra.mxu0 %v1211_v62 }
 0x683   : > { %1882 = vmatprep.mubr.msk.bf16.mxu0 %vm2322_vm0, %v2321_v4  ;;  %1867 = vmatpush3.bf16.msra.mxu0 %v2079_v26 }
 0x684   : > { %1868 = vmatprep.subr.bf16.mxu0 %v2321_v4 }
 0x687   : > { %1869 = vmatpush3.bf16.msra.mxu0 %v2080_v27 }
 0x688   : > { %1870 = vmatprep.subr.bf16.mxu0 %v2321_v4 }
 0x68b   : > { %1871 = vmatpush3.bf16.msra.mxu0 %v2081_v28 }
 0x68c   : > { %1872 = vmatprep.subr.bf16.mxu0 %v2321_v4 }
 0x68f   : > { %1873 = vmatpush3.bf16.msra.mxu0 %v2082_v31 }
 0x690   : > { %1874 = vmatprep.subr.bf16.mxu0 %v2321_v4 }
 0x693   : > { %1875 = vmatpush3.bf16.msra.mxu0 %v2083_v32 }
 0x694   : > { %1876 = vmatprep.subr.bf16.mxu0 %v2321_v4 }
 0x697   : > { %1877 = vmatpush3.bf16.msra.mxu0 %v2084_v52 }
 0x698   : > { %1878 = vmatprep.subr.bf16.mxu0 %v2321_v4 }
 0x69b   : > { %1879 = vmatpush3.bf16.msra.mxu0 %v2085_v54 }
 0x69c   : > { %1880 = vmatprep.subr.bf16.mxu0 %v2321_v4 }
 0x69f   : > { %1881 = vmatpush3.bf16.msra.mxu0 %v2086_v55 }
 0x742   : > { %v1282_v5 = vpop.f32.mrf.mxu0 }
 0x743   : > { %v1283_v6 = vadd.f32 %v1282_v5, %v1215_v2 }
 0x744   : > { %v1844_v7 = vpop.f32.mrf.mxu0 }
 0x745   : > { %v1289_v8 = vadd.f32 %v1283_v6, %v2603_v63 }
 0x746   : > { %v1285_v9 = vpop.f32.mrf.mxu0 }
 0x747   : > { %v1286_v10 = vadd.f32 %v1285_v9, %v1215_v2  ;;  %1291 = vadd.xlane.f32.xlu1 %v1289_v8 }
 0x748   : > { %v1845_v11 = vpop.f32.mrf.mxu0 }
 0x749   : > { %v1290_v12 = vadd.f32 %v1286_v10, %v2605_v0  ;;  %v2067_v0 = vld [vmem:[#allocation8 + $0x100] ss:$24 sps:$4 sm:$0xff]  }
 0x74a   : > { %1851 = vmatpush3.bf16.msra.mxu1 %v2067_v0 }
 0x74b   : > { %1293 = vadd.xlane.f32.xlu0 %v1290_v12  ;;  %1852 = vmatprep.subr.bf16.mxu1 %v2321_v4 }
 0x74e   : > { %1853 = vmatpush3.bf16.msra.mxu1 %v2069_v20 }
 0x74f   : > { %1854 = vmatprep.subr.bf16.mxu1 %v2321_v4 }
 0x752   : > { %1855 = vmatpush3.bf16.msra.mxu1 %v2071_v21 }
 0x753   : > { %1856 = vmatprep.subr.bf16.mxu1 %v2321_v4 }
 0x756   : > { %1857 = vmatpush3.bf16.msra.mxu1 %v2073_v22 }
 0x757   : > { %1858 = vmatprep.subr.bf16.mxu1 %v2321_v4 }
 0x75a   : > { %1859 = vmatpush3.bf16.msra.mxu1 %v2075_v23 }
 0x75b   : > { %1860 = vmatprep.subr.bf16.mxu1 %v2321_v4  ;;  %v1425_v4 = vrot.slane %v332_v56, %v364_v57 }
 0x75e   : > { %1861 = vmatpush3.bf16.msra.mxu1 %v2077_v24 }
 0x7d0   : > { %v1292_v13 = vpop.xlane.xlu1 %1291 }
 0x7d1   : > { %v1295_v14 = vmul.f32 0.0078125, %v1292_v13 }
 0x7d3   : > { %v1297_v15 = vsub.f32 %v1289_v8, %v1295_v14 }
 0x7d4   : > { %v1294_v45 = vpop.xlane.xlu0 %1293 }
 0x7d5   : > { %v1296_v16 = vmul.f32 0.0078125, %v1294_v45  ;;  %v1299_v17 = vmul.f32 %v1297_v15, %v1297_v15 }
 0x7d7   : > { %v1298_v18 = vsub.f32 %v1290_v12, %v1296_v16  ;;  %1301 = vadd.xlane.f32.xlu0 %v1299_v17 }
 0x7d9   : > { %v1300_v63 = vmul.f32 %v1298_v18, %v1298_v18 }
 0x7db   : > { %1303 = vadd.xlane.f32.xlu0 %v1300_v63 }
 0x860   : > { %v1302_v33 = vpop.xlane.xlu0 %1301 }
 0x861   : > { %v1305_v34 = vmul.f32 0.0078125, %v1302_v33 }
 0x863   : > { %v1307_v35 = vadd.f32 1e-05, %v1305_v34 }
 0x864   : > { %v1304_v37 = vpop.xlane.xlu0 %1303 }
 0x865   : > { %2123 = vrsqrt.f32 %v1307_v35  ;;  %v1306_v38 = vmul.f32 0.0078125, %v1304_v37 }
 0x867   : > { %v1308_v39 = vadd.f32 1e-05, %v1306_v38 }
 0x869   : > { %2125 = vrsqrt.f32 %v1308_v39 }
 0x872   : > { %v2124_v40 = vpop.eup %2123 }
 0x873   : > { %v1311_v1 = vmul.f32 %v2124_v40, %v1297_v15 }
 0x875   : > { %v1317_v46 = vmul.f32 %v1316_v41, %v1311_v1 }
 0x876   : > { %v2126_v42 = vpop.eup %2125 }
 0x877   : > { %v1312_v44 = vmul.f32 %v2126_v42, %v1298_v18  ;;  %v1323_v49 = vadd.f32 %v1322_v47, %v1317_v46 }
 0x879   : > { %v1318_v48 = vmul.f32 %v1316_v41, %v1312_v44 }
 0x87b   : > { %v1324_v50 = vadd.f32 %v1322_v47, %v1318_v48 }
 0x87d   : > { %v1325_v51 = vpack.c.bf16 %v1324_v50, %v1323_v49 }
 0x87f   : > { %1863 = vmatmul.mubr.bf16.vlgmr.msra.gmra.mxu1 %v1325_v51 }
 0x93f   : > { %v1412_v53 = vpop.f32.mrf.mxu1 }
 0x940   : > { %v1413_v60 = vadd.f32 %v1412_v53, %v1329_v58 }
 0x941   : > { %v1864_v59 = vpop.f32.mrf.mxu1 }
 0x942   : > { %v1419_v2 = vmax.f32 %v1413_v60, 0.0 }
 0x943   : > { %v1415_v61 = vpop.f32.mrf.mxu1 }
 0x944   : > { %v1416_v62 = vadd.f32 %v1415_v61, %v1329_v58 }
 0x945   : > { %v1865_v30 = vpop.f32.mrf.mxu1 }
 0x946   : > { %v1420_v5 = vmax.f32 %v1416_v62, 0.0 }
 0x948   : > { %v1421_v6 = vpack.c.bf16 %v1420_v5, %v1419_v2 }
 0x94a   : > { %1883 = vmatmul.mubr.bf16.vlgmr.msra.gmra.mxu0 %v1421_v6 }
 0xa0a   : > { %v1492_v7 = vpop.f32.mrf.mxu0 }
 0xa0b   : > { %v1493_v8 = vadd.f32 %v1492_v7, %v1425_v4 }
 0xa0c   : > { %v1884_v36 = vpop.f32.mrf.mxu0 }
 0xa0d   : > { %v1499_v9 = vadd.f32 %v1493_v8, %v1323_v49 }
 0xa0e   : > { %v1495_v10 = vpop.f32.mrf.mxu0 }
 0xa0f   : > { %1501 = vst [vmem:[%s278_s6] sm:$0xff] %v1499_v9  ;;  %v1496_v11 = vadd.f32 %v1495_v10, %v1425_v4 }
 0xa10   : > { %v1885_v29 = vpop.f32.mrf.mxu0 }
 0xa11   : > { %v1500_v57 = vadd.f32 %v1496_v11, %v1324_v50 }
 0xa13   : > { %1502 = vst [vmem:[%s278_s6 + $0x8] sm:$0xff] %v1500_v57 }
 0xa14   : > { %2248 = shalt.err (!%p2245_p7)
}
 0xa15   : > { %s2249_s3 = scalar_lea.hbm %s2766_s26, 256  ;;  %s2253_s23 = scalar_lea.hbm %s2813_s4, 512 }
 0xa16   : > { %p2250_p10 = scmp.ne.s32.totalorder %s2766_s26, %s2249_s3  ;;  %p2254_p11 = scmp.lt.s32.totalorder %s2766_s26, %s2813_s4 }
 0xa17   : > { %p2255_p2 = scmp.lt.s32.totalorder %s2253_s23, %s2249_s3 }
 0xa18   : > { %p2251_p0 = pnand %p2250_p10, %p2842_p3 }
 0xa19   : > { %p2256_p6 = por %p2255_p2, %p2254_p11 }
 0xa1a   : > { %p2252_p8 = pneg %p2251_p0 }
 0xa1c   : > { %p2257_p12 = pnand %p2256_p6, %p2252_p8 }
 0xa1e   : > { %2260 = shalt.err (!%p2257_p12)
}
 0xa1f   : > { %s2328_s21 = smov 128   ;;  %s2329_s29 = smov 8  }
 0xa20   : > { %1898 = dma.vmem_to_hbm [thread:$0]  (%p2842_p3), %s2761_s20, 256, %s2766_s26, %s1504_s5, %s2328_s21, %s2328_s21, %s2329_s29  }
 0xa21 PF: > { %s1532_s30 = sand.u32 1, %s2299_s15   ;;  %p2843_p9 = scmp.ne.s32.totalorder %s2822_s22, 0 }
 0xa22   : > { %p2844_p13 = scmp.ge.s32.totalorder %s2311_s18, 2  ;;  %s1533_s6 = scalar_lea.sflag [#allocation5], %s1532_s30 }
 0xa24   : > { %p1915_p5 = pnand %p2844_p13, %p2843_p9 }
 0xa26   : > { %p1916_p1 = pneg %p1915_p5 }
 0xa28   : > { %2294 = dma.done.wait (%p1916_p1), %s1533_s6, 256  }
 0xa29   : > { %2296 = vsyncadd (%p1916_p1), %s1533_s6, 4294967040  ;;  %p21_p4 = scmp.ge.s32.totalorder %s2430_s13, 4   ;;  %s2845_s15 = smov %s2303_s16 }
 0xa2a   : > { %s2846_s16 = smov %s2307_s17  ;;  %s2847_s17 = smov %s2439_s24 }
 0xa2b   : > { %s2848_s18 = smov %s2430_s13  ;;  %23 = sbr.rel (!%p21_p4) target bundleno = 12 (0xc), region = 102 }
 0xa30   :  { %1538 = vsyncpa [#allocation4], 1 }
 0xa31   :  { %1540 = vsyncpa [#allocation4 + $0x1], 1 }
 0xa32   :  { %1541 = vsyncpa [#allocation7], 1 }
 0xa33   :  { %1543 = vsyncpa [#allocation7 + $0x1], 1 }
 0xa34   :  { %1544 = vsyncpa [#allocation10], 1 }
 0xa35   :  { %1545 = vsyncpa [#allocation5], 1 }
 0xa36   :  { %1547 = vsyncpa [#allocation5 + $0x1], 1 }

// kernel: tpu_custom_call.1
= control target key start
LH: loop header
LB: loop body
LE: loop exit
PB: predicated region body
PF: predicated region fallthrough
CT: control target
= control target key end

     0   :  { %s2809_s0 = inlined_call_operand.hbm [shape: f32[2,16,128], index: 0, kind: input, shape index: {}]   ;;  %s2810_s1 = inlined_call_operand.hbm [shape: f32[2,1,16], index: 1, kind: input, shape index: {}]   ;;  %s2811_s2 = inlined_call_operand.hbm [shape: bf16[128,768], index: 2, kind: input, shape index: {}]   ;;  %s2812_s3 = inlined_call_operand.hbm [shape: f32[10,128], index: 3, kind: input, shape index: {}]   ;;  %s2813_s4 = inlined_call_operand.hbm [shape: f32[2,16,128], index: 4, kind: output, shape index: {}]  }
   0x1   :  { %2818 = sst [smem:[#allocation17_spill]] %s2809_s0 }
   0x2   :  { %2819 = sst [smem:[#allocation18_spill]] %s2811_s2 }
   0x3   :  { %2820 = sst [smem:[#allocation19_spill]] %s2812_s3 }
   0x4   :  { %9 = vsyncpa [#allocation4], 0 }
   0x5   :  { %11 = vsyncpa [#allocation4 + $0x1], 0 }
   0x6   :  { %12 = vsyncpa [#allocation7], 0 }
   0x7   :  { %14 = vsyncpa [#allocation7 + $0x1], 0 }
   0x8   :  { %15 = vsyncpa [#allocation10], 0 }
   0x9   :  { %16 = vsyncpa [#allocation5], 0 }
   0xa   :  { %18 = vsyncpa [#allocation5 + $0x1], 0  ;;  %s2355_s15 = smov 0   ;;  %s2357_s16 = smov 0  }
   0xb   :  { %s2359_s17 = smov 0   ;;  %s2361_s18 = smov 0  }
   0xc LB: > { %s2376_s19 = sadd.s32 4294967295, %s2311_s18   ;;  %s1629_s20 = sadd.s32 4294967294, %s2311_s18   ;;  %s2311_s18 = sphi %s2361_s18, %s2848_s18   ;;  %s2307_s17 = sphi %s2359_s17, %s2847_s17   ;;  %s2303_s16 = sphi %s2357_s16, %s2846_s16   ;;  %s2299_s15 = sphi %s2355_s15, %s2845_s15  }
   0xd   : > { %p44_p0 = scmp.ne.s32.totalorder %s2303_s16, %s2299_s15  ;;  %p2814_p1 = scmp.eq.s32.totalorder %s2376_s19, 0 }
   0xe   : > { %p142_p3 = scmp.eq.s32.totalorder %s1629_s20, 1  ;;  %p1630_p5 = scmp.ge.s32.totalorder %s2311_s18, 1 }
   0xf   : > { %p2385_p4 = por %p2814_p1, %p44_p0  ;;  %p149_p7 = scmp.lt.s32.totalorder %s2311_s18, 3 }
  0x10   : > { %p2390_p6 = por %p142_p3, %p44_p0  ;;  %s2313_s24 = smov [#allocation8]  }
  0x11   : > { %s2821_s21 = scalar_select %p2385_p4, 1, 0 }
  0x12   : > { %s2822_s22 = scalar_select %p2390_p6, 1, 0 }
  0x13   : > { %p2395_p8 = pnand %p1630_p5, %p149_p7  ;;  %s161_s25 = sshll.u32 %s2313_s24, 4  ;;  %s162_s25 = int_to_ptr.vmem [resolvable:$true] %s161_s25 }
  0x14   : > { %s2314_s27 = smov [#allocation9]   ;;  %s2138_s29 = scalar_lea.vmem %s162_s25, 6144 }
  0x15   : > { %s2823_s23 = scalar_select %p2395_p8, 1, 0 }
  0x16   : > { %p1900_p9 = pneg %p2395_p8  ;;  %s174_s28 = sshll.u32 %s2314_s27, 4  ;;  %s175_s28 = int_to_ptr.vmem [resolvable:$true] %s174_s28 }
  0x17   : > { %p2139_p13 = scmp.ne.s32.totalorder %s162_s25, %s2138_s29  ;;  %p2146_p5 = scmp.lt.s32.totalorder %s162_s25, %s162_s25 }
  0x18   : > { %p2404_p11 = pnand %p1900_p9, %p2814_p1  ;;  %p2147_p7 = scmp.lt.s32.totalorder %s2138_s29, %s2138_s29 }
  0x1a   : > { %p2129_p12 = pneg %p2404_p11  ;;  %p2148_p10 = por %p2147_p7, %p2146_p5 }
  0x1c   : > { %p2141_p0 = pnand %p2139_p13, %p2129_p12 }
  0x1e   : > { %p2142_p3 = pneg %p2141_p0 }
  0x20   : > { %p2149_p9 = pnand %p2148_p10, %p2142_p3 }
  0x22   : > { %2152 = shalt.err (!%p2149_p9)
}
  0x23   : > { %s2315_s30 = smov 384   ;;  %s2316_s5 = smov 24  }
  0x24   : > { %s2825_s2 = sld [smem:[#allocation18_spill]]  ;;  %s2164_s8 = scalar_lea.vmem %s175_s28, 256 }
  0x25   : > { %p2165_p1 = scmp.ne.s32.totalorder %s175_s28, %s2164_s8  ;;  %p2172_p2 = scmp.lt.s32.totalorder %s175_s28, %s175_s28 }
  0x26   : > { %p2173_p6 = scmp.lt.s32.totalorder %s2164_s8, %s2164_s8 }
  0x27   : > { %p2167_p13 = pnand %p2165_p1, %p2129_p12 }
  0x28   : > { %p2174_p5 = por %p2173_p6, %p2172_p2 }
  0x29   : > { %p2168_p0 = pneg %p2167_p13 }
  0x2a   : > { %1903 = dma.hbm_to_vmem [thread:$0]  (!%p2404_p11), %s2825_s2, 6144, %s162_s25, [#allocation7], %s2315_s30, %s2315_s30, %s2316_s5  }
  0x2b   : > { %p2175_p10 = pnand %p2174_p5, %p2168_p0 }
  0x2d   : > { %2178 = shalt.err (!%p2175_p10)
}
  0x2e   : > { %s2317_s9 = smov 128   ;;  %s2318_s10 = smov 8  }
  0x2f   : > { %s2826_s3 = sld [smem:[#allocation19_spill]]  ;;  %s2430_s13 = sadd.s32 1, %s2311_s18  }
  0x30   : > { %s28_s14 = ssub.s32 %s2311_s18, %s2430_s13  ;;  %s31_s20 = sadd.s32 1, %s2307_s17 }
  0x31   : > { %p29_p1 = scmp.eq.s32.totalorder %s28_s14, 0  ;;  %p38_p2 = scmp.ne.s32.totalorder %s2307_s17, %s2303_s16 }
  0x32   : > { %p39_p6 = scmp.eq.s32.totalorder %s2311_s18, 0  ;;  %p2827_p3 = scmp.eq.s32.totalorder %s2376_s19, 1 }
  0x33   : > { %s2439_s24 = scalar_select %p29_p1, %s2307_s17, %s31_s20  }
  0x34   : > { %p40_p12 = por %p39_p6, %p38_p2  ;;  %p2443_p7 = por %p2827_p3, %p38_p2 }
  0x35   : > { %1906 = dma.hbm_to_vmem [thread:$0]  (!%p2404_p11), %s2826_s3, 256, %s175_s28, [#allocation10], %s2317_s9, %s2317_s9, %s2318_s10  }
  0x36   : > { %s2828_s25 = scalar_select %p2443_p7, 1, 0 }
  0x37   : > { %p1920_p9 = scmp.lt.s32.totalorder %s2311_s18, 2  ;;  %s2449_s26 = sand.u32 1, %s2307_s17  }
  0x38   : > { %s1634_s27 = sshll.u32 %s2449_s26, 4  ;;  %s1704_s28 = sshll.u32 %s2311_s18, 8 }
  0x39   : > { %s2829_s0 = sld [smem:[#allocation17_spill]]  ;;  %s192_s6 = scalar_lea.vmem [#allocation3], %s1634_s27 }
  0x3a   : > { %s199_s7 = sshll.u32 %s192_s6, 4  ;;  %p2460_p11 = pnand %p1920_p9, %p40_p12  ;;  %s2458_s7 = int_to_ptr.vmem [resolvable:$true] %s199_s7 }
  0x3b   : > { %s189_s12 = scalar_lea.sflag [#allocation4], %s2449_s26 }
  0x3c   : > { %p2181_p0 = pneg %p2460_p11 }
  0x3f   : > { %s2456_s5 = scalar_lea.hbm %s2829_s0, %s1704_s28  ;;  %s2184_s28 = scalar_lea.hbm %s2829_s0, 512 }
  0x40   : > { %s2179_s14 = scalar_lea.hbm %s2456_s5, 256  ;;  %p2185_p1 = scmp.lt.s32.totalorder %s2456_s5, %s2829_s0 }
  0x41   : > { %p2180_p13 = scmp.ne.s32.totalorder %s2456_s5, %s2179_s14  ;;  %p2186_p2 = scmp.lt.s32.totalorder %s2184_s28, %s2179_s14 }
  0x43   : > { %p2182_p5 = pnand %p2181_p0, %p2180_p13  ;;  %p2187_p6 = por %p2186_p2, %p2185_p1 }
  0x45   : > { %p2183_p10 = pneg %p2182_p5 }
  0x47   : > { %p2188_p12 = pnand %p2187_p6, %p2183_p10 }
  0x49   : > { %2191 = shalt.err (!%p2188_p12)
}
  0x4a   : > { %s2192_s6 = scalar_lea.vmem %s2458_s7, 256  ;;  %s2319_s20 = smov [#allocation3]  }
  0x4b   : > { %p2193_p3 = scmp.ne.s32.totalorder %s2458_s7, %s2192_s6  ;;  %s2197_s27 = sshll.u32 %s2319_s20, 4  ;;  %s2198_s27 = int_to_ptr.vmem [resolvable:$false] %s2197_s27 }
  0x4c   : > { %s2199_s11 = scalar_lea.vmem %s2198_s27, 512  ;;  %p2200_p5 = scmp.lt.s32.totalorder %s2458_s7, %s2198_s27 }
  0x4d   : > { %p2195_p9 = pnand %p2193_p3, %p2181_p0  ;;  %p2201_p7 = scmp.lt.s32.totalorder %s2199_s11, %s2192_s6 }
  0x4f   : > { %p2196_p13 = pneg %p2195_p9  ;;  %p2202_p4 = por %p2201_p7, %p2200_p5 }
  0x51   : > { %p2203_p1 = pnand %p2202_p4, %p2196_p13 }
  0x53   : > { %2206 = shalt.err (!%p2203_p1)
}
  0x54   : > { %1910 = dma.hbm_to_vmem [thread:$0]  (!%p2460_p11), %s2456_s5, 256, %s2458_s7, %s189_s12, %s2317_s9, %s2317_s9, %s2318_s10  }
  0x55   : > { %s1637_s14 = sshll.u32 %s2311_s18, 4  ;;  %s212_s28 = scalar_lea.vmem [#allocation6], %s2449_s26 }
  0x56   : > { %s219_s11 = sshll.u32 %s212_s28, 4  ;;  %s217_s6 = scalar_lea.hbm %s2810_s1, %s1637_s14  ;;  %s220_s11 = int_to_ptr.vmem [resolvable:$true] %s219_s11 }
  0x57   : > { %s2831_s20 = sand.u32 1, %s2311_s18   ;;  %s2207_s0 = scalar_lea.hbm %s217_s6, 16 }
  0x58   : > { %s210_s27 = scalar_lea.sflag [#allocation7], %s2831_s20  ;;  %p2208_p4 = scmp.ne.s32.totalorder %s217_s6, %s2207_s0 }
  0x59   : > { %s2212_s9 = scalar_lea.hbm %s2810_s1, 32  ;;  %p2213_p2 = scmp.lt.s32.totalorder %s217_s6, %s2810_s1 }
  0x5a   : > { %p2210_p7 = pnand %p2208_p4, %p2181_p0  ;;  %p2214_p6 = scmp.lt.s32.totalorder %s2212_s9, %s2207_s0 }
  0x5c   : > { %p2211_p10 = pneg %p2210_p7  ;;  %p2215_p12 = por %p2214_p6, %p2213_p2 }
  0x5e   : > { %p2216_p3 = pnand %p2215_p12, %p2211_p10 }
  0x60   : > { %2219 = shalt.err (!%p2216_p3)
}
  0x61   : > { %s2220_s5 = scalar_lea.vmem %s220_s11, 16  ;;  %s2320_s7 = smov [#allocation6]  }
  0x62   : > { %p2221_p9 = scmp.ne.s32.totalorder %s220_s11, %s2220_s5  ;;  %s2225_s12 = sshll.u32 %s2320_s7, 4  ;;  %s2226_s12 = int_to_ptr.vmem [resolvable:$false] %s2225_s12 }
  0x63   : > { %s2227_s2 = scalar_lea.vmem %s2226_s12, 32  ;;  %p2228_p1 = scmp.lt.s32.totalorder %s220_s11, %s2226_s12 }
  0x64   : > { %p2223_p13 = pnand %p2221_p9, %p2181_p0  ;;  %p2229_p4 = scmp.lt.s32.totalorder %s2227_s2, %s2220_s5 }
  0x66   : > { %p2224_p5 = pneg %p2223_p13  ;;  %p2230_p7 = por %p2229_p4, %p2228_p1 }
  0x68   : > { %p2231_p8 = pnand %p2230_p7, %p2224_p5 }
  0x6a   : > { %2234 = shalt.err (!%p2231_p8)
}
  0x6b   : > { %1913 = dma.hbm_to_vmem [thread:$0]  (!%p2460_p11), %s217_s6, 16, %s220_s11, %s210_s27  }
  0x6c   : > { %p2832_p10 = scmp.ne.s32.totalorder %s2823_s23, 0 }
  0x6d   : > { %s2519_s0 = sand.u32 (!%p2832_p10), 1, %s2303_s16   ;;  %p2833_p0 = scmp.ne.s32.totalorder (!%p2832_p10), %s2821_s21, 0 }
  0x6e   : > { %228 = sbr.rel (%p2832_p10) target bundleno = 2593 (0xa21), region = 36  ;;  %s1639_s3 = sshll.u32 (!%p2832_p10), %s2519_s0, 4 }
  0x6f   : > { %s231_s14 = scalar_lea.sflag (!%p2832_p10), [#allocation4], %s2519_s0  ;;  %s234_s28 = scalar_lea.vmem (!%p2832_p10), [#allocation3], %s1639_s3 }
  0x73   : > { %2278 = dma.done.wait (%p2833_p0), %s231_s14, 256  }
  0x74   : > { %2280 = vsyncadd (%p2833_p0), %s231_s14, 4294967040  ;;  %s239_s23 = sand.u32 1, %s2376_s19   ;;  %s242_s11 = scalar_lea.vmem [#allocation6], %s2519_s0 }
  0x75   : > { %s240_s8 = scalar_lea.sflag [#allocation7], %s239_s23 }
  0x76   : > { %2282 = dma.done.wait (%p2833_p0), %s240_s8, 16  }
  0x77   : > { %2284 = vsyncadd (%p2833_p0), %s240_s8, 4294967280  ;;  %p2834_p8 = scmp.eq.s32.totalorder %s2376_s19, 0 }
  0x79   : > { %2286 = dma.done.wait (%p2834_p8), [#allocation7], 6144   ;;  %p2835_p11 = pmov %p2834_p8 }
  0x7a   : > { %p2836_p2 = pmov %p2834_p8 }
  0x7b   : > { %2288 = vsyncadd (%p2835_p11), [#allocation7], 4294961152 }
  0x7c   : > { %2290 = dma.done.wait (%p2836_p2), [#allocation10], 256   ;;  %p2837_p6 = pmov %p2836_p2 }
  0x7d   : > { %v2543_v0 = vld [vmem:[%s234_s28] sm:$0xff]  ;;  %v2545_v1 = vld [vmem:[%s234_s28 + $0x8] sm:$0xff]  ;;  %v2321_v4 = vmov 0.0   ;;  %v356_v25 = vlaneseq  ;;  %vm2322_vm0 = vmmov 0   ;;  %v2323_v37 = vmov 0   ;;  %s2324_s21 = smov 96  }
  0x7e   : > { %2292 = vsyncadd (%p2837_p6), [#allocation10], 4294967040  ;;  %333 = vadd.xlane.f32.xlu0 %v2543_v0  ;;  %v2015_v2 = vld [vmem:[#allocation8 + $0x150] ss:$24 sps:$4 sm:$0xff]   ;;  %1758 = vmatprep.subr.bf16.mxu0 %v2321_v4  ;;  %v2022_v5 = vld [vmem:[#allocation8 + $0x154] ss:$24 sps:$4 sm:$0xff]   ;;  %v368_v44 = vpack.c.bf16 %v2545_v1, %v2543_v0 }
  0x7f   : > { %v2017_v3 = vld [vmem:[#allocation8 + $0x158] ss:$24 sps:$4 sm:$0xff]   ;;  %1759 = vmatpush3.bf16.msra.mxu0 %v2015_v2  ;;  %v2023_v15 = vld [vmem:[#allocation8 + $0x128] ss:$24 sps:$4 sm:$0xff]   ;;  %v2028_v17 = vld [vmem:[#allocation8 + $0x124] ss:$24 sps:$4 sm:$0xff]   ;;  %1774 = vmatprep.mubr.msk.bf16.mxu0 %vm2322_vm0, %v2321_v4 }
  0x80   : > { %543 = vmatprep.subr.bf16.mxu1 %v2017_v3  ;;  %v2020_v6 = vld [vmem:[#allocation8 + $0x120] ss:$24 sps:$4 sm:$0xff]   ;;  %1760 = vmatprep.subr.bf16.mxu0 %v2321_v4  ;;  %v2026_v16 = vld [vmem:[#allocation8 + $0xf0] ss:$24 sps:$4 sm:$0xff]   ;;  %v2034_v20 = vld [vmem:[#allocation8 + $0xf4] ss:$24 sps:$4 sm:$0xff]  }
  0x81   : > { %544 = vmatpush1.bf16.msra.mxu1 %v2022_v5  ;;  %v2029_v18 = vld [vmem:[#allocation8 + $0xf8] ss:$24 sps:$4 sm:$0xff]   ;;  %v2035_v21 = vld [vmem:[#allocation8 + $0xc8] ss:$24 sps:$4 sm:$0xff]   ;;  %v2040_v23 = vld [vmem:[#allocation8 + $0xc4] ss:$24 sps:$4 sm:$0xff]   ;;  %575 = vmatprep.mubr.bf16.mxu1 %v2323_v37 }
  0x82   : > { %335 = vadd.xlane.f32.xlu0 %v2545_v1  ;;  %545 = vmatprep.subr.bf16.mxu1 %v2023_v15  ;;  %v2032_v19 = vld [vmem:[#allocation8 + $0xc0] ss:$24 sps:$4 sm:$0xff]   ;;  %v2038_v22 = vld [vmem:[#allocation8 + $0x90] ss:$24 sps:$4 sm:$0xff]   ;;  %v2046_v27 = vld [vmem:[#allocation8 + $0x94] ss:$24 sps:$4 sm:$0xff]  }
  0x83   : > { %1761 = vmatpush3.bf16.msra.mxu0 %v2020_v6  ;;  %v2041_v24 = vld [vmem:[#allocation8 + $0x98] ss:$24 sps:$4 sm:$0xff]   ;;  %v2047_v28 = vld [vmem:[#allocation8 + $0x68] ss:$24 sps:$4 sm:$0xff]   ;;  %v2565_v29 = vshrl.u32 %v356_v25, 7  ;;  %v602_v34 = vand.u32 127, %v356_v25 }
  0x84   : > { %1762 = vmatprep.subr.bf16.mxu0 %v2321_v4  ;;  %v2044_v26 = vld [vmem:[#allocation8 + $0x60] ss:$24 sps:$4 sm:$0xff]   ;;  %v2050_v30 = vld [vmem:[#allocation8 + $0x30] ss:$24 sps:$4 sm:$0xff]   ;;  %v2052_v31 = vld [vmem:[#allocation8 + $0x64] ss:$24 sps:$4 sm:$0xff]  }
  0x85   : > { %546 = vmatpush1.bf16.msra.mxu1 %v2028_v17  ;;  %v282_v32 = vld [vmem:[%s242_s11] sm:$0x1]  ;;  %v600_v33 = vadd.s32 8, %v2565_v29  ;;  %v2053_v35 = vld [vmem:[#allocation8 + $0x38] ss:$24 sps:$4 sm:$0xff]   ;;  %v2574_v36 = vsub.s32 0, %v2565_v29  ;;  %vm603_vm2 = vcmp.ge.s32.totalorder %v2565_v29, %v602_v34 }
  0x86   : > { %547 = vmatprep.subr.bf16.mxu1 %v2029_v18  ;;  %vm605_vm1 = vcmp.gt.f32.partialorder %v282_v32, 0.0  ;;  %v2056_v40 = vld [vmem:[#allocation8] ss:$24 sps:$4 sm:$0xff]   ;;  %v2058_v41 = vld [vmem:[#allocation8 + $0x34] ss:$24 sps:$4 sm:$0xff]   ;;  %v364_v57 = vsub.s32 1, %v2565_v29 }
  0x87   : > { %1763 = vmatpush3.bf16.msra.mxu0 %v2026_v16  ;;  %v606_v38 = vsel %vm605_vm1, 1, %v2323_v37  ;;  %vm604_vm3 = vcmp.ge.s32.totalorder %v600_v33, %v602_v34  ;;  %v2059_v42 = vld [vmem:[#allocation8 + $0x8] ss:$24 sps:$4 sm:$0xff]   ;;  %v2062_v46 = vld [vmem:[#allocation8 + $0x4] ss:$24 sps:$4 sm:$0xff]   ;;  %v371_v2 = vsub.s32 4, %v2565_v29 }
  0x88   : > { %1764 = vmatprep.subr.bf16.mxu0 %v2321_v4  ;;  %v610_v39 = vrot.slane %v606_v38, %v2574_v36  ;;  %v2593_v53 = vld [vmem:[#allocation9] sm:$0xff]  ;;  %vm692_vm7 = vcmask 261120   ;;  %s2325_s29 = smov 64   ;;  %s2326_s30 = smov 32   ;;  %vm897_vm8 = vcmask 130048   ;;  %vm1184_vm9 = vcmask 523520  }
  0x89   : > { %548 = vmatpush1.bf16.msra.mxu1 %v2034_v20  ;;  %v359_v56 = vrot.slane %v2593_v53, %v2574_v36  ;;  %v365_v61 = vrot.slane %v2593_v53, %v364_v57  ;;  %v372_v3 = vrot.slane %v2593_v53, %v371_v2  ;;  %vm1195_vm10 = vcmask 785920   ;;  %s278_s6 = scalar_lea.vmem [#allocation11], %s1639_s3  ;;  %s1705_s27 = sshll.u32 %s2376_s19, 8 }
  0x8a   : > { %549 = vmatprep.subr.bf16.mxu1 %v2035_v21  ;;  %vm611_vm4 = vcmp.eq.s32.totalorder %v610_v39, 1  ;;  %vm1206_vm11 = vcmask 1048320   ;;  %s1517_s20 = sshll.u32 %s278_s6, 4  ;;  %s2766_s26 = scalar_lea.hbm %s2813_s4, %s1705_s27  ;;  %s2761_s20 = int_to_ptr.vmem [resolvable:$true] %s1517_s20 }
  0x8b   : > { %1765 = vmatpush3.bf16.msra.mxu0 %v2032_v19  ;;  %vm2579_vm5 = vmand %vm603_vm2, %vm611_vm4  ;;  %s1504_s5 = scalar_lea.sflag [#allocation5], %s2519_s0  ;;  %s2235_s7 = scalar_lea.vmem %s2761_s20, 256 }
  0x8c   : > { %1766 = vmatprep.subr.bf16.mxu0 %v2321_v4  ;;  %vm2585_vm6 = vmand %vm604_vm3, %vm611_vm4  ;;  %p2236_p12 = scmp.ne.s32.totalorder %s2761_s20, %s2235_s7  ;;  %p2842_p3 = scmp.ne.s32.totalorder %s2828_s25, 0 }
  0x8d   : > { %550 = vmatpush1.bf16.msra.mxu1 %v2040_v23  ;;  %s2327_s19 = smov [#allocation11]  }
  0x8e   : > { %551 = vmatprep.subr.bf16.mxu1 %v2041_v24  ;;  %p2237_p9 = pnand %p2236_p12, %p2842_p3  ;;  %s2239_s12 = sshll.u32 %s2327_s19, 4  ;;  %s2240_s12 = int_to_ptr.vmem [resolvable:$false] %s2239_s12 }
  0x8f   : > { %1767 = vmatpush3.bf16.msra.mxu0 %v2038_v22  ;;  %s2241_s2 = scalar_lea.vmem %s2240_s12, 512  ;;  %p2242_p5 = scmp.lt.s32.totalorder %s2761_s20, %s2240_s12 }
  0x90   : > { %1768 = vmatprep.subr.bf16.mxu0 %v2321_v4  ;;  %p2238_p13 = pneg %p2237_p9  ;;  %p2243_p1 = scmp.lt.s32.totalorder %s2241_s2, %s2235_s7 }
  0x91   : > { %552 = vmatpush1.bf16.msra.mxu1 %v2046_v27 }
  0x92   : > { %553 = vmatprep.subr.bf16.mxu1 %v2047_v28  ;;  %p2244_p4 = por %p2243_p1, %p2242_p5 }
  0x93   : > { %1769 = vmatpush3.bf16.msra.mxu0 %v2044_v26 }
  0x94   : > { %1770 = vmatprep.subr.bf16.mxu0 %v2321_v4  ;;  %p2245_p7 = pnand %p2244_p4, %p2238_p13 }
  0x95   : > { %554 = vmatpush1.bf16.msra.mxu1 %v2052_v31 }
  0x96   : > { %555 = vmatprep.subr.bf16.mxu1 %v2053_v35 }
  0x97   : > { %1771 = vmatpush3.bf16.msra.mxu0 %v2050_v30 }
  0x98   : > { %1772 = vmatprep.subr.bf16.mxu0 %v2321_v4 }
  0x99   : > { %556 = vmatpush1.bf16.msra.mxu1 %v2058_v41 }
  0x9a   : > { %557 = vmatprep.subr.bf16.mxu1 %v2059_v42 }
  0x9b   : > { %1773 = vmatpush3.bf16.msra.mxu0 %v2056_v40 }
  0x9c   : > { %1802 = vmatprep.subr.bf16.mxu0 %v2321_v4 }
  0x9d   : > { %558 = vmatpush1.bf16.msra.mxu1 %v2062_v46 }
  0x9e   : > { %1775 = vmatmul.mubr.bf16.vlgmr.msra.gmra.mxu0 %v368_v44  ;;  %1778 = vmatprep.subr.bf16.mxu1 %v2321_v4 }
  0x9f   : > { %1804 = vmatprep.mubr.msk.bf16.mxu0 %vm2322_vm0, %v2321_v4 }
 0x107   : > { %v334_v7 = vpop.xlane.xlu0 %333 }
 0x108   : > { %v338_v8 = vmul.f32 0.0078125, %v334_v7 }
 0x10a   : > { %v2553_v9 = vsub.f32 %v2543_v0, %v338_v8 }
 0x10b   : > { %v336_v10 = vpop.xlane.xlu0 %335 }
 0x10c   : > { %v339_v11 = vmul.f32 0.0078125, %v336_v10  ;;  %v342_v12 = vmul.f32 %v2553_v9, %v2553_v9 }
 0x10e   : > { %v2558_v13 = vsub.f32 %v2545_v1, %v339_v11  ;;  %344 = vadd.xlane.f32.xlu1 %v342_v12 }
 0x110   : > { %v343_v14 = vmul.f32 %v2558_v13, %v2558_v13 }
 0x112   : > { %346 = vadd.xlane.f32.xlu1 %v343_v14  ;;  %v594_v14 = vsub.s32 6, %v2565_v29 }
 0x114   : > { %v595_v18 = vrot.slane %v2593_v53, %v594_v14 }
 0x15e   : > { %v455_v5 = vpop.f32.mrf.mxu0 }
 0x15f   : > { %v456_v7 = vadd.f32 %v455_v5, %v372_v3 }
 0x160   : > { %v1776_v6 = vpop.f32.mrf.mxu0 }
 0x162   : > { %v458_v8 = vpop.f32.mrf.mxu0 }
 0x164   : > { %v1777_v10 = vpop.f32.mrf.mxu0 }
 0x197   : > { %v345_v47 = vpop.xlane.xlu1 %344 }
 0x198   : > { %v348_v48 = vmul.f32 0.0078125, %v345_v47 }
 0x19a   : > { %v350_v49 = vadd.f32 1e-05, %v348_v48 }
 0x19b   : > { %v347_v50 = vpop.xlane.xlu1 %346 }
 0x19c   : > { %2087 = vrsqrt.f32 %v350_v49  ;;  %v349_v51 = vmul.f32 0.0078125, %v347_v50 }
 0x19e   : > { %v351_v52 = vadd.f32 1e-05, %v349_v51 }
 0x1a0   : > { %2089 = vrsqrt.f32 %v351_v52 }
 0x1a9   : > { %v2088_v54 = vpop.eup %2087 }
 0x1aa   : > { %v354_v55 = vmul.f32 %v2088_v54, %v2553_v9  ;;  %v459_v9 = vadd.f32 %v458_v8, %v372_v3  ;;  %v2655_v3 = vsel %vm2585_vm6, 1.0, %v2321_v4 }
 0x1ab   : > { %v617_v6 = vsub.f32 1.0, %v2655_v3 }
 0x1ac   : > { %v360_v60 = vmul.f32 %v359_v56, %v354_v55  ;;  %v640_v11 = vpack.c.bf16 %v459_v9, %v456_v7  ;;  %v1975_v12 = vpack.i.bf16 %v459_v9, %v456_v7 }
 0x1ad   : > { %v2090_v58 = vpop.eup %2089 }
 0x1ae   : > { %v355_v59 = vmul.f32 %v2090_v58, %v2558_v13  ;;  %v2603_v63 = vadd.f32 %v365_v61, %v360_v60  ;;  %1976 = vrot.lane.b32.xlu1 %v1975_v12, %s2324_s21  ;;  %v588_v13 = vsub.s32 5, %v2565_v29 }
 0x1b0   : > { %v361_v62 = vmul.f32 %v359_v56, %v355_v59  ;;  %v589_v16 = vrot.slane %v2593_v53, %v588_v13 }
 0x1b2   : > { %v2605_v0 = vadd.f32 %v365_v61, %v361_v62 }
 0x1b4   : > { %v462_v1 = vpack.c.bf16 %v2605_v0, %v2603_v63 }
 0x1b6   : > { %576 = vmatmul.mubr.bf16.vlgmr.msra.gmra.mxu1 %v462_v1  ;;  %v2649_v1 = vsel %vm2579_vm5, 1.0, %v2321_v4 }
 0x1b7   : > { %1780 = vmatprep.mubr.msk.bf16.mxu1 %vm2322_vm0, %v2321_v4  ;;  %v616_v2 = vsub.f32 1.0, %v2649_v1 }
 0x1b9   : > { %v618_v5 = vmul.f32 -1e+09, %v616_v2 }
 0x220   : > { %v1977_v31 = vpop.permute.xlu1 %1976 }
 0x221   : > { %v1979_v41 = vunpack.i.h.bf16 %v1977_v31  ;;  %v1978_v42 = vunpack.i.l.bf16 %v1977_v31 }
 0x223   : > { %v641_v47 = vpack.c.bf16 %v1979_v41, %v1978_v42 }
 0x276   : > { %v577_v15 = vpop.f32.mrf.mxu1 }
 0x277   : > { %v590_v20 = vadd.f32 %v589_v16, %v577_v15 }
 0x278   : > { %v579_v17 = vpop.f32.mrf.mxu1 }
 0x279   : > { %v596_v22 = vadd.f32 %v595_v18, %v579_v17 }
 0x27a   : > { %v581_v19 = vpop.f32.mrf.mxu1 }
 0x27b   : > { %v591_v21 = vadd.f32 %v589_v16, %v581_v19 }
 0x27c   : > { %v583_v23 = vpop.f32.mrf.mxu1 }
 0x27d   : > { %v597_v24 = vadd.f32 %v595_v18, %v583_v23  ;;  %v1970_v25 = vpack.i.bf16 %v591_v21, %v590_v20  ;;  %v664_v26 = vpack.c.bf16 %v591_v21, %v590_v20 }
 0x27f   : > { %1971 = vrot.lane.b32.xlu0 %v1970_v25, %s2324_s21  ;;  %1981 = vrot.lane.b32.xlu1 %v1970_v25, %s2325_s29  ;;  %v697_v27 = vsel %vm692_vm7, %v664_v26, 0  ;;  %v688_v28 = vpack.c.bf16 %v597_v24, %v596_v22  ;;  %v2621_v30 = vpack.i.bf16 %v597_v24, %v596_v22 }
 0x280   : > { %1779 = vmatpush3.bf16.xpose.msra.mxu1 %v697_v27 }
 0x281   : > { %1803 = vmatpush3.bf16.msra.mxu0 %v688_v28  ;;  %1784 = vmatprep.subr.bf16.mxu1 %v2321_v4 }
 0x282   : > { %1814 = vmatprep.subr.bf16.mxu0 %v2321_v4 }
 0x283   : > { %1991 = vrot.lane.b32.xlu0 %v1970_v25, %s2326_s30  ;;  %1986 = vrot.lane.b32.xlu1 %v1975_v12, %s2325_s29 }
 0x287   : > { %1996 = vrot.lane.b32.xlu1 %v1975_v12, %s2326_s30  ;;  %1781 = vmatmul.mubr.msk.bf16.vlgmr.msra.gmra.mxu1 %vm692_vm7, %v640_v11  ;;  %v619_v11 = vmul.f32 -1e+09, %v617_v6 }
 0x288   : > { %1786 = vmatprep.mubr.msk.bf16.mxu1 %vm2322_vm0, %v2321_v4 }
 0x2f1   : > { %v1972_v32 = vpop.permute.xlu0 %1971  ;;  %v1982_v37 = vpop.permute.xlu1 %1981 }
 0x2f2   : > { %v1974_v33 = vunpack.i.h.bf16 %v1972_v32  ;;  %v1973_v34 = vunpack.i.l.bf16 %v1972_v32  ;;  %v1984_v38 = vunpack.i.h.bf16 %v1982_v37  ;;  %v1983_v39 = vunpack.i.l.bf16 %v1982_v37 }
 0x2f4   : > { %v665_v35 = vpack.c.bf16 %v1974_v33, %v1973_v34  ;;  %v666_v44 = vpack.c.bf16 %v1984_v38, %v1983_v39 }
 0x2f5   : > { %v1992_v46 = vpop.permute.xlu0 %1991  ;;  %v1987_v48 = vpop.permute.xlu1 %1986 }
 0x2f6   : > { %v744_v40 = vsel %vm692_vm7, %v665_v35, 0  ;;  %v1994_v49 = vunpack.i.h.bf16 %v1992_v46  ;;  %v1993_v50 = vunpack.i.l.bf16 %v1992_v46  ;;  %v791_v51 = vsel %vm692_vm7, %v666_v44, 0 }
 0x2f7   : > { %1785 = vmatpush3.bf16.xpose.msra.mxu1 %v744_v40  ;;  %v1989_v52 = vunpack.i.h.bf16 %v1987_v48  ;;  %v1988_v54 = vunpack.i.l.bf16 %v1987_v48 }
 0x2f8   : > { %1790 = vmatprep.subr.bf16.mxu1 %v2321_v4  ;;  %v667_v55 = vpack.c.bf16 %v1994_v49, %v1993_v50 }
 0x2f9   : > { %v642_v56 = vpack.c.bf16 %v1989_v52, %v1988_v54  ;;  %v1997_v58 = vpop.permute.xlu1 %1996 }
 0x2fa   : > { %v838_v59 = vsel %vm692_vm7, %v667_v55, 0  ;;  %v1999_v60 = vunpack.i.h.bf16 %v1997_v58  ;;  %v1998_v61 = vunpack.i.l.bf16 %v1997_v58 }
 0x2fc   : > { %v643_v62 = vpack.c.bf16 %v1999_v60, %v1998_v61 }
 0x2fe   : > { %1787 = vmatmul.mubr.msk.bf16.vlgmr.msra.gmra.mxu1 %vm692_vm7, %v641_v47 }
 0x2ff   : > { %1791 = vmatpush3.bf16.xpose.msra.mxu1 %v791_v51  ;;  %1792 = vmatprep.mubr.msk.bf16.mxu1 %vm2322_vm0, %v2321_v4 }
 0x300   : > { %1796 = vmatprep.subr.bf16.mxu1 %v2321_v4 }
 0x306   : > { %1793 = vmatmul.mubr.msk.bf16.vlgmr.msra.gmra.mxu1 %vm692_vm7, %v642_v56 }
 0x307   : > { %1797 = vmatpush3.bf16.xpose.msra.mxu1 %v838_v59  ;;  %1798 = vmatprep.mubr.msk.bf16.mxu1 %vm2322_vm0, %v2321_v4 }
 0x308   : > { %1808 = vmatprep.subr.bf16.mxu1 %v2321_v4 }
 0x30e   : > { %1799 = vmatmul.mubr.msk.bf16.vlgmr.msra.gmra.mxu1 %vm692_vm7, %v643_v62 }
 0x30f   : > { %1810 = vmatprep.mubr.msk.bf16.mxu1 %vm2322_vm0, %v2321_v4 }
 0x347   : > { %v733_v7 = vpop.f32.mrf.mxu1 }
 0x348   : > { %v881_v8 = vmul.f32 0.17677669, %v733_v7 }
 0x349   : > { %v1782_v9 = vpop.f32.mrf.mxu1 }
 0x34a   : > { %v889_v10 = vadd.f32 %v881_v8, %v618_v5 }
 0x34b   : > { %v736_v12 = vpop.f32.mrf.mxu1 }
 0x34c   : > { %v882_v43 = vmul.f32 0.17677669, %v736_v12  ;;  %v898_v13 = vsel %vm897_vm8, %v889_v10, -inf }
 0x34d   : > { %899 = vmax.xlane.f32.xlu0 %v898_v13  ;;  %v1783_v14 = vpop.f32.mrf.mxu1 }
 0x34e   : > { %v890_v15 = vadd.f32 %v882_v43, %v619_v11 }
 0x350   : > { %v901_v45 = vsel %vm897_vm8, %v890_v15, -inf }
 0x351   : > { %902 = vmax.xlane.f32.xlu1 %v901_v45 }
 0x3be   : > { %v780_v16 = vpop.f32.mrf.mxu1 }
 0x3bf   : > { %v883_v17 = vmul.f32 0.17677669, %v780_v16 }
 0x3c0   : > { %v1788_v18 = vpop.f32.mrf.mxu1 }
 0x3c1   : > { %v891_v19 = vadd.f32 %v883_v17, %v618_v5 }
 0x3c2   : > { %v783_v20 = vpop.f32.mrf.mxu1 }
 0x3c3   : > { %v884_v21 = vmul.f32 0.17677669, %v783_v20  ;;  %v904_v22 = vsel %vm897_vm8, %v891_v19, -inf }
 0x3c4   : > { %905 = vmax.xlane.f32.xlu0 %v904_v22  ;;  %v1789_v23 = vpop.f32.mrf.mxu1 }
 0x3c5   : > { %v892_v24 = vadd.f32 %v884_v21, %v619_v11 }
 0x3c6   : > { %v827_v25 = vpop.f32.mrf.mxu1 }
 0x3c7   : > { %v885_v26 = vmul.f32 0.17677669, %v827_v25  ;;  %v907_v27 = vsel %vm897_vm8, %v892_v24, -inf }
 0x3c8   : > { %908 = vmax.xlane.f32.xlu0 %v907_v27  ;;  %v1794_v28 = vpop.f32.mrf.mxu1 }
 0x3c9   : > { %v893_v31 = vadd.f32 %v885_v26, %v618_v5 }
 0x3ca   : > { %v830_v32 = vpop.f32.mrf.mxu1 }
 0x3cb   : > { %v886_v33 = vmul.f32 0.17677669, %v830_v32  ;;  %v910_v34 = vsel %vm897_vm8, %v893_v31, -inf }
 0x3cc   : > { %911 = vmax.xlane.f32.xlu0 %v910_v34  ;;  %v1795_v35 = vpop.f32.mrf.mxu1 }
 0x3cd   : > { %v894_v37 = vadd.f32 %v886_v33, %v619_v11 }
 0x3ce   : > { %v874_v38 = vpop.f32.mrf.mxu1 }
 0x3cf   : > { %v887_v39 = vmul.f32 0.17677669, %v874_v38  ;;  %v913_v40 = vsel %vm897_vm8, %v894_v37, -inf }
 0x3d0   : > { %914 = vmax.xlane.f32.xlu1 %v913_v40  ;;  %v1800_v41 = vpop.f32.mrf.mxu1 }
 0x3d1   : > { %v895_v42 = vadd.f32 %v887_v39, %v618_v5 }
 0x3d2   : > { %v877_v44 = vpop.f32.mrf.mxu1 }
 0x3d3   : > { %v888_v46 = vmul.f32 0.17677669, %v877_v44  ;;  %v916_v47 = vsel %vm897_vm8, %v895_v42, -inf }
 0x3d4   : > { %917 = vmax.xlane.f32.xlu0 %v916_v47  ;;  %v1801_v48 = vpop.f32.mrf.mxu1 }
 0x3d5   : > { %v2665_v50 = vadd.f32 %v888_v46, %v619_v11 }
 0x3d6   : > { %v900_v49 = vpop.xlane.xlu0 %899 }
 0x3d7   : > { %v922_v51 = vsub.f32 %v889_v10, %v900_v49  ;;  %v919_v52 = vsel %vm897_vm8, %v2665_v50, -inf }
 0x3d8   : > { %920 = vmax.xlane.f32.xlu1 %v919_v52 }
 0x3d9   : > { %v930_v54 = vmul.f32 1.442695, %v922_v51 }
 0x3da   : > { %v903_v55 = vpop.xlane.xlu1 %902 }
 0x3db   : > { %2091 = vpow2.f32 %v930_v54  ;;  %v923_v56 = vsub.f32 %v890_v15, %v903_v55 }
 0x3dd   : > { %v932_v58 = vmul.f32 1.442695, %v923_v56 }
 0x3df   : > { %2093 = vpow2.f32 %v932_v58 }
 0x3e8   : > { %v2092_v59 = vpop.eup %2091 }
 0x3e9   : > { %v946_v60 = vsel %vm897_vm8, %v2092_v59, 0.0 }
 0x3ea   : > { %947 = vadd.xlane.f32.xlu0 %v946_v60 }
 0x3ec   : > { %v2094_v61 = vpop.eup %2093 }
 0x3ed   : > { %v949_v62 = vsel %vm897_vm8, %v2094_v61, 0.0 }
 0x3ee   : > { %950 = vadd.xlane.f32.xlu1 %v949_v62 }
 0x44d   : > { %v906_v2 = vpop.xlane.xlu0 %905 }
 0x44e   : > { %v924_v5 = vsub.f32 %v891_v19, %v906_v2 }
 0x450   : > { %v934_v6 = vmul.f32 1.442695, %v924_v5 }
 0x451   : > { %v909_v7 = vpop.xlane.xlu0 %908 }
 0x452   : > { %2095 = vpow2.f32 %v934_v6  ;;  %v925_v8 = vsub.f32 %v892_v24, %v909_v7 }
 0x454   : > { %v936_v9 = vmul.f32 1.442695, %v925_v8 }
 0x455   : > { %v912_v10 = vpop.xlane.xlu0 %911 }
 0x456   : > { %2097 = vpow2.f32 %v936_v9  ;;  %v926_v11 = vsub.f32 %v893_v31, %v912_v10 }
 0x458   : > { %v938_v12 = vmul.f32 1.442695, %v926_v11 }
 0x459   : > { %v915_v43 = vpop.xlane.xlu1 %914 }
 0x45a   : > { %2099 = vpow2.f32 %v938_v12  ;;  %v927_v13 = vsub.f32 %v894_v37, %v915_v43 }
 0x45c   : > { %v940_v14 = vmul.f32 1.442695, %v927_v13  ;;  %v2019_v13 = vld [vmem:[#allocation8 + $0x15c] ss:$24 sps:$4 sm:$0xff]  }
 0x45d   : > { %v918_v15 = vpop.xlane.xlu0 %917 }
 0x45e   : > { %2101 = vpow2.f32 %v940_v14  ;;  %v928_v45 = vsub.f32 %v895_v42, %v918_v15  ;;  %v2025_v15 = vld [vmem:[#allocation8 + $0x12c] ss:$24 sps:$4 sm:$0xff]  }
 0x45f   : > { %v2096_v16 = vpop.eup %2095 }
 0x460   : > { %v942_v17 = vmul.f32 1.442695, %v928_v45  ;;  %v952_v18 = vsel %vm897_vm8, %v2096_v16, 0.0  ;;  %v2031_v45 = vld [vmem:[#allocation8 + $0xfc] ss:$24 sps:$4 sm:$0xff]  }
 0x461   : > { %953 = vadd.xlane.f32.xlu0 %v952_v18  ;;  %v921_v27 = vpop.xlane.xlu1 %920  ;;  %v2049_v18 = vld [vmem:[#allocation8 + $0x6c] ss:$24 sps:$4 sm:$0xff]  }
 0x462   : > { %2103 = vpow2.f32 %v942_v17  ;;  %v929_v39 = vsub.f32 %v2665_v50, %v921_v27  ;;  %v2043_v17 = vld [vmem:[#allocation8 + $0x9c] ss:$24 sps:$4 sm:$0xff]  }
 0x463   : > { %v2098_v19 = vpop.eup %2097 }
 0x464   : > { %v955_v20 = vsel %vm897_vm8, %v2098_v19, 0.0  ;;  %v944_v41 = vmul.f32 1.442695, %v929_v39 }
 0x465   : > { %956 = vadd.xlane.f32.xlu1 %v955_v20  ;;  %v2061_v20 = vld [vmem:[#allocation8 + $0xc] ss:$24 sps:$4 sm:$0xff]  }
 0x467   : > { %v2100_v21 = vpop.eup %2099 }
 0x468   : > { %v958_v22 = vsel %vm897_vm8, %v2100_v21, 0.0 }
 0x469   : > { %959 = vadd.xlane.f32.xlu0 %v958_v22 }
 0x46b   : > { %v2102_v23 = vpop.eup %2101 }
 0x46c   : > { %v961_v24 = vsel %vm897_vm8, %v2102_v23, 0.0 }
 0x46d   : > { %962 = vadd.xlane.f32.xlu1 %v961_v24 }
 0x46f   : > { %v2675_v25 = vpop.eup %2103 }
 0x470   : > { %v964_v26 = vsel %vm897_vm8, %v2675_v25, 0.0 }
 0x471   : > { %965 = vadd.xlane.f32.xlu0 %v964_v26 }
 0x473   : > { %v948_v28 = vpop.xlane.xlu0 %947 }
 0x474   : > { %2105 = vrcp.f32 %v948_v28 }
 0x477   : > { %v951_v31 = vpop.xlane.xlu1 %950 }
 0x478   : > { %2107 = vrcp.f32 %v951_v31 }
 0x479   : > { %2109 = vpow2.f32 %v944_v41 }
 0x47e   : > { %2006 = vrot.lane.b32.xlu1 %v2621_v30, %s2325_s29 }
 0x481   : > { %v2106_v32 = vpop.eup %2105 }
 0x482   : > { %v978_v33 = vmul.f32 %v2106_v32, %v2092_v59 }
 0x484   : > { %v986_v37 = vmul.f32 %v978_v33, %v2649_v1 }
 0x485   : > { %v2108_v34 = vpop.eup %2107 }
 0x486   : > { %v979_v35 = vmul.f32 %v2108_v34, %v2094_v61  ;;  %v2689_v42 = vpop.eup %2109 }
 0x487   : > { %2001 = vrot.lane.b32.xlu0 %v2621_v30, %s2324_s21  ;;  %v967_v44 = vsel %vm897_vm8, %v2689_v42, 0.0 }
 0x488   : > { %v987_v38 = vmul.f32 %v979_v35, %v2655_v3 }
 0x48a   : > { %v994_v40 = vpack.c.bf16 %v987_v38, %v986_v37 }
 0x48c   : > { %1805 = vmatmul.mubr.msk.bf16.vlgmr.msra.gmra.mxu0 %vm897_vm8, %v994_v40 }
 0x48d   : > { %1816 = vmatprep.mubr.msk.bf16.mxu0 %vm2322_vm0, %v2321_v4 }
 0x4a2   : > { %968 = vadd.xlane.f32.xlu1 %v967_v44 }
 0x4b3   : > { %2011 = vrot.lane.b32.xlu1 %v2621_v30, %s2326_s30 }
 0x4ea   : > { %v954_v46 = vpop.xlane.xlu0 %953 }
 0x4eb   : > { %2111 = vrcp.f32 %v954_v46 }
 0x4ee   : > { %v957_v47 = vpop.xlane.xlu1 %956 }
 0x4ef   : > { %2113 = vrcp.f32 %v957_v47 }
 0x4f2   : > { %v960_v48 = vpop.xlane.xlu0 %959 }
 0x4f3   : > { %2115 = vrcp.f32 %v960_v48 }
 0x4f6   : > { %v963_v49 = vpop.xlane.xlu1 %962 }
 0x4f7   : > { %2117 = vrcp.f32 %v963_v49 }
 0x4f8   : > { %v2112_v52 = vpop.eup %2111 }
 0x4f9   : > { %v980_v60 = vmul.f32 %v2112_v52, %v2096_v16  ;;  %v2037_v16 = vld [vmem:[#allocation8 + $0xcc] ss:$24 sps:$4 sm:$0xff]  }
 0x4fa   : > { %v966_v50 = vpop.xlane.xlu0 %965  ;;  %v2007_v51 = vpop.permute.xlu1 %2006 }
 0x4fb   : > { %v2009_v54 = vunpack.i.h.bf16 %v2007_v51  ;;  %v2008_v55 = vunpack.i.l.bf16 %v2007_v51  ;;  %v988_v7 = vmul.f32 %v980_v60, %v2649_v1  ;;  %2119 = vrcp.f32 %v966_v50 }
 0x4fc   : > { %v2114_v56 = vpop.eup %2113 }
 0x4fd   : > { %v981_v58 = vmul.f32 %v2114_v56, %v2098_v19  ;;  %v690_v59 = vpack.c.bf16 %v2009_v54, %v2008_v55  ;;  %v2055_v19 = vld [vmem:[#allocation8 + $0x3c] ss:$24 sps:$4 sm:$0xff]  }
 0x4fe   : > { %v2002_v61 = vpop.permute.xlu0 %2001 }
 0x4ff   : > { %v2004_v62 = vunpack.i.h.bf16 %v2002_v61  ;;  %v2003_v30 = vunpack.i.l.bf16 %v2002_v61  ;;  %1815 = vmatpush3.bf16.msra.mxu0 %v690_v59  ;;  %v989_v5 = vmul.f32 %v981_v58, %v2655_v3 }
 0x500   : > { %v2116_v2 = vpop.eup %2115  ;;  %1826 = vmatprep.subr.bf16.mxu0 %v2321_v4 }
 0x501   : > { %v689_v6 = vpack.c.bf16 %v2004_v62, %v2003_v30  ;;  %v982_v8 = vmul.f32 %v2116_v2, %v2100_v21  ;;  %v995_v10 = vpack.c.bf16 %v989_v5, %v988_v7  ;;  %v1214_v30 = vsub.s32 7, %v2565_v29 }
 0x503   : > { %1809 = vmatpush3.bf16.msra.mxu1 %v689_v6  ;;  %v990_v12 = vmul.f32 %v982_v8, %v2649_v1  ;;  %v1215_v2 = vrot.slane %v2593_v53, %v1214_v30 }
 0x504   : > { %v2118_v9 = vpop.eup %2117  ;;  %1820 = vmatprep.subr.bf16.mxu1 %v2321_v4 }
 0x505   : > { %v983_v11 = vmul.f32 %v2118_v9, %v2102_v23 }
 0x506   : > { %1811 = vmatmul.mubr.msk.bf16.vlgmr.msra.gmra.mxu1 %vm897_vm8, %v995_v10 }
 0x507   : > { %v991_v43 = vmul.f32 %v983_v11, %v2655_v3  ;;  %1822 = vmatprep.mubr.msk.bf16.mxu1 %vm2322_vm0, %v2321_v4 }
 0x508   : > { %v2120_v27 = vpop.eup %2119 }
 0x509   : > { %v996_v14 = vpack.c.bf16 %v991_v43, %v990_v12  ;;  %v984_v28 = vmul.f32 %v2120_v27, %v2675_v25  ;;  %v2063_v43 = vld [vmem:[#allocation8 + $0x160] ss:$24 sps:$4 sm:$0xff]   ;;  %v2080_v27 = vld [vmem:[#allocation8 + $0x134] ss:$24 sps:$4 sm:$0xff]  }
 0x50b   : > { %1817 = vmatmul.mubr.msk.bf16.vlgmr.msra.gmra.mxu0 %vm897_vm8, %v996_v14  ;;  %v992_v33 = vmul.f32 %v984_v28, %v2649_v1  ;;  %v2081_v28 = vld [vmem:[#allocation8 + $0x104] ss:$24 sps:$4 sm:$0xff]  }
 0x50c   : > { %1827 = vmatpush3.bf16.msra.mxu0 %v2019_v13  ;;  %1842 = vmatprep.mubr.msk.bf16.mxu0 %vm2322_vm0, %v2321_v4 }
 0x50d   : > { %1828 = vmatprep.subr.bf16.mxu0 %v2321_v4 }
 0x510   : > { %1829 = vmatpush3.bf16.msra.mxu0 %v2025_v15 }
 0x511   : > { %1830 = vmatprep.subr.bf16.mxu0 %v2321_v4 }
 0x514   : > { %1831 = vmatpush3.bf16.msra.mxu0 %v2031_v45 }
 0x515   : > { %1832 = vmatprep.subr.bf16.mxu0 %v2321_v4 }
 0x518   : > { %1833 = vmatpush3.bf16.msra.mxu0 %v2037_v16 }
 0x519   : > { %1834 = vmatprep.subr.bf16.mxu0 %v2321_v4 }
 0x51c   : > { %1835 = vmatpush3.bf16.msra.mxu0 %v2043_v17 }
 0x51d   : > { %1836 = vmatprep.subr.bf16.mxu0 %v2321_v4 }
 0x520   : > { %1837 = vmatpush3.bf16.msra.mxu0 %v2049_v18 }
 0x521   : > { %1838 = vmatprep.subr.bf16.mxu0 %v2321_v4 }
 0x524   : > { %1839 = vmatpush3.bf16.msra.mxu0 %v2055_v19  ;;  %v2065_v19 = vld [vmem:[#allocation8 + $0x130] ss:$24 sps:$4 sm:$0xff]  }
 0x525   : > { %1840 = vmatprep.subr.bf16.mxu0 %v2321_v4 }
 0x528   : > { %1841 = vmatpush3.bf16.msra.mxu0 %v2061_v20  ;;  %v2069_v20 = vld [vmem:[#allocation8 + $0xd0] ss:$24 sps:$4 sm:$0xff]  }
 0x529   : > { %1866 = vmatprep.subr.bf16.mxu0 %v2321_v4 }
 0x52b   : > { %v969_v21 = vpop.xlane.xlu1 %968 }
 0x52c   : > { %2121 = vrcp.f32 %v969_v21  ;;  %v2071_v21 = vld [vmem:[#allocation8 + $0xa0] ss:$24 sps:$4 sm:$0xff]  }
 0x52f   : > { %v2012_v22 = vpop.permute.xlu1 %2011 }
 0x530   : > { %v2014_v23 = vunpack.i.h.bf16 %v2012_v22  ;;  %v2013_v24 = vunpack.i.l.bf16 %v2012_v22  ;;  %v2073_v22 = vld [vmem:[#allocation8 + $0x70] ss:$24 sps:$4 sm:$0xff]  }
 0x532   : > { %v691_v26 = vpack.c.bf16 %v2014_v23, %v2013_v24  ;;  %v2075_v23 = vld [vmem:[#allocation8 + $0x40] ss:$24 sps:$4 sm:$0xff]   ;;  %v2077_v24 = vld [vmem:[#allocation8 + $0x10] ss:$24 sps:$4 sm:$0xff]  }
 0x534   : > { %1821 = vmatpush3.bf16.msra.mxu1 %v691_v26  ;;  %v2079_v26 = vld [vmem:[#allocation8 + $0x164] ss:$24 sps:$4 sm:$0xff]  }
 0x535   : > { %1846 = vmatprep.subr.bf16.mxu1 %v2321_v4 }
 0x539   : > { %v2122_v31 = vpop.eup %2121 }
 0x53a   : > { %v985_v32 = vmul.f32 %v2122_v31, %v2689_v42  ;;  %v2082_v31 = vld [vmem:[#allocation8 + $0xd4] ss:$24 sps:$4 sm:$0xff]  }
 0x53c   : > { %v993_v34 = vmul.f32 %v985_v32, %v2655_v3  ;;  %v2083_v32 = vld [vmem:[#allocation8 + $0xa4] ss:$24 sps:$4 sm:$0xff]  }
 0x53e   : > { %v997_v35 = vpack.c.bf16 %v993_v34, %v992_v33 }
 0x540   : > { %1823 = vmatmul.mubr.msk.bf16.vlgmr.msra.gmra.mxu1 %vm897_vm8, %v997_v35 }
 0x541   : > { %1862 = vmatprep.mubr.msk.bf16.mxu1 %vm2322_vm0, %v2321_v4  ;;  %1847 = vmatpush3.bf16.msra.mxu1 %v2063_v43 }
 0x542   : > { %1848 = vmatprep.subr.bf16.mxu1 %v2321_v4 }
 0x545   : > { %1849 = vmatpush3.bf16.msra.mxu1 %v2065_v19 }
 0x546   : > { %1850 = vmatprep.subr.bf16.mxu1 %v2321_v4 }
 0x54c   : > { %v1035_v37 = vpop.f32.mrf.mxu0 }
 0x54d   : > { %1174 = vst.msk [vmem:[#allocation2] sm:$0xff] %vm692_vm7, %v1035_v37 }
 0x54e   : > { %v1806_v38 = vpop.f32.mrf.mxu0 }
 0x550   : > { %v1038_v39 = vpop.f32.mrf.mxu0 }
 0x551   : > { %1175 = vst.msk [vmem:[#allocation2 + $0x8] sm:$0xff] %vm692_vm7, %v1038_v39 }
 0x552   : > { %v1807_v25 = vpop.f32.mrf.mxu0 }
 0x553   : > { %v1315_v25 = vsub.s32 2, %v2565_v29 }
 0x5c6   : > { %v1079_v40 = vpop.f32.mrf.mxu1 }
 0x5c7   : > { %1178 = vrot.lane.b32.xlu1 %v1079_v40, %s2326_s30 }
 0x5c8   : > { %v1812_v1 = vpop.f32.mrf.mxu1 }
 0x5ca   : > { %v1082_v41 = vpop.f32.mrf.mxu1 }
 0x5cb   : > { %1180 = vrot.lane.b32.xlu0 %v1082_v41, %s2326_s30  ;;  %v1123_v3 = vpop.f32.mrf.mxu0  ;;  %v1316_v41 = vrot.slane %v2593_v53, %v1315_v25 }
 0x5cc   : > { %v1813_v42 = vpop.f32.mrf.mxu1  ;;  %1189 = vrot.lane.b32.xlu1 %v1123_v3, %s2325_s29  ;;  %v1321_v3 = vsub.s32 3, %v2565_v29 }
 0x5cd   : > { %v1818_v44 = vpop.f32.mrf.mxu0 }
 0x5cf   : > { %v1126_v46 = vpop.f32.mrf.mxu0 }
 0x5d0   : > { %1191 = vrot.lane.b32.xlu0 %v1126_v46, %s2325_s29 }
 0x5d1   : > { %v1819_v47 = vpop.f32.mrf.mxu0 }
 0x5d2   : > { %v1322_v47 = vrot.slane %v2593_v53, %v1321_v3 }
 0x600   : > { %v1167_v48 = vpop.f32.mrf.mxu1 }
 0x601   : > { %1200 = vrot.lane.b32.xlu1 %v1167_v48, %s2324_s21 }
 0x602   : > { %v1824_v49 = vpop.f32.mrf.mxu1 }
 0x604   : > { %v1170_v50 = vpop.f32.mrf.mxu1 }
 0x605   : > { %1202 = vrot.lane.b32.xlu0 %v1170_v50, %s2324_s21 }
 0x606   : > { %v1825_v51 = vpop.f32.mrf.mxu1 }
 0x639   : > { %v1179_v52 = vpop.permute.xlu1 %1178 }
 0x63a   : > { %1185 = vst.msk [vmem:[#allocation2] sm:$0xff] %vm1184_vm9, %v1179_v52  ;;  %v2084_v52 = vld [vmem:[#allocation8 + $0x74] ss:$24 sps:$4 sm:$0xff]  }
 0x63d   : > { %v1181_v54 = vpop.permute.xlu0 %1180 }
 0x63e   : > { %1186 = vst.msk [vmem:[#allocation2 + $0x8] sm:$0xff] %vm1184_vm9, %v1181_v54  ;;  %v1190_v55 = vpop.permute.xlu1 %1189  ;;  %v2085_v54 = vld [vmem:[#allocation8 + $0x44] ss:$24 sps:$4 sm:$0xff]  }
 0x63f   : > { %1196 = vst.msk [vmem:[#allocation2] sm:$0xff] %vm1195_vm10, %v1190_v55  ;;  %v2086_v55 = vld [vmem:[#allocation8 + $0x14] ss:$24 sps:$4 sm:$0xff]  }
 0x642   : > { %v1192_v56 = vpop.permute.xlu0 %1191 }
 0x643   : > { %1197 = vst.msk [vmem:[#allocation2 + $0x8] sm:$0xff] %vm1195_vm10, %v1192_v56  ;;  %v332_v56 = vld [vmem:[#allocation9 + $0x8] sm:$0x3] }
 0x673   : > { %v1201_v58 = vpop.permute.xlu1 %1200 }
 0x674   : > { %1207 = vst.msk [vmem:[#allocation2] sm:$0xff] %vm1206_vm11, %v1201_v58  ;;  %v1329_v58 = vrot.slane %v332_v56, %v2574_v36 }
 0x677   : > { %v1203_v59 = vpop.permute.xlu0 %1202 }
 0x678   : > { %1208 = vst.msk [vmem:[#allocation2 + $0x8] sm:$0xff] %vm1206_vm11, %v1203_v59 }
 0x67b   : > { %v1209_v60 = vld [vmem:[#allocation2] sm:$0xff] }
 0x67f   : > { %v1210_v61 = vld [vmem:[#allocation2 + $0x8] sm:$0xff] }
 0x680   : > { %v1211_v62 = vpack.c.bf16 %v1210_v61, %v1209_v60 }
 0x682   : > { %1843 = vmatmul.mubr.bf16.vlgmr.msra.gmra.mxu0 %v1211_v62 }
 0x683   : > { %1882 = vmatprep.mubr.msk.bf16.mxu0 %vm2322_vm0, %v2321_v4  ;;  %1867 = vmatpush3.bf16.msra.mxu0 %v2079_v26 }
 0x684   : > { %1868 = vmatprep.subr.bf16.mxu0 %v2321_v4 }
 0x687   : > { %1869 = vmatpush3.bf16.msra.mxu0 %v2080_v27 }
 0x688   : > { %1870 = vmatprep.subr.bf16.mxu0 %v2321_v4 }
 0x68b   : > { %1871 = vmatpush3.bf16.msra.mxu0 %v2081_v28 }
 0x68c   : > { %1872 = vmatprep.subr.bf16.mxu0 %v2321_v4 }
 0x68f   : > { %1873 = vmatpush3.bf16.msra.mxu0 %v2082_v31 }
 0x690   : > { %1874 = vmatprep.subr.bf16.mxu0 %v2321_v4 }
 0x693   : > { %1875 = vmatpush3.bf16.msra.mxu0 %v2083_v32 }
 0x694   : > { %1876 = vmatprep.subr.bf16.mxu0 %v2321_v4 }
 0x697   : > { %1877 = vmatpush3.bf16.msra.mxu0 %v2084_v52 }
 0x698   : > { %1878 = vmatprep.subr.bf16.mxu0 %v2321_v4 }
 0x69b   : > { %1879 = vmatpush3.bf16.msra.mxu0 %v2085_v54 }
 0x69c   : > { %1880 = vmatprep.subr.bf16.mxu0 %v2321_v4 }
 0x69f   : > { %1881 = vmatpush3.bf16.msra.mxu0 %v2086_v55 }
 0x742   : > { %v1282_v5 = vpop.f32.mrf.mxu0 }
 0x743   : > { %v1283_v6 = vadd.f32 %v1282_v5, %v1215_v2 }
 0x744   : > { %v1844_v7 = vpop.f32.mrf.mxu0 }
 0x745   : > { %v1289_v8 = vadd.f32 %v1283_v6, %v2603_v63 }
 0x746   : > { %v1285_v9 = vpop.f32.mrf.mxu0 }
 0x747   : > { %v1286_v10 = vadd.f32 %v1285_v9, %v1215_v2  ;;  %1291 = vadd.xlane.f32.xlu1 %v1289_v8 }
 0x748   : > { %v1845_v11 = vpop.f32.mrf.mxu0 }
 0x749   : > { %v1290_v12 = vadd.f32 %v1286_v10, %v2605_v0  ;;  %v2067_v0 = vld [vmem:[#allocation8 + $0x100] ss:$24 sps:$4 sm:$0xff]  }
 0x74a   : > { %1851 = vmatpush3.bf16.msra.mxu1 %v2067_v0 }
 0x74b   : > { %1293 = vadd.xlane.f32.xlu0 %v1290_v12  ;;  %1852 = vmatprep.subr.bf16.mxu1 %v2321_v4 }
 0x74e   : > { %1853 = vmatpush3.bf16.msra.mxu1 %v2069_v20 }
 0x74f   : > { %1854 = vmatprep.subr.bf16.mxu1 %v2321_v4 }
 0x752   : > { %1855 = vmatpush3.bf16.msra.mxu1 %v2071_v21 }
 0x753   : > { %1856 = vmatprep.subr.bf16.mxu1 %v2321_v4 }
 0x756   : > { %1857 = vmatpush3.bf16.msra.mxu1 %v2073_v22 }
 0x757   : > { %1858 = vmatprep.subr.bf16.mxu1 %v2321_v4 }
 0x75a   : > { %1859 = vmatpush3.bf16.msra.mxu1 %v2075_v23 }
 0x75b   : > { %1860 = vmatprep.subr.bf16.mxu1 %v2321_v4  ;;  %v1425_v4 = vrot.slane %v332_v56, %v364_v57 }
 0x75e   : > { %1861 = vmatpush3.bf16.msra.mxu1 %v2077_v24 }
 0x7d0   : > { %v1292_v13 = vpop.xlane.xlu1 %1291 }
 0x7d1   : > { %v1295_v14 = vmul.f32 0.0078125, %v1292_v13 }
 0x7d3   : > { %v1297_v15 = vsub.f32 %v1289_v8, %v1295_v14 }
 0x7d4   : > { %v1294_v45 = vpop.xlane.xlu0 %1293 }
 0x7d5   : > { %v1296_v16 = vmul.f32 0.0078125, %v1294_v45  ;;  %v1299_v17 = vmul.f32 %v1297_v15, %v1297_v15 }
 0x7d7   : > { %v1298_v18 = vsub.f32 %v1290_v12, %v1296_v16  ;;  %1301 = vadd.xlane.f32.xlu0 %v1299_v17 }
 0x7d9   : > { %v1300_v63 = vmul.f32 %v1298_v18, %v1298_v18 }
 0x7db   : > { %1303 = vadd.xlane.f32.xlu0 %v1300_v63 }
 0x860   : > { %v1302_v33 = vpop.xlane.xlu0 %1301 }
 0x861   : > { %v1305_v34 = vmul.f32 0.0078125, %v1302_v33 }
 0x863   : > { %v1307_v35 = vadd.f32 1e-05, %v1305_v34 }
 0x864   : > { %v1304_v37 = vpop.xlane.xlu0 %1303 }
 0x865   : > { %2123 = vrsqrt.f32 %v1307_v35  ;;  %v1306_v38 = vmul.f32 0.0078125, %v1304_v37 }
 0x867   : > { %v1308_v39 = vadd.f32 1e-05, %v1306_v38 }
 0x869   : > { %2125 = vrsqrt.f32 %v1308_v39 }
 0x872   : > { %v2124_v40 = vpop.eup %2123 }
 0x873   : > { %v1311_v1 = vmul.f32 %v2124_v40, %v1297_v15 }
 0x875   : > { %v1317_v46 = vmul.f32 %v1316_v41, %v1311_v1 }
 0x876   : > { %v2126_v42 = vpop.eup %2125 }
 0x877   : > { %v1312_v44 = vmul.f32 %v2126_v42, %v1298_v18  ;;  %v1323_v49 = vadd.f32 %v1322_v47, %v1317_v46 }
 0x879   : > { %v1318_v48 = vmul.f32 %v1316_v41, %v1312_v44 }
 0x87b   : > { %v1324_v50 = vadd.f32 %v1322_v47, %v1318_v48 }
 0x87d   : > { %v1325_v51 = vpack.c.bf16 %v1324_v50, %v1323_v49 }
 0x87f   : > { %1863 = vmatmul.mubr.bf16.vlgmr.msra.gmra.mxu1 %v1325_v51 }
 0x93f   : > { %v1412_v53 = vpop.f32.mrf.mxu1 }
 0x940   : > { %v1413_v60 = vadd.f32 %v1412_v53, %v1329_v58 }
 0x941   : > { %v1864_v59 = vpop.f32.mrf.mxu1 }
 0x942   : > { %v1419_v2 = vmax.f32 %v1413_v60, 0.0 }
 0x943   : > { %v1415_v61 = vpop.f32.mrf.mxu1 }
 0x944   : > { %v1416_v62 = vadd.f32 %v1415_v61, %v1329_v58 }
 0x945   : > { %v1865_v30 = vpop.f32.mrf.mxu1 }
 0x946   : > { %v1420_v5 = vmax.f32 %v1416_v62, 0.0 }
 0x948   : > { %v1421_v6 = vpack.c.bf16 %v1420_v5, %v1419_v2 }
 0x94a   : > { %1883 = vmatmul.mubr.bf16.vlgmr.msra.gmra.mxu0 %v1421_v6 }
 0xa0a   : > { %v1492_v7 = vpop.f32.mrf.mxu0 }
 0xa0b   : > { %v1493_v8 = vadd.f32 %v1492_v7, %v1425_v4 }
 0xa0c   : > { %v1884_v36 = vpop.f32.mrf.mxu0 }
 0xa0d   : > { %v1499_v9 = vadd.f32 %v1493_v8, %v1323_v49 }
 0xa0e   : > { %v1495_v10 = vpop.f32.mrf.mxu0 }
 0xa0f   : > { %1501 = vst [vmem:[%s278_s6] sm:$0xff] %v1499_v9  ;;  %v1496_v11 = vadd.f32 %v1495_v10, %v1425_v4 }
 0xa10   : > { %v1885_v29 = vpop.f32.mrf.mxu0 }
 0xa11   : > { %v1500_v57 = vadd.f32 %v1496_v11, %v1324_v50 }
 0xa13   : > { %1502 = vst [vmem:[%s278_s6 + $0x8] sm:$0xff] %v1500_v57 }
 0xa14   : > { %2248 = shalt.err (!%p2245_p7)
}
 0xa15   : > { %s2249_s3 = scalar_lea.hbm %s2766_s26, 256  ;;  %s2253_s23 = scalar_lea.hbm %s2813_s4, 512 }
 0xa16   : > { %p2250_p10 = scmp.ne.s32.totalorder %s2766_s26, %s2249_s3  ;;  %p2254_p11 = scmp.lt.s32.totalorder %s2766_s26, %s2813_s4 }
 0xa17   : > { %p2255_p2 = scmp.lt.s32.totalorder %s2253_s23, %s2249_s3 }
 0xa18   : > { %p2251_p0 = pnand %p2250_p10, %p2842_p3 }
 0xa19   : > { %p2256_p6 = por %p2255_p2, %p2254_p11 }
 0xa1a   : > { %p2252_p8 = pneg %p2251_p0 }
 0xa1c   : > { %p2257_p12 = pnand %p2256_p6, %p2252_p8 }
 0xa1e   : > { %2260 = shalt.err (!%p2257_p12)
}
 0xa1f   : > { %s2328_s21 = smov 128   ;;  %s2329_s29 = smov 8  }
 0xa20   : > { %1898 = dma.vmem_to_hbm [thread:$0]  (%p2842_p3), %s2761_s20, 256, %s2766_s26, %s1504_s5, %s2328_s21, %s2328_s21, %s2329_s29  }
 0xa21 PF: > { %s1532_s30 = sand.u32 1, %s2299_s15   ;;  %p2843_p9 = scmp.ne.s32.totalorder %s2822_s22, 0 }
 0xa22   : > { %p2844_p13 = scmp.ge.s32.totalorder %s2311_s18, 2  ;;  %s1533_s6 = scalar_lea.sflag [#allocation5], %s1532_s30 }
 0xa24   : > { %p1915_p5 = pnand %p2844_p13, %p2843_p9 }
 0xa26   : > { %p1916_p1 = pneg %p1915_p5 }
 0xa28   : > { %2294 = dma.done.wait (%p1916_p1), %s1533_s6, 256  }
 0xa29   : > { %2296 = vsyncadd (%p1916_p1), %s1533_s6, 4294967040  ;;  %p21_p4 = scmp.ge.s32.totalorder %s2430_s13, 4   ;;  %s2845_s15 = smov %s2303_s16 }
 0xa2a   : > { %s2846_s16 = smov %s2307_s17  ;;  %s2847_s17 = smov %s2439_s24 }
 0xa2b   : > { %s2848_s18 = smov %s2430_s13  ;;  %23 = sbr.rel (!%p21_p4) target bundleno = 12 (0xc), region = 102 }
 0xa30   :  { %1538 = vsyncpa [#allocation4], 1 }
 0xa31   :  { %1540 = vsyncpa [#allocation4 + $0x1], 1 }
 0xa32   :  { %1541 = vsyncpa [#allocation7], 1 }
 0xa33   :  { %1543 = vsyncpa [#allocation7 + $0x1], 1 }
 0xa34   :  { %1544 = vsyncpa [#allocation10], 1 }
 0xa35   :  { %1545 = vsyncpa [#allocation5], 1 }
 0xa36   :  { %1547 = vsyncpa [#allocation5 + $0x1], 1 }

</bundles_post_ra>
